<compile_context>
chip_gen: v6e
topology: v6e:2x2x1
jax: 0.10.0
libtpu: 0.0.40
codegen_flags: <defaults>
</compile_context>

<pallas_src>
import functools

import jax
import jax.numpy as jnp
from jax import lax
from jax.experimental import pallas as pl
from jax.experimental.pallas import tpu as pltpu


def _gru_chunk_kernel(gi_ref, bhn_ref, whh_hbm_ref, h_ref, whh_vmem,
                      *, seq_len, t_chunk, hidden, fused, mask_tail, unroll):
    """One grid step == one chunk of `t_chunk` GRU time steps.

    gi already contains x @ W_ih^T + b_ih (+ b_hr, b_hz folded in).  The
    hidden state lives in the VMEM-resident output block (constant output
    block index across the grid).  Recurrent weights are DMA'd from HBM into
    a single-buffered VMEM scratch once, at chunk 0, and stay resident.
    """
    c = pl.program_id(0)

    @pl.when(c == 0)
    def _():
        h_ref[...] = jnp.zeros_like(h_ref)
        # Single-buffered constant weights: one DMA for the whole call.
        pltpu.sync_copy(whh_hbm_ref, whh_vmem)

    H = hidden
    # Hoist the (1,H)->(B,H) broadcast of b_hn out of the serial loop
    # (JAX does not CSE broadcast_in_dim).
    b_hn = jnp.broadcast_to(bhn_ref[...], h_ref.shape)
    base = c * t_chunk

    if fused:
        whh = whh_vmem[...]                       # (H, 3H)
        wdt = whh.dtype

        def step(t, h):
            hd = h.astype(wdt)
            gh = jnp.dot(hd, whh, preferred_element_type=jnp.float32)  # (B,3H)
            gi = gi_ref[t]                        # (B, 3H)
            r = jax.nn.sigmoid(gi[:, :H] + gh[:, :H])
            z = jax.nn.sigmoid(gi[:, H:2 * H] + gh[:, H:2 * H])
            n = jnp.tanh(gi[:, 2 * H:] + r * (gh[:, 2 * H:] + b_hn))
            h_new = (1.0 - z) * n + z * h
            if mask_tail:
                h_new = jnp.where(base + t < seq_len, h_new, h)
            return h_new
    else:
        # Per-gate (H,H) weights stacked on the leading axis: no lane slicing.
        w_r = whh_vmem[0]
        w_z = whh_vmem[1]
        w_n = whh_vmem[2]
        wdt = w_r.dtype

        def step(t, h):
            hd = h.astype(wdt)
            hr = jnp.dot(hd, w_r, preferred_element_type=jnp.float32)
            hz = jnp.dot(hd, w_z, preferred_element_type=jnp.float32)
            hn = jnp.dot(hd, w_n, preferred_element_type=jnp.float32)
            g = gi_ref[t]                         # (3, B, H)
            r = jax.nn.sigmoid(g[0] + hr)
            z = jax.nn.sigmoid(g[1] + hz)
            n = jnp.tanh(g[2] + r * (hn + b_hn))
            h_new = (1.0 - z) * n + z * h
            if mask_tail:
                h_new = jnp.where(base + t < seq_len, h_new, h)
            return h_new

    h_ref[...] = lax.fori_loop(0, t_chunk, step, h_ref[...], unroll=unroll)


def text_encoder_rnn(x, w_ih, w_hh, b_ih, b_hh, *, t_chunk=None,
                     weight_dtype=jnp.float32):
    """x: (seq_len, batch, cnn_dim); returns (batch, embed_dim) == flattened h_n.

    Weights use PyTorch nn.GRU layout:
      w_ih: (3H, cnn_dim), w_hh: (3H, H), b_ih/b_hh: (3H,), gate order [r,z,n].
    """
    seq_len, batch, cnn_dim = x.shape
    H = w_hh.shape[1]

    # Sublane-pad the batch so (B, H) operands fill vreg sublanes.
    b_pad = ((batch + 7) // 8) * 8

    # ---- Hoisted, time-independent input projection (one big MXU matmul, XLA).
    # Fold all of b_ih plus the r/z parts of b_hh; only b_hn must stay inside
    # the r * (W_hn h + b_hn) term.
    b_fold = (b_ih + jnp.concatenate(
        [b_hh[:H], b_hh[H:2 * H], jnp.zeros((H,), b_hh.dtype)])).astype(jnp.float32)
    x_p = jnp.pad(x, ((0, 0), (0, b_pad - batch), (0, 0))) if b_pad != batch else x
    gi = jnp.einsum("tbc,gc->tbg", x_p, w_ih).astype(jnp.float32) + b_fold  # (T,Bp,3H)

    fused = (H % 128 == 0)

    # ---- t_chunk from a conservative VMEM budget (double-buffered gi stream
    # dominates); fits the explicit 32 MiB scoped limit on v5e/v6e/v7x.
    gi_bytes_per_step = 2 * 3 * H * b_pad * 4            # double buffer, f32
    budget = 12 * 1024 * 1024
    if t_chunk is None:
        t_chunk = max(1, min(seq_len, budget // gi_bytes_per_step, 256))
    t_chunk = max(1, min(t_chunk, seq_len))
    num_chunks = pl.cdiv(seq_len, t_chunk)
    t_padded = num_chunks * t_chunk
    mask_tail = (t_padded != seq_len)
    if mask_tail:
        gi = jnp.pad(gi, ((0, t_padded - seq_len), (0, 0), (0, 0)))

    if fused:
        # One (B,H)@(H,3H) matmul per step; gate slices at 128-lane boundaries.
        gi_in = gi                                                   # (T,Bp,3H)
        whh = w_hh.T.astype(weight_dtype)                            # (H, 3H)
        gi_spec = pl.BlockSpec((t_chunk, b_pad, 3 * H), lambda c: (c, 0, 0))
    else:
        # Gate axis moved to a leading dim: (T,3,Bp,H) gi and (3,H,H) weights.
        gi_in = jnp.transpose(gi.reshape(t_padded, b_pad, 3, H), (0, 2, 1, 3))
        whh = jnp.stack([w_hh[:H].T, w_hh[H:2 * H].T,
                         w_hh[2 * H:].T]).astype(weight_dtype)       # (3, H, H)
        gi_spec = pl.BlockSpec((t_chunk, 3, b_pad, H), lambda c: (c, 0, 0, 0))

    b_hn = b_hh[2 * H:].reshape(1, H).astype(jnp.float32)

    kernel = functools.partial(
        _gru_chunk_kernel, seq_len=seq_len, t_chunk=t_chunk, hidden=H,
        fused=fused, mask_tail=mask_tail, unroll=min(8, t_chunk))

    grid_spec = pltpu.PrefetchScalarGridSpec(
        num_scalar_prefetch=0,
        grid=(num_chunks,),
        in_specs=[
            gi_spec,                                                 # gi stream
            pl.BlockSpec((1, H), lambda c: (0, 0)),                  # b_hn
            pl.BlockSpec(memory_space=pl.ANY),                       # W_hh (HBM)
        ],
        out_specs=pl.BlockSpec((b_pad, H), lambda c: (0, 0)),
        scratch_shapes=[pltpu.VMEM(whh.shape, whh.dtype)],           # 1x weights
    )

    h_n = pl.pallas_call(
        kernel,
        out_shape=jax.ShapeDtypeStruct((b_pad, H), jnp.float32),
        grid_spec=grid_spec,
        compiler_params=pltpu.CompilerParams(
            dimension_semantics=("arbitrary",),
            vmem_limit_bytes=32 * 1024 * 1024),
    )(gi_in, b_hn, whh)

    # h_n.transpose(0,1).view(batch, -1) with num_layers==1 is just (batch, H).
    return h_n[:batch]


def _gru_reference(x, w_ih, w_hh, b_ih, b_hh):
    """Pure-JAX reference (PyTorch GRU equations)."""
    _, batch, _ = x.shape
    H = w_hh.shape[1]
    h0 = jnp.zeros((batch, H), jnp.float32)

    def step(h, xt):
        gi = xt @ w_ih.T + b_ih
        gh = h @ w_hh.T + b_hh
        i_r, i_z, i_n = gi[:, :H], gi[:, H:2 * H], gi[:, 2 * H:]
        h_r, h_z, h_n = gh[:, :H], gh[:, H:2 * H], gh[:, 2 * H:]
        r = jax.nn.sigmoid(i_r + h_r)
        z = jax.nn.sigmoid(i_z + h_z)
        n = jnp.tanh(i_n + r * h_n)
        return (1.0 - z) * n + z * h, None

    h_n, _ = lax.scan(step, h0, x)
    return h_n   # (batch, H) == transpose(h_n,0,1).view(batch, -1)


if __name__ == "__main__":
    # Make the XLA-side reference / projection use full-precision f32 matmuls.
    jax.config.update("jax_default_matmul_precision", "highest")

    seq_len, batch, cnn_dim, embed_dim = 8, 4, 16, 32

    key = jax.random.PRNGKey(0)
    kx, k1, k2, k3, k4 = jax.random.split(key, 5)

    scale = 1.0 / jnp.sqrt(jnp.float32(embed_dim))
    w_ih = jax.random.uniform(k1, (3 * embed_dim, cnn_dim), jnp.float32, -scale, scale)
    w_hh = jax.random.uniform(k2, (3 * embed_dim, embed_dim), jnp.float32, -scale, scale)
    b_ih = jax.random.uniform(k3, (3 * embed_dim,), jnp.float32, -scale, scale)
    b_hh = jax.random.uniform(k4, (3 * embed_dim,), jnp.float32, -scale, scale)
    x = jax.random.normal(kx, (seq_len, batch, cnn_dim), jnp.float32)

    ref = jax.block_until_ready(_gru_reference(x, w_ih, w_hh, b_ih, b_hh))

    # Split-gate path (H % 128 != 0), single chunk, static unrolled loop.
    out = jax.block_until_ready(text_encoder_rnn(x, w_ih, w_hh, b_ih, b_hh))
    assert out.shape == (batch, embed_dim)
    assert jnp.allclose(out, ref, atol=5e-3, rtol=5e-3), "mismatch (single chunk)"

    # Multi-chunk path with a remainder chunk (exercises masked tail steps).
    out2 = jax.block_until_ready(
        text_encoder_rnn(x, w_ih, w_hh, b_ih, b_hh, t_chunk=3))
    assert jnp.allclose(out2, ref, atol=5e-3, rtol=5e-3), "mismatch (chunked)"

    # Fused-gate path (H % 128 == 0): one (B,H)@(H,3H) matmul per step.
    H2 = 128
    kw1, kw2, kw3, kw4 = jax.random.split(jax.random.PRNGKey(1), 4)
    scale2 = 1.0 / jnp.sqrt(jnp.float32(H2))
    w_ih2 = jax.random.uniform(kw1, (3 * H2, cnn_dim), jnp.float32, -scale2, scale2)
    w_hh2 = jax.random.uniform(kw2, (3 * H2, H2), jnp.float32, -scale2, scale2)
    b_ih2 = jax.random.uniform(kw3, (3 * H2,), jnp.float32, -scale2, scale2)
    b_hh2 = jax.random.uniform(kw4, (3 * H2,), jnp.float32, -scale2, scale2)
    ref2 = jax.block_until_ready(_gru_reference(x, w_ih2, w_hh2, b_ih2, b_hh2))
    out3 = jax.block_until_ready(text_encoder_rnn(x, w_ih2, w_hh2, b_ih2, b_hh2))
    assert out3.shape == (batch, H2)
    assert jnp.allclose(out3, ref2, atol=5e-3, rtol=5e-3), "mismatch (fused)"

    print("KERNEL_OK")
</pallas_src>

<mosaic_0001>
module attributes {stable_mosaic.version = 11 : i64} {
  func.func @_gru_chunk_kernel(%arg0: i32, %arg1: memref<8x3x8x32xf32, #tpu.memory_space<vmem>>, %arg2: memref<1x32xf32, #tpu.memory_space<vmem>>, %arg3: memref<3x32x32xf32, #tpu.memory_space<any>>, %arg4: memref<8x32xf32, #tpu.memory_space<vmem>>, %arg5: memref<3x32x32xf32, #tpu.memory_space<vmem>>) attributes {dimension_semantics = [#tpu.dimension_semantics<arbitrary>], iteration_bounds = array<i64: 1>, scalar_prefetch = 0 : i64, scratch_operands = 1 : i64, tpu.core_type = #tpu.core_type<tc>, window_params = [{transform_indices = @transform_0, window_bounds = array<i64: 8, 3, 8, 32>}, {pipeline_mode = #tpu.pipeline_mode<synchronous>, transform_indices = @transform_1, window_bounds = array<i64: 1, 32>}, {}, {pipeline_mode = #tpu.pipeline_mode<synchronous>, transform_indices = @transform_3, window_bounds = array<i64: 8, 32>}]} {
    %c0_i32 = arith.constant 0 : i32
    %0 = arith.cmpi eq, %arg0, %c0_i32 : i32
    %1 = arith.extui %0 : i1 to i32
    %c0_i32_0 = arith.constant 0 : i32
    %2 = arith.cmpi ne, %1, %c0_i32_0 : i32
    scf.if %2 {
      %cst_85 = arith.constant 0.000000e+00 : f32
      %278 = vector.broadcast %cst_85 : f32 to vector<8x32xf32>
      %c0_86 = arith.constant 0 : index
      %c0_87 = arith.constant 0 : index
      %279 = vector.load %arg4[%c0_86, %c0_87] : memref<8x32xf32, #tpu.memory_space<vmem>>, vector<8x32xf32>
      tpu.vector_store %arg4[%c0_86, %c0_87], %278 {strides = array<i32>} : memref<8x32xf32, #tpu.memory_space<vmem>>, vector<8x32xf32>,
      "tpu.region"() ({
        %280 = tpu.sem_alloc : memref<!tpu.dma_semaphore, #tpu.memory_space<semaphore_mem>>
        tpu.enqueue_dma source(%arg3 : memref<3x32x32xf32, #tpu.memory_space<any>>) target(%arg5 : memref<3x32x32xf32, #tpu.memory_space<vmem>>) target_semaphore(%280 : memref<!tpu.dma_semaphore, #tpu.memory_space<semaphore_mem>>)
        tpu.wait_dma2 semaphore(%280 : memref<!tpu.dma_semaphore, #tpu.memory_space<semaphore_mem>>) src(%arg3 : memref<3x32x32xf32, #tpu.memory_space<any>>) dst(%arg5 : memref<3x32x32xf32, #tpu.memory_space<vmem>>)
        tpu.yield
      }) : () -> ()
    } else {
    }
    %c0 = arith.constant 0 : index
    %c0_1 = arith.constant 0 : index
    %3 = vector.load %arg2[%c0, %c0_1] : memref<1x32xf32, #tpu.memory_space<vmem>>, vector<1x32xf32>
    %4 = vector.shape_cast %3 : vector<1x32xf32> to vector<1x32xf32>
    %5 = vector.broadcast %4 : vector<1x32xf32> to vector<8x32xf32>
    %c0_2 = arith.constant 0 : index
    %c0_3 = arith.constant 0 : index
    %c0_4 = arith.constant 0 : index
    %6 = vector.load %arg5[%c0_2, %c0_3, %c0_4] : memref<3x32x32xf32, #tpu.memory_space<vmem>>, vector<1x32x32xf32>
    %7 = vector.shape_cast %6 : vector<1x32x32xf32> to vector<32x32xf32>
    %c1 = arith.constant 1 : index
    %c0_5 = arith.constant 0 : index
    %c0_6 = arith.constant 0 : index
    %8 = vector.load %arg5[%c1, %c0_5, %c0_6] : memref<3x32x32xf32, #tpu.memory_space<vmem>>, vector<1x32x32xf32>
    %9 = vector.shape_cast %8 : vector<1x32x32xf32> to vector<32x32xf32>
    %c2 = arith.constant 2 : index
    %c0_7 = arith.constant 0 : index
    %c0_8 = arith.constant 0 : index
    %10 = vector.load %arg5[%c2, %c0_7, %c0_8] : memref<3x32x32xf32, #tpu.memory_space<vmem>>, vector<1x32x32xf32>
    %11 = vector.shape_cast %10 : vector<1x32x32xf32> to vector<32x32xf32>
    %c0_9 = arith.constant 0 : index
    %c0_10 = arith.constant 0 : index
    %12 = vector.load %arg4[%c0_9, %c0_10] : memref<8x32xf32, #tpu.memory_space<vmem>>, vector<8x32xf32>
    %c0_i32_11 = arith.constant 0 : i32
    %cst = arith.constant dense<0.000000e+00> : vector<8x32xf32>
    %13 = tpu.matmul %12, %7, %cst {dimension_numbers = #tpu.dot_dimension_numbers<[1], [0], [0], [1], [0, 0, 1, 1], [], []>, precision = #tpu.contract_precision<fp32>} : vector<8x32xf32>, vector<32x32xf32>, vector<8x32xf32> -> vector<8x32xf32>
    %cst_12 = arith.constant dense<0.000000e+00> : vector<8x32xf32>
    %14 = tpu.matmul %12, %9, %cst_12 {dimension_numbers = #tpu.dot_dimension_numbers<[1], [0], [0], [1], [0, 0, 1, 1], [], []>, precision = #tpu.contract_precision<fp32>} : vector<8x32xf32>, vector<32x32xf32>, vector<8x32xf32> -> vector<8x32xf32>
    %cst_13 = arith.constant dense<0.000000e+00> : vector<8x32xf32>
    %15 = tpu.matmul %12, %11, %cst_13 {dimension_numbers = #tpu.dot_dimension_numbers<[1], [0], [0], [1], [0, 0, 1, 1], [], []>, precision = #tpu.contract_precision<fp32>} : vector<8x32xf32>, vector<32x32xf32>, vector<8x32xf32> -> vector<8x32xf32>
    %16 = arith.index_cast %c0_i32_11 : i32 to index
    %c0_14 = arith.constant 0 : index
    %c0_15 = arith.constant 0 : index
    %c0_16 = arith.constant 0 : index
    %17 = vector.load %arg1[%16, %c0_14, %c0_15, %c0_16] : memref<8x3x8x32xf32, #tpu.memory_space<vmem>>, vector<1x3x8x32xf32>
    %18 = vector.shape_cast %17 : vector<1x3x8x32xf32> to vector<3x8x32xf32>
    %19 = vector.extract_strided_slice %18 {offsets = [0, 0, 0], sizes = [1, 8, 32], strides = [1, 1, 1]} : vector<3x8x32xf32> to vector<1x8x32xf32>
    %20 = vector.shape_cast %19 : vector<1x8x32xf32> to vector<8x32xf32>
    %21 = arith.addf %20, %13 : vector<8x32xf32>
    %22 = arith.negf %21 : vector<8x32xf32>
    %23 = math.exp %22 : vector<8x32xf32>
    %cst_17 = arith.constant 1.000000e+00 : f32
    %24 = vector.broadcast %cst_17 : f32 to vector<8x32xf32>
    %25 = arith.addf %24, %23 : vector<8x32xf32>
    %26 = arith.divf %24, %25 : vector<8x32xf32>
    %27 = vector.extract_strided_slice %18 {offsets = [1, 0, 0], sizes = [1, 8, 32], strides = [1, 1, 1]} : vector<3x8x32xf32> to vector<1x8x32xf32>
    %28 = vector.shape_cast %27 : vector<1x8x32xf32> to vector<8x32xf32>
    %29 = arith.addf %28, %14 : vector<8x32xf32>
    %30 = arith.negf %29 : vector<8x32xf32>
    %31 = math.exp %30 : vector<8x32xf32>
    %cst_18 = arith.constant 1.000000e+00 : f32
    %32 = vector.broadcast %cst_18 : f32 to vector<8x32xf32>
    %33 = arith.addf %32, %31 : vector<8x32xf32>
    %34 = arith.divf %32, %33 : vector<8x32xf32>
    %35 = vector.extract_strided_slice %18 {offsets = [2, 0, 0], sizes = [1, 8, 32], strides = [1, 1, 1]} : vector<3x8x32xf32> to vector<1x8x32xf32>
    %36 = vector.shape_cast %35 : vector<1x8x32xf32> to vector<8x32xf32>
    %37 = arith.addf %15, %5 : vector<8x32xf32>
    %38 = arith.mulf %26, %37 : vector<8x32xf32>
    %39 = arith.addf %36, %38 : vector<8x32xf32>
    %40 = math.tanh %39 : vector<8x32xf32>
    %cst_19 = arith.constant 1.000000e+00 : f32
    %41 = vector.broadcast %cst_19 : f32 to vector<8x32xf32>
    %42 = arith.subf %41, %34 : vector<8x32xf32>
    %43 = arith.mulf %42, %40 : vector<8x32xf32>
    %44 = arith.mulf %34, %12 : vector<8x32xf32>
    %45 = arith.addf %43, %44 : vector<8x32xf32>
    %c1_i32 = arith.constant 1 : i32
    %cst_20 = arith.constant dense<0.000000e+00> : vector<8x32xf32>
    %46 = tpu.matmul %45, %7, %cst_20 {dimension_numbers = #tpu.dot_dimension_numbers<[1], [0], [0], [1], [0, 0, 1, 1], [], []>, precision = #tpu.contract_precision<fp32>} : vector<8x32xf32>, vector<32x32xf32>, vector<8x32xf32> -> vector<8x32xf32>
    %cst_21 = arith.constant dense<0.000000e+00> : vector<8x32xf32>
    %47 = tpu.matmul %45, %9, %cst_21 {dimension_numbers = #tpu.dot_dimension_numbers<[1], [0], [0], [1], [0, 0, 1, 1], [], []>, precision = #tpu.contract_precision<fp32>} : vector<8x32xf32>, vector<32x32xf32>, vector<8x32xf32> -> vector<8x32xf32>
    %cst_22 = arith.constant dense<0.000000e+00> : vector<8x32xf32>
    %48 = tpu.matmul %45, %11, %cst_22 {dimension_numbers = #tpu.dot_dimension_numbers<[1], [0], [0], [1], [0, 0, 1, 1], [], []>, precision = #tpu.contract_precision<fp32>} : vector<8x32xf32>, vector<32x32xf32>, vector<8x32xf32> -> vector<8x32xf32>
    %49 = arith.index_cast %c1_i32 : i32 to index
    %c0_23 = arith.constant 0 : index
    %c0_24 = arith.constant 0 : index
    %c0_25 = arith.constant 0 : index
    %50 = vector.load %arg1[%49, %c0_23, %c0_24, %c0_25] : memref<8x3x8x32xf32, #tpu.memory_space<vmem>>, vector<1x3x8x32xf32>
    %51 = vector.shape_cast %50 : vector<1x3x8x32xf32> to vector<3x8x32xf32>
    %52 = vector.extract_strided_slice %51 {offsets = [0, 0, 0], sizes = [1, 8, 32], strides = [1, 1, 1]} : vector<3x8x32xf32> to vector<1x8x32xf32>
    %53 = vector.shape_cast %52 : vector<1x8x32xf32> to vector<8x32xf32>
    %54 = arith.addf %53, %46 : vector<8x32xf32>
    %55 = arith.negf %54 : vector<8x32xf32>
    %56 = math.exp %55 : vector<8x32xf32>
    %cst_26 = arith.constant 1.000000e+00 : f32
    %57 = vector.broadcast %cst_26 : f32 to vector<8x32xf32>
    %58 = arith.addf %57, %56 : vector<8x32xf32>
    %59 = arith.divf %57, %58 : vector<8x32xf32>
    %60 = vector.extract_strided_slice %51 {offsets = [1, 0, 0], sizes = [1, 8, 32], strides = [1, 1, 1]} : vector<3x8x32xf32> to vector<1x8x32xf32>
    %61 = vector.shape_cast %60 : vector<1x8x32xf32> to vector<8x32xf32>
    %62 = arith.addf %61, %47 : vector<8x32xf32>
    %63 = arith.negf %62 : vector<8x32xf32>
    %64 = math.exp %63 : vector<8x32xf32>
    %cst_27 = arith.constant 1.000000e+00 : f32
    %65 = vector.broadcast %cst_27 : f32 to vector<8x32xf32>
    %66 = arith.addf %65, %64 : vector<8x32xf32>
    %67 = arith.divf %65, %66 : vector<8x32xf32>
    %68 = vector.extract_strided_slice %51 {offsets = [2, 0, 0], sizes = [1, 8, 32], strides = [1, 1, 1]} : vector<3x8x32xf32> to vector<1x8x32xf32>
    %69 = vector.shape_cast %68 : vector<1x8x32xf32> to vector<8x32xf32>
    %70 = arith.addf %48, %5 : vector<8x32xf32>
    %71 = arith.mulf %59, %70 : vector<8x32xf32>
    %72 = arith.addf %69, %71 : vector<8x32xf32>
    %73 = math.tanh %72 : vector<8x32xf32>
    %cst_28 = arith.constant 1.000000e+00 : f32
    %74 = vector.broadcast %cst_28 : f32 to vector<8x32xf32>
    %75 = arith.subf %74, %67 : vector<8x32xf32>
    %76 = arith.mulf %75, %73 : vector<8x32xf32>
    %77 = arith.mulf %67, %45 : vector<8x32xf32>
    %78 = arith.addf %76, %77 : vector<8x32xf32>
    %c2_i32 = arith.constant 2 : i32
    %cst_29 = arith.constant dense<0.000000e+00> : vector<8x32xf32>
    %79 = tpu.matmul %78, %7, %cst_29 {dimension_numbers = #tpu.dot_dimension_numbers<[1], [0], [0], [1], [0, 0, 1, 1], [], []>, precision = #tpu.contract_precision<fp32>} : vector<8x32xf32>, vector<32x32xf32>, vector<8x32xf32> -> vector<8x32xf32>
    %cst_30 = arith.constant dense<0.000000e+00> : vector<8x32xf32>
    %80 = tpu.matmul %78, %9, %cst_30 {dimension_numbers = #tpu.dot_dimension_numbers<[1], [0], [0], [1], [0, 0, 1, 1], [], []>, precision = #tpu.contract_precision<fp32>} : vector<8x32xf32>, vector<32x32xf32>, vector<8x32xf32> -> vector<8x32xf32>
    %cst_31 = arith.constant dense<0.000000e+00> : vector<8x32xf32>
    %81 = tpu.matmul %78, %11, %cst_31 {dimension_numbers = #tpu.dot_dimension_numbers<[1], [0], [0], [1], [0, 0, 1, 1], [], []>, precision = #tpu.contract_precision<fp32>} : vector<8x32xf32>, vector<32x32xf32>, vector<8x32xf32> -> vector<8x32xf32>
    %82 = arith.index_cast %c2_i32 : i32 to index
    %c0_32 = arith.constant 0 : index
    %c0_33 = arith.constant 0 : index
    %c0_34 = arith.constant 0 : index
    %83 = vector.load %arg1[%82, %c0_32, %c0_33, %c0_34] : memref<8x3x8x32xf32, #tpu.memory_space<vmem>>, vector<1x3x8x32xf32>
    %84 = vector.shape_cast %83 : vector<1x3x8x32xf32> to vector<3x8x32xf32>
    %85 = vector.extract_strided_slice %84 {offsets = [0, 0, 0], sizes = [1, 8, 32], strides = [1, 1, 1]} : vector<3x8x32xf32> to vector<1x8x32xf32>
    %86 = vector.shape_cast %85 : vector<1x8x32xf32> to vector<8x32xf32>
    %87 = arith.addf %86, %79 : vector<8x32xf32>
    %88 = arith.negf %87 : vector<8x32xf32>
    %89 = math.exp %88 : vector<8x32xf32>
    %cst_35 = arith.constant 1.000000e+00 : f32
    %90 = vector.broadcast %cst_35 : f32 to vector<8x32xf32>
    %91 = arith.addf %90, %89 : vector<8x32xf32>
    %92 = arith.divf %90, %91 : vector<8x32xf32>
    %93 = vector.extract_strided_slice %84 {offsets = [1, 0, 0], sizes = [1, 8, 32], strides = [1, 1, 1]} : vector<3x8x32xf32> to vector<1x8x32xf32>
    %94 = vector.shape_cast %93 : vector<1x8x32xf32> to vector<8x32xf32>
    %95 = arith.addf %94, %80 : vector<8x32xf32>
    %96 = arith.negf %95 : vector<8x32xf32>
    %97 = math.exp %96 : vector<8x32xf32>
    %cst_36 = arith.constant 1.000000e+00 : f32
    %98 = vector.broadcast %cst_36 : f32 to vector<8x32xf32>
    %99 = arith.addf %98, %97 : vector<8x32xf32>
    %100 = arith.divf %98, %99 : vector<8x32xf32>
    %101 = vector.extract_strided_slice %84 {offsets = [2, 0, 0], sizes = [1, 8, 32], strides = [1, 1, 1]} : vector<3x8x32xf32> to vector<1x8x32xf32>
    %102 = vector.shape_cast %101 : vector<1x8x32xf32> to vector<8x32xf32>
    %103 = arith.addf %81, %5 : vector<8x32xf32>
    %104 = arith.mulf %92, %103 : vector<8x32xf32>
    %105 = arith.addf %102, %104 : vector<8x32xf32>
    %106 = math.tanh %105 : vector<8x32xf32>
    %cst_37 = arith.constant 1.000000e+00 : f32
    %107 = vector.broadcast %cst_37 : f32 to vector<8x32xf32>
    %108 = arith.subf %107, %100 : vector<8x32xf32>
    %109 = arith.mulf %108, %106 : vector<8x32xf32>
    %110 = arith.mulf %100, %78 : vector<8x32xf32>
    %111 = arith.addf %109, %110 : vector<8x32xf32>
    %c3_i32 = arith.constant 3 : i32
    %cst_38 = arith.constant dense<0.000000e+00> : vector<8x32xf32>
    %112 = tpu.matmul %111, %7, %cst_38 {dimension_numbers = #tpu.dot_dimension_numbers<[1], [0], [0], [1], [0, 0, 1, 1], [], []>, precision = #tpu.contract_precision<fp32>} : vector<8x32xf32>, vector<32x32xf32>, vector<8x32xf32> -> vector<8x32xf32>
    %cst_39 = arith.constant dense<0.000000e+00> : vector<8x32xf32>
    %113 = tpu.matmul %111, %9, %cst_39 {dimension_numbers = #tpu.dot_dimension_numbers<[1], [0], [0], [1], [0, 0, 1, 1], [], []>, precision = #tpu.contract_precision<fp32>} : vector<8x32xf32>, vector<32x32xf32>, vector<8x32xf32> -> vector<8x32xf32>
    %cst_40 = arith.constant dense<0.000000e+00> : vector<8x32xf32>
    %114 = tpu.matmul %111, %11, %cst_40 {dimension_numbers = #tpu.dot_dimension_numbers<[1], [0], [0], [1], [0, 0, 1, 1], [], []>, precision = #tpu.contract_precision<fp32>} : vector<8x32xf32>, vector<32x32xf32>, vector<8x32xf32> -> vector<8x32xf32>
    %115 = arith.index_cast %c3_i32 : i32 to index
    %c0_41 = arith.constant 0 : index
    %c0_42 = arith.constant 0 : index
    %c0_43 = arith.constant 0 : index
    %116 = vector.load %arg1[%115, %c0_41, %c0_42, %c0_43] : memref<8x3x8x32xf32, #tpu.memory_space<vmem>>, vector<1x3x8x32xf32>
    %117 = vector.shape_cast %116 : vector<1x3x8x32xf32> to vector<3x8x32xf32>
    %118 = vector.extract_strided_slice %117 {offsets = [0, 0, 0], sizes = [1, 8, 32], strides = [1, 1, 1]} : vector<3x8x32xf32> to vector<1x8x32xf32>
    %119 = vector.shape_cast %118 : vector<1x8x32xf32> to vector<8x32xf32>
    %120 = arith.addf %119, %112 : vector<8x32xf32>
    %121 = arith.negf %120 : vector<8x32xf32>
    %122 = math.exp %121 : vector<8x32xf32>
    %cst_44 = arith.constant 1.000000e+00 : f32
    %123 = vector.broadcast %cst_44 : f32 to vector<8x32xf32>
    %124 = arith.addf %123, %122 : vector<8x32xf32>
    %125 = arith.divf %123, %124 : vector<8x32xf32>
    %126 = vector.extract_strided_slice %117 {offsets = [1, 0, 0], sizes = [1, 8, 32], strides = [1, 1, 1]} : vector<3x8x32xf32> to vector<1x8x32xf32>
    %127 = vector.shape_cast %126 : vector<1x8x32xf32> to vector<8x32xf32>
    %128 = arith.addf %127, %113 : vector<8x32xf32>
    %129 = arith.negf %128 : vector<8x32xf32>
    %130 = math.exp %129 : vector<8x32xf32>
    %cst_45 = arith.constant 1.000000e+00 : f32
    %131 = vector.broadcast %cst_45 : f32 to vector<8x32xf32>
    %132 = arith.addf %131, %130 : vector<8x32xf32>
    %133 = arith.divf %131, %132 : vector<8x32xf32>
    %134 = vector.extract_strided_slice %117 {offsets = [2, 0, 0], sizes = [1, 8, 32], strides = [1, 1, 1]} : vector<3x8x32xf32> to vector<1x8x32xf32>
    %135 = vector.shape_cast %134 : vector<1x8x32xf32> to vector<8x32xf32>
    %136 = arith.addf %114, %5 : vector<8x32xf32>
    %137 = arith.mulf %125, %136 : vector<8x32xf32>
    %138 = arith.addf %135, %137 : vector<8x32xf32>
    %139 = math.tanh %138 : vector<8x32xf32>
    %cst_46 = arith.constant 1.000000e+00 : f32
    %140 = vector.broadcast %cst_46 : f32 to vector<8x32xf32>
    %141 = arith.subf %140, %133 : vector<8x32xf32>
    %142 = arith.mulf %141, %139 : vector<8x32xf32>
    %143 = arith.mulf %133, %111 : vector<8x32xf32>
    %144 = arith.addf %142, %143 : vector<8x32xf32>
    %c4_i32 = arith.constant 4 : i32
    %cst_47 = arith.constant dense<0.000000e+00> : vector<8x32xf32>
    %145 = tpu.matmul %144, %7, %cst_47 {dimension_numbers = #tpu.dot_dimension_numbers<[1], [0], [0], [1], [0, 0, 1, 1], [], []>, precision = #tpu.contract_precision<fp32>} : vector<8x32xf32>, vector<32x32xf32>, vector<8x32xf32> -> vector<8x32xf32>
    %cst_48 = arith.constant dense<0.000000e+00> : vector<8x32xf32>
    %146 = tpu.matmul %144, %9, %cst_48 {dimension_numbers = #tpu.dot_dimension_numbers<[1], [0], [0], [1], [0, 0, 1, 1], [], []>, precision = #tpu.contract_precision<fp32>} : vector<8x32xf32>, vector<32x32xf32>, vector<8x32xf32> -> vector<8x32xf32>
    %cst_49 = arith.constant dense<0.000000e+00> : vector<8x32xf32>
    %147 = tpu.matmul %144, %11, %cst_49 {dimension_numbers = #tpu.dot_dimension_numbers<[1], [0], [0], [1], [0, 0, 1, 1], [], []>, precision = #tpu.contract_precision<fp32>} : vector<8x32xf32>, vector<32x32xf32>, vector<8x32xf32> -> vector<8x32xf32>
    %148 = arith.index_cast %c4_i32 : i32 to index
    %c0_50 = arith.constant 0 : index
    %c0_51 = arith.constant 0 : index
    %c0_52 = arith.constant 0 : index
    %149 = vector.load %arg1[%148, %c0_50, %c0_51, %c0_52] : memref<8x3x8x32xf32, #tpu.memory_space<vmem>>, vector<1x3x8x32xf32>
    %150 = vector.shape_cast %149 : vector<1x3x8x32xf32> to vector<3x8x32xf32>
    %151 = vector.extract_strided_slice %150 {offsets = [0, 0, 0], sizes = [1, 8, 32], strides = [1, 1, 1]} : vector<3x8x32xf32> to vector<1x8x32xf32>
    %152 = vector.shape_cast %151 : vector<1x8x32xf32> to vector<8x32xf32>
    %153 = arith.addf %152, %145 : vector<8x32xf32>
    %154 = arith.negf %153 : vector<8x32xf32>
    %155 = math.exp %154 : vector<8x32xf32>
    %cst_53 = arith.constant 1.000000e+00 : f32
    %156 = vector.broadcast %cst_53 : f32 to vector<8x32xf32>
    %157 = arith.addf %156, %155 : vector<8x32xf32>
    %158 = arith.divf %156, %157 : vector<8x32xf32>
    %159 = vector.extract_strided_slice %150 {offsets = [1, 0, 0], sizes = [1, 8, 32], strides = [1, 1, 1]} : vector<3x8x32xf32> to vector<1x8x32xf32>
    %160 = vector.shape_cast %159 : vector<1x8x32xf32> to vector<8x32xf32>
    %161 = arith.addf %160, %146 : vector<8x32xf32>
    %162 = arith.negf %161 : vector<8x32xf32>
    %163 = math.exp %162 : vector<8x32xf32>
    %cst_54 = arith.constant 1.000000e+00 : f32
    %164 = vector.broadcast %cst_54 : f32 to vector<8x32xf32>
    %165 = arith.addf %164, %163 : vector<8x32xf32>
    %166 = arith.divf %164, %165 : vector<8x32xf32>
    %167 = vector.extract_strided_slice %150 {offsets = [2, 0, 0], sizes = [1, 8, 32], strides = [1, 1, 1]} : vector<3x8x32xf32> to vector<1x8x32xf32>
    %168 = vector.shape_cast %167 : vector<1x8x32xf32> to vector<8x32xf32>
    %169 = arith.addf %147, %5 : vector<8x32xf32>
    %170 = arith.mulf %158, %169 : vector<8x32xf32>
    %171 = arith.addf %168, %170 : vector<8x32xf32>
    %172 = math.tanh %171 : vector<8x32xf32>
    %cst_55 = arith.constant 1.000000e+00 : f32
    %173 = vector.broadcast %cst_55 : f32 to vector<8x32xf32>
    %174 = arith.subf %173, %166 : vector<8x32xf32>
    %175 = arith.mulf %174, %172 : vector<8x32xf32>
    %176 = arith.mulf %166, %144 : vector<8x32xf32>
    %177 = arith.addf %175, %176 : vector<8x32xf32>
    %c5_i32 = arith.constant 5 : i32
    %cst_56 = arith.constant dense<0.000000e+00> : vector<8x32xf32>
    %178 = tpu.matmul %177, %7, %cst_56 {dimension_numbers = #tpu.dot_dimension_numbers<[1], [0], [0], [1], [0, 0, 1, 1], [], []>, precision = #tpu.contract_precision<fp32>} : vector<8x32xf32>, vector<32x32xf32>, vector<8x32xf32> -> vector<8x32xf32>
    %cst_57 = arith.constant dense<0.000000e+00> : vector<8x32xf32>
    %179 = tpu.matmul %177, %9, %cst_57 {dimension_numbers = #tpu.dot_dimension_numbers<[1], [0], [0], [1], [0, 0, 1, 1], [], []>, precision = #tpu.contract_precision<fp32>} : vector<8x32xf32>, vector<32x32xf32>, vector<8x32xf32> -> vector<8x32xf32>
    %cst_58 = arith.constant dense<0.000000e+00> : vector<8x32xf32>
    %180 = tpu.matmul %177, %11, %cst_58 {dimension_numbers = #tpu.dot_dimension_numbers<[1], [0], [0], [1], [0, 0, 1, 1], [], []>, precision = #tpu.contract_precision<fp32>} : vector<8x32xf32>, vector<32x32xf32>, vector<8x32xf32> -> vector<8x32xf32>
    %181 = arith.index_cast %c5_i32 : i32 to index
    %c0_59 = arith.constant 0 : index
    %c0_60 = arith.constant 0 : index
    %c0_61 = arith.constant 0 : index
    %182 = vector.load %arg1[%181, %c0_59, %c0_60, %c0_61] : memref<8x3x8x32xf32, #tpu.memory_space<vmem>>, vector<1x3x8x32xf32>
    %183 = vector.shape_cast %182 : vector<1x3x8x32xf32> to vector<3x8x32xf32>
    %184 = vector.extract_strided_slice %183 {offsets = [0, 0, 0], sizes = [1, 8, 32], strides = [1, 1, 1]} : vector<3x8x32xf32> to vector<1x8x32xf32>
    %185 = vector.shape_cast %184 : vector<1x8x32xf32> to vector<8x32xf32>
    %186 = arith.addf %185, %178 : vector<8x32xf32>
    %187 = arith.negf %186 : vector<8x32xf32>
    %188 = math.exp %187 : vector<8x32xf32>
    %cst_62 = arith.constant 1.000000e+00 : f32
    %189 = vector.broadcast %cst_62 : f32 to vector<8x32xf32>
    %190 = arith.addf %189, %188 : vector<8x32xf32>
    %191 = arith.divf %189, %190 : vector<8x32xf32>
    %192 = vector.extract_strided_slice %183 {offsets = [1, 0, 0], sizes = [1, 8, 32], strides = [1, 1, 1]} : vector<3x8x32xf32> to vector<1x8x32xf32>
    %193 = vector.shape_cast %192 : vector<1x8x32xf32> to vector<8x32xf32>
    %194 = arith.addf %193, %179 : vector<8x32xf32>
    %195 = arith.negf %194 : vector<8x32xf32>
    %196 = math.exp %195 : vector<8x32xf32>
    %cst_63 = arith.constant 1.000000e+00 : f32
    %197 = vector.broadcast %cst_63 : f32 to vector<8x32xf32>
    %198 = arith.addf %197, %196 : vector<8x32xf32>
    %199 = arith.divf %197, %198 : vector<8x32xf32>
    %200 = vector.extract_strided_slice %183 {offsets = [2, 0, 0], sizes = [1, 8, 32], strides = [1, 1, 1]} : vector<3x8x32xf32> to vector<1x8x32xf32>
    %201 = vector.shape_cast %200 : vector<1x8x32xf32> to vector<8x32xf32>
    %202 = arith.addf %180, %5 : vector<8x32xf32>
    %203 = arith.mulf %191, %202 : vector<8x32xf32>
    %204 = arith.addf %201, %203 : vector<8x32xf32>
    %205 = math.tanh %204 : vector<8x32xf32>
    %cst_64 = arith.constant 1.000000e+00 : f32
    %206 = vector.broadcast %cst_64 : f32 to vector<8x32xf32>
    %207 = arith.subf %206, %199 : vector<8x32xf32>
    %208 = arith.mulf %207, %205 : vector<8x32xf32>
    %209 = arith.mulf %199, %177 : vector<8x32xf32>
    %210 = arith.addf %208, %209 : vector<8x32xf32>
    %c6_i32 = arith.constant 6 : i32
    %cst_65 = arith.constant dense<0.000000e+00> : vector<8x32xf32>
    %211 = tpu.matmul %210, %7, %cst_65 {dimension_numbers = #tpu.dot_dimension_numbers<[1], [0], [0], [1], [0, 0, 1, 1], [], []>, precision = #tpu.contract_precision<fp32>} : vector<8x32xf32>, vector<32x32xf32>, vector<8x32xf32> -> vector<8x32xf32>
    %cst_66 = arith.constant dense<0.000000e+00> : vector<8x32xf32>
    %212 = tpu.matmul %210, %9, %cst_66 {dimension_numbers = #tpu.dot_dimension_numbers<[1], [0], [0], [1], [0, 0, 1, 1], [], []>, precision = #tpu.contract_precision<fp32>} : vector<8x32xf32>, vector<32x32xf32>, vector<8x32xf32> -> vector<8x32xf32>
    %cst_67 = arith.constant dense<0.000000e+00> : vector<8x32xf32>
    %213 = tpu.matmul %210, %11, %cst_67 {dimension_numbers = #tpu.dot_dimension_numbers<[1], [0], [0], [1], [0, 0, 1, 1], [], []>, precision = #tpu.contract_precision<fp32>} : vector<8x32xf32>, vector<32x32xf32>, vector<8x32xf32> -> vector<8x32xf32>
    %214 = arith.index_cast %c6_i32 : i32 to index
    %c0_68 = arith.constant 0 : index
    %c0_69 = arith.constant 0 : index
    %c0_70 = arith.constant 0 : index
    %215 = vector.load %arg1[%214, %c0_68, %c0_69, %c0_70] : memref<8x3x8x32xf32, #tpu.memory_space<vmem>>, vector<1x3x8x32xf32>
    %216 = vector.shape_cast %215 : vector<1x3x8x32xf32> to vector<3x8x32xf32>
    %217 = vector.extract_strided_slice %216 {offsets = [0, 0, 0], sizes = [1, 8, 32], strides = [1, 1, 1]} : vector<3x8x32xf32> to vector<1x8x32xf32>
    %218 = vector.shape_cast %217 : vector<1x8x32xf32> to vector<8x32xf32>
    %219 = arith.addf %218, %211 : vector<8x32xf32>
    %220 = arith.negf %219 : vector<8x32xf32>
    %221 = math.exp %220 : vector<8x32xf32>
    %cst_71 = arith.constant 1.000000e+00 : f32
    %222 = vector.broadcast %cst_71 : f32 to vector<8x32xf32>
    %223 = arith.addf %222, %221 : vector<8x32xf32>
    %224 = arith.divf %222, %223 : vector<8x32xf32>
    %225 = vector.extract_strided_slice %216 {offsets = [1, 0, 0], sizes = [1, 8, 32], strides = [1, 1, 1]} : vector<3x8x32xf32> to vector<1x8x32xf32>
    %226 = vector.shape_cast %225 : vector<1x8x32xf32> to vector<8x32xf32>
    %227 = arith.addf %226, %212 : vector<8x32xf32>
    %228 = arith.negf %227 : vector<8x32xf32>
    %229 = math.exp %228 : vector<8x32xf32>
    %cst_72 = arith.constant 1.000000e+00 : f32
    %230 = vector.broadcast %cst_72 : f32 to vector<8x32xf32>
    %231 = arith.addf %230, %229 : vector<8x32xf32>
    %232 = arith.divf %230, %231 : vector<8x32xf32>
    %233 = vector.extract_strided_slice %216 {offsets = [2, 0, 0], sizes = [1, 8, 32], strides = [1, 1, 1]} : vector<3x8x32xf32> to vector<1x8x32xf32>
    %234 = vector.shape_cast %233 : vector<1x8x32xf32> to vector<8x32xf32>
    %235 = arith.addf %213, %5 : vector<8x32xf32>
    %236 = arith.mulf %224, %235 : vector<8x32xf32>
    %237 = arith.addf %234, %236 : vector<8x32xf32>
    %238 = math.tanh %237 : vector<8x32xf32>
    %cst_73 = arith.constant 1.000000e+00 : f32
    %239 = vector.broadcast %cst_73 : f32 to vector<8x32xf32>
    %240 = arith.subf %239, %232 : vector<8x32xf32>
    %241 = arith.mulf %240, %238 : vector<8x32xf32>
    %242 = arith.mulf %232, %210 : vector<8x32xf32>
    %243 = arith.addf %241, %242 : vector<8x32xf32>
    %c7_i32 = arith.constant 7 : i32
    %cst_74 = arith.constant dense<0.000000e+00> : vector<8x32xf32>
    %244 = tpu.matmul %243, %7, %cst_74 {dimension_numbers = #tpu.dot_dimension_numbers<[1], [0], [0], [1], [0, 0, 1, 1], [], []>, precision = #tpu.contract_precision<fp32>} : vector<8x32xf32>, vector<32x32xf32>, vector<8x32xf32> -> vector<8x32xf32>
    %cst_75 = arith.constant dense<0.000000e+00> : vector<8x32xf32>
    %245 = tpu.matmul %243, %9, %cst_75 {dimension_numbers = #tpu.dot_dimension_numbers<[1], [0], [0], [1], [0, 0, 1, 1], [], []>, precision = #tpu.contract_precision<fp32>} : vector<8x32xf32>, vector<32x32xf32>, vector<8x32xf32> -> vector<8x32xf32>
    %cst_76 = arith.constant dense<0.000000e+00> : vector<8x32xf32>
    %246 = tpu.matmul %243, %11, %cst_76 {dimension_numbers = #tpu.dot_dimension_numbers<[1], [0], [0], [1], [0, 0, 1, 1], [], []>, precision = #tpu.contract_precision<fp32>} : vector<8x32xf32>, vector<32x32xf32>, vector<8x32xf32> -> vector<8x32xf32>
    %247 = arith.index_cast %c7_i32 : i32 to index
    %c0_77 = arith.constant 0 : index
    %c0_78 = arith.constant 0 : index
    %c0_79 = arith.constant 0 : index
    %248 = vector.load %arg1[%247, %c0_77, %c0_78, %c0_79] : memref<8x3x8x32xf32, #tpu.memory_space<vmem>>, vector<1x3x8x32xf32>
    %249 = vector.shape_cast %248 : vector<1x3x8x32xf32> to vector<3x8x32xf32>
    %250 = vector.extract_strided_slice %249 {offsets = [0, 0, 0], sizes = [1, 8, 32], strides = [1, 1, 1]} : vector<3x8x32xf32> to vector<1x8x32xf32>
    %251 = vector.shape_cast %250 : vector<1x8x32xf32> to vector<8x32xf32>
    %252 = arith.addf %251, %244 : vector<8x32xf32>
    %253 = arith.negf %252 : vector<8x32xf32>
    %254 = math.exp %253 : vector<8x32xf32>
    %cst_80 = arith.constant 1.000000e+00 : f32
    %255 = vector.broadcast %cst_80 : f32 to vector<8x32xf32>
    %256 = arith.addf %255, %254 : vector<8x32xf32>
    %257 = arith.divf %255, %256 : vector<8x32xf32>
    %258 = vector.extract_strided_slice %249 {offsets = [1, 0, 0], sizes = [1, 8, 32], strides = [1, 1, 1]} : vector<3x8x32xf32> to vector<1x8x32xf32>
    %259 = vector.shape_cast %258 : vector<1x8x32xf32> to vector<8x32xf32>
    %260 = arith.addf %259, %245 : vector<8x32xf32>
    %261 = arith.negf %260 : vector<8x32xf32>
    %262 = math.exp %261 : vector<8x32xf32>
    %cst_81 = arith.constant 1.000000e+00 : f32
    %263 = vector.broadcast %cst_81 : f32 to vector<8x32xf32>
    %264 = arith.addf %263, %262 : vector<8x32xf32>
    %265 = arith.divf %263, %264 : vector<8x32xf32>
    %266 = vector.extract_strided_slice %249 {offsets = [2, 0, 0], sizes = [1, 8, 32], strides = [1, 1, 1]} : vector<3x8x32xf32> to vector<1x8x32xf32>
    %267 = vector.shape_cast %266 : vector<1x8x32xf32> to vector<8x32xf32>
    %268 = arith.addf %246, %5 : vector<8x32xf32>
    %269 = arith.mulf %257, %268 : vector<8x32xf32>
    %270 = arith.addf %267, %269 : vector<8x32xf32>
    %271 = math.tanh %270 : vector<8x32xf32>
    %cst_82 = arith.constant 1.000000e+00 : f32
    %272 = vector.broadcast %cst_82 : f32 to vector<8x32xf32>
    %273 = arith.subf %272, %265 : vector<8x32xf32>
    %274 = arith.mulf %273, %271 : vector<8x32xf32>
    %275 = arith.mulf %265, %243 : vector<8x32xf32>
    %276 = arith.addf %274, %275 : vector<8x32xf32>
    %c8_i32 = arith.constant 8 : i32
    %c0_83 = arith.constant 0 : index
    %c0_84 = arith.constant 0 : index
    %277 = vector.load %arg4[%c0_83, %c0_84] : memref<8x32xf32, #tpu.memory_space<vmem>>, vector<8x32xf32>
    tpu.vector_store %arg4[%c0_83, %c0_84], %276 {strides = array<i32>} : memref<8x32xf32, #tpu.memory_space<vmem>>, vector<8x32xf32>,
    return
  }
  func.func @transform_0(%arg0: i32) -> (i32, i32, i32, i32) {
    %c0_i32 = arith.constant 0 : i32
    %c0_i32_0 = arith.constant 0 : i32
    %c0_i32_1 = arith.constant 0 : i32
    %c0_i32_2 = arith.constant 0 : i32
    return %arg0, %c0_i32, %c0_i32_0, %c0_i32_1 : i32, i32, i32, i32
  }
  func.func @transform_1(%arg0: i32) -> (i32, i32) {
    %c0_i32 = arith.constant 0 : i32
    %c0_i32_0 = arith.constant 0 : i32
    %c0_i32_1 = arith.constant 0 : i32
    return %c0_i32, %c0_i32_0 : i32, i32
  }
  func.func @transform_3(%arg0: i32) -> (i32, i32) {
    %c0_i32 = arith.constant 0 : i32
    %c0_i32_0 = arith.constant 0 : i32
    %c0_i32_1 = arith.constant 0 : i32
    return %c0_i32, %c0_i32_0 : i32, i32
  }
}

</mosaic_0001>

<bundles_post_ra>
// kernel: tpu_custom_call.1
= control target key start
LH: loop header
LB: loop body
LE: loop exit
PB: predicated region body
PF: predicated region fallthrough
CT: control target
= control target key end

     0   :  { %8 = vsyncpa [#allocation4], 0  ;;  %s16358_s0 = inlined_call_operand.hbm [shape: f32[8,3,8,32], index: 0, kind: input, shape index: {}]   ;;  %s16359_s1 = inlined_call_operand.vmem [shape: f32[1,32], index: 1, kind: input, shape index: {}]   ;;  %s16360_s2 = inlined_call_operand.hbm [shape: f32[3,32,32], index: 2, kind: input, shape index: {}]   ;;  %s16361_s3 = inlined_call_operand.hbm [shape: f32[8,32], index: 3, kind: output, shape index: {}]  }
   0x1   :  { %9 = vsyncpa [#allocation5], 0  ;;  %s14427_s12 = smov [#allocation3]  }
   0x2   :  { %s15_s13 = sshll.u32 %s14427_s12, 4  ;;  %s16_s13 = int_to_ptr.vmem [resolvable:$true] %s15_s13 }
   0x3   :  { %s14369_s14 = scalar_lea.vmem %s16_s13, 3072  ;;  %p14374_p1 = scmp.lt.s32.totalorder %s16_s13, %s16_s13 }
   0x4   :  { %p14370_p0 = scmp.ne.s32.totalorder %s16_s13, %s14369_s14  ;;  %p14375_p2 = scmp.lt.s32.totalorder %s14369_s14, %s14369_s14 }
   0x6   :  { %p14376_p3 = por %p14375_p2, %p14374_p1 }
   0x8   :  { %p14377_p4 = pnand %p14376_p3, %p14370_p0 }
   0xa   :  { %14380 = shalt.err (!%p14377_p4)
}
   0xb   :  { %s14428_s15 = smov 128   ;;  %s14429_s16 = smov 8  }
   0xc   :  { %21 = dma.hbm_to_vmem [thread:$0]  %s16358_s0, 3072, %s16_s13, [#allocation4], %s14428_s15, %s14428_s15, %s14429_s16  }
   0xd   :  { %14421 = dma.done.wait [#allocation4], 3072  }
   0xe   :  { %14422 = vsyncadd [#allocation4], 4294964224  ;;  %vm31_vm0 = vcmask 261120   ;;  %v16372_v0 = vmov 0.0  }
   0xf   :  { %32 = vst.msk [vmem:[#allocation6] sm:$0xff] %vm31_vm0, %v16372_v0 }
  0x10   :  { %s14431_s19 = smov [#allocation2]  }
  0x11   :  { %s40_s20 = sshll.u32 %s14431_s19, 4  ;;  %s41_s20 = int_to_ptr.vmem [resolvable:$true] %s40_s20 }
  0x12   :  { %s14389_s21 = scalar_lea.vmem %s41_s20, 1536  ;;  %p14394_p6 = scmp.lt.s32.totalorder %s41_s20, %s41_s20 }
  0x13   :  { %p14390_p5 = scmp.ne.s32.totalorder %s41_s20, %s14389_s21  ;;  %p14395_p7 = scmp.lt.s32.totalorder %s14389_s21, %s14389_s21 }
  0x15   :  { %p14396_p8 = por %p14395_p7, %p14394_p6 }
  0x17   :  { %p14397_p9 = pnand %p14396_p8, %p14390_p5 }
  0x19   :  { %14400 = shalt.err (!%p14397_p9)  }
  0x1a   :  { %43 = dma.hbm_to_vmem [thread:$0]  %s16360_s2, 1536, %s41_s20, [#allocation7] }
  0x1b   :  { %14423 = dma.done.wait [#allocation7], 1536 }
  0x1c   :  { %14424 = vsyncadd [#allocation7], 4294965760  ;;  %12687 = vmatprep.subr.mxu0 %v16372_v0  ;;  %v58_v1 = vld [vmem:[#allocation2 + $0x18] sm:$0xff]  ;;  %v57_v2 = vld [vmem:[#allocation2 + $0x10] sm:$0xff]  ;;  %12698 = vmatprep.subr.mxu1 %v16372_v0  ;;  %vm14432_vm1 = vmmov 0  }
  0x1d   :  { %v56_v3 = vld [vmem:[#allocation2 + $0x8] sm:$0xff]  ;;  %v14464_v4 = vand.u32 4294901760, %v58_v1  ;;  %v14466_v5 = vand.u32 4294901760, %v57_v2  ;;  %v55_v7 = vld [vmem:[#allocation2] sm:$0xff]  ;;  %12695 = vmatprep.mubr.msk.f32.mxu0 %vm14432_vm1, %v16372_v0  ;;  %12706 = vmatprep.mubr.msk.f32.mxu1 %vm14432_vm1, %v16372_v0  ;;  %v63_v32 = vld [vmem:[#allocation2 + $0x38] sm:$0xff] }
  0x1e   :  { %v14468_v6 = vand.u32 4294901760, %v56_v3  ;;  %v14472_v8 = vld [vmem:[#allocation6] sm:$0xff]  ;;  %v14476_v9 = vand.u32 4294901760, %v55_v7  ;;  %v14559_v33 = vand.u32 4294901760, %v63_v32  ;;  %v62_v34 = vld [vmem:[#allocation2 + $0x30] sm:$0xff]  ;;  %v61_v35 = vld [vmem:[#allocation2 + $0x28] sm:$0xff] }
  0x1f   :  { %v72_v10 = vsel %vm31_vm0, %v14472_v8, 0  ;;  %12688 = vmatpush3.msra.mxu0 %v14464_v4  ;;  %v14482_v11 = vsub.f32 %v58_v1, %v14464_v4  ;;  %v14487_v13 = vsub.f32 %v57_v2, %v14466_v5  ;;  %v14567_v36 = vand.u32 4294901760, %v62_v34  ;;  %v60_v37 = vld [vmem:[#allocation2 + $0x20] sm:$0xff]  ;;  %v68_v56 = vld [vmem:[#allocation2 + $0x58] sm:$0xff]  ;;  %v67_v58 = vld [vmem:[#allocation2 + $0x50] sm:$0xff] }
  0x20   :  { %v14484_v12 = vand.u32 4294901760, %v72_v10  ;;  %v14490_v14 = vsub.f32 %v56_v3, %v14468_v6  ;;  %12689 = vmatprep.subr.mxu0 %v16372_v0  ;;  %v14494_v15 = vsub.f32 %v55_v7, %v14476_v9  ;;  %v14572_v38 = vsub.f32 %v63_v32, %v14559_v33  ;;  %v66_v59 = vld [vmem:[#allocation2 + $0x48] sm:$0xff]  ;;  %v65_v61 = vld [vmem:[#allocation2 + $0x40] sm:$0xff] }
  0x21   :  { %12690 = vmatpush3.msra.mxu0 %v14466_v5  ;;  %v14498_v16 = vand.u32 4294901760, %v14482_v11  ;;  %v14504_v18 = vand.u32 4294901760, %v14487_v13  ;;  %v14576_v39 = vand.u32 4294901760, %v61_v35  ;;  %v14583_v40 = vand.u32 4294901760, %v60_v37 }
  0x22   :  { %v14501_v17 = vsub.f32 %v72_v10, %v14484_v12  ;;  %v14507_v19 = vand.u32 4294901760, %v14490_v14  ;;  %12691 = vmatprep.subr.mxu0 %v16372_v0  ;;  %v14511_v20 = vand.u32 4294901760, %v14494_v15  ;;  %v14586_v41 = vsub.f32 %v62_v34, %v14567_v36 }
  0x23   :  { %12692 = vmatpush3.msra.mxu0 %v14468_v6  ;;  %v181_v21 = vsub.f32 %v14482_v11, %v14498_v16  ;;  %v188_v23 = vsub.f32 %v14487_v13, %v14504_v18  ;;  %v14591_v42 = vand.u32 4294901760, %v14572_v38  ;;  %v14596_v43 = vsub.f32 %v61_v35, %v14576_v39 }
  0x24   :  { %v14517_v22 = vand.u32 4294901760, %v14501_v17  ;;  %v195_v24 = vsub.f32 %v14490_v14, %v14507_v19  ;;  %12693 = vmatprep.subr.mxu0 %v16372_v0  ;;  %v202_v28 = vsub.f32 %v14494_v15, %v14511_v20  ;;  %v14604_v44 = vand.u32 4294901760, %v14586_v41 }
  0x25   :  { %12694 = vmatpush3.msra.mxu0 %v14476_v9  ;;  %v14525_v25 = vand.u32 4294901760, %v181_v21  ;;  %v14529_v27 = vand.u32 4294901760, %v188_v23  ;;  %v14607_v45 = vsub.f32 %v60_v37, %v14583_v40  ;;  %v666_v46 = vsub.f32 %v14572_v38, %v14591_v42 }
  0x26   :  { %v146_v26 = vsub.f32 %v14501_v17, %v14517_v22  ;;  %12709 = vmatprep.subr.mxu0 %v16372_v0  ;;  %v14537_v30 = vand.u32 4294901760, %v195_v24  ;;  %v14542_v31 = vand.u32 4294901760, %v202_v28  ;;  %v14616_v47 = vand.u32 4294901760, %v14596_v43 }
  0x27   :  { %16399 = vst [vmem:[#allocation15_spill] sm:$0xff] %v14525_v25  ;;  %16400 = vst [vmem:[#allocation16_spill] sm:$0xff] %v14529_v27  ;;  %12699 = vmatpush3.msra.mxu1 %v14525_v25  ;;  %v673_v48 = vsub.f32 %v14586_v41, %v14604_v44  ;;  %v14625_v49 = vand.u32 4294901760, %v14607_v45  ;;  %v14629_v50 = vand.u32 4294901760, %v666_v46  ;;  %v14673_v57 = vand.u32 4294901760, %v68_v56 }
  0x28   :  { %v14535_v29 = vand.u32 4294901760, %v146_v26  ;;  %16401 = vst [vmem:[#allocation17_spill] sm:$0xff] %v14537_v30  ;;  %12700 = vmatprep.subr.mxu1 %v16372_v0  ;;  %16402 = vst [vmem:[#allocation18_spill] sm:$0xff] %v14542_v31  ;;  %v680_v51 = vsub.f32 %v14596_v43, %v14616_v47  ;;  %v14681_v60 = vand.u32 4294901760, %v67_v58  ;;  %v14690_v63 = vand.u32 4294901760, %v66_v59 }
  0x29   :  { %12701 = vmatpush3.msra.mxu1 %v14529_v27  ;;  %v14640_v52 = vand.u32 4294901760, %v673_v48  ;;  %v687_v53 = vsub.f32 %v14607_v45, %v14625_v49  ;;  %v14686_v62 = vsub.f32 %v68_v56, %v14673_v57  ;;  %v14697_v1 = vand.u32 4294901760, %v65_v61 }
  0x2a   :  { %12696 = vmatmul.mubr.f32.vlgmr.msra.gmra.mxu0 %v14535_v29  ;;  %12702 = vmatprep.subr.mxu1 %v16372_v0  ;;  %v14649_v54 = vand.u32 4294901760, %v680_v51  ;;  %16404 = vst [vmem:[#allocation20_spill] sm:$0xff] %v14690_v63  ;;  %v14700_v2 = vsub.f32 %v67_v58, %v14681_v60  ;;  %v14710_v7 = vsub.f32 %v66_v59, %v14690_v63 }
  0x2b   :  { %12710 = vmatpush3.msra.mxu0 %v14482_v11  ;;  %12703 = vmatpush3.msra.mxu1 %v14537_v30  ;;  %v14655_v55 = vand.u32 4294901760, %v687_v53  ;;  %16403 = vst [vmem:[#allocation19_spill] sm:$0xff] %v14686_v62  ;;  %16405 = vst [vmem:[#allocation21_spill] sm:$0xff] %v14697_v1  ;;  %v14705_v3 = vand.u32 4294901760, %v14686_v62  ;;  %v14721_v21 = vsub.f32 %v65_v61, %v14697_v1 }
  0x2c   :  { %12711 = vmatprep.subr.mxu0 %v16372_v0  ;;  %12704 = vmatprep.subr.mxu1 %v16372_v0  ;;  %16406 = vst [vmem:[#allocation22_spill] sm:$0xff] %v14700_v2  ;;  %16408 = vst [vmem:[#allocation24_spill] sm:$0xff] %v14710_v7  ;;  %v14718_v10 = vand.u32 4294901760, %v14700_v2  ;;  %v14730_v24 = vand.u32 4294901760, %v14710_v7 }
  0x2d   :  { %12712 = vmatpush3.msra.mxu0 %v14487_v13  ;;  %12705 = vmatpush3.msra.mxu1 %v14542_v31  ;;  %16407 = vst [vmem:[#allocation23_spill] sm:$0xff] %v14705_v3  ;;  %16410 = vst [vmem:[#allocation26_spill] sm:$0xff] %v14721_v21  ;;  %v1168_v23 = vsub.f32 %v14686_v62, %v14705_v3  ;;  %v14739_v28 = vand.u32 4294901760, %v14721_v21 }
  0x2e   :  { %12713 = vmatprep.subr.mxu0 %v16372_v0  ;;  %12707 = vmatmul.mubr.f32.vlgmr.msra.gmra.mxu1 %v14484_v12  ;;  %16409 = vst [vmem:[#allocation25_spill] sm:$0xff] %v14718_v10  ;;  %16411 = vst [vmem:[#allocation27_spill] sm:$0xff] %v14730_v24  ;;  %v1175_v26 = vsub.f32 %v14700_v2, %v14718_v10  ;;  %v1182_v34 = vsub.f32 %v14710_v7, %v14730_v24 }
  0x2f   :  { %12714 = vmatpush3.msra.mxu0 %v14490_v14  ;;  %12720 = vmatprep.subr.mxu1 %v16372_v0  ;;  %16412 = vst [vmem:[#allocation28_spill] sm:$0xff] %v14739_v28  ;;  %v14743_v32 = vand.u32 4294901760, %v1168_v23  ;;  %v1189_v37 = vsub.f32 %v14721_v21, %v14739_v28 }
  0x30   :  { %12715 = vmatprep.subr.mxu0 %v16372_v0  ;;  %12717 = vmatprep.mubr.msk.f32.mxu0 %vm14432_vm1, %v16372_v0  ;;  %v14754_v35 = vand.u32 4294901760, %v1175_v26  ;;  %v14763_v46 = vand.u32 4294901760, %v1182_v34 }
  0x31   :  { %12716 = vmatpush3.msra.mxu0 %v14494_v15  ;;  %12721 = vmatpush3.msra.mxu1 %v14464_v4  ;;  %v14769_v48 = vand.u32 4294901760, %v1189_v37 }
  0x32   :  { %12718 = vmatmul.mubr.f32.vlgmr.msra.gmra.mxu0 %v14501_v17  ;;  %12722 = vmatprep.subr.mxu1 %v16372_v0 }
  0x33   :  { %12731 = vmatprep.subr.mxu0 %v16372_v0  ;;  %12723 = vmatpush3.msra.mxu1 %v14466_v5 }
  0x34   :  { %12732 = vmatpush3.msra.mxu0 %v14498_v16  ;;  %12724 = vmatprep.subr.mxu1 %v16372_v0 }
  0x35   :  { %12733 = vmatprep.subr.mxu0 %v16372_v0  ;;  %12725 = vmatpush3.msra.mxu1 %v14468_v6 }
  0x36   :  { %12734 = vmatpush3.msra.mxu0 %v14504_v18  ;;  %12726 = vmatprep.subr.mxu1 %v16372_v0 }
  0x37   :  { %12735 = vmatprep.subr.mxu0 %v16372_v0  ;;  %12727 = vmatpush3.msra.mxu1 %v14476_v9 }
  0x38   :  { %12728 = vmatprep.mubr.msk.f32.mxu1 %vm14432_vm1, %v16372_v0  ;;  %12736 = vmatpush3.msra.mxu0 %v14507_v19 }
  0x39   :  { %12729 = vmatmul.mubr.f32.vlgmr.msra.gmra.mxu1 %v14517_v22  ;;  %12737 = vmatprep.subr.mxu0 %v16372_v0 }
  0x3a   :  { %12742 = vmatprep.subr.mxu1 %v16372_v0  ;;  %12738 = vmatpush3.msra.mxu0 %v14511_v20 }
  0x3b   :  { %12739 = vmatprep.mubr.msk.f32.mxu0 %vm14432_vm1, %v16372_v0  ;;  %12743 = vmatpush3.msra.mxu1 %v14464_v4 }
  0x3c   :  { %12740 = vmatmul.mubr.f32.vlgmr.msra.gmra.mxu0 %v14484_v12  ;;  %12744 = vmatprep.subr.mxu1 %v16372_v0 }
  0x3d   :  { %12753 = vmatprep.subr.mxu0 %v16372_v0  ;;  %12745 = vmatpush3.msra.mxu1 %v14466_v5 }
  0x3e   :  { %12754 = vmatpush3.msra.mxu0 %v14559_v33  ;;  %12746 = vmatprep.subr.mxu1 %v16372_v0 }
  0x3f   :  { %12755 = vmatprep.subr.mxu0 %v16372_v0  ;;  %12747 = vmatpush3.msra.mxu1 %v14468_v6 }
  0x40   :  { %12756 = vmatpush3.msra.mxu0 %v14567_v36  ;;  %12748 = vmatprep.subr.mxu1 %v16372_v0 }
  0x41   :  { %12757 = vmatprep.subr.mxu0 %v16372_v0  ;;  %12749 = vmatpush3.msra.mxu1 %v14476_v9 }
  0x42   :  { %12750 = vmatprep.mubr.msk.f32.mxu1 %vm14432_vm1, %v16372_v0  ;;  %12758 = vmatpush3.msra.mxu0 %v14576_v39 }
  0x43   :  { %12751 = vmatmul.mubr.f32.vlgmr.msra.gmra.mxu1 %v14484_v12  ;;  %12759 = vmatprep.subr.mxu0 %v16372_v0 }
  0x44   :  { %12764 = vmatprep.subr.mxu1 %v16372_v0  ;;  %12760 = vmatpush3.msra.mxu0 %v14583_v40 }
  0x45   :  { %12765 = vmatpush3.msra.mxu1 %v14629_v50  ;;  %12761 = vmatprep.mubr.msk.f32.mxu0 %vm14432_vm1, %v16372_v0 }
  0x46   :  { %12766 = vmatprep.subr.mxu1 %v16372_v0  ;;  %12775 = vmatprep.subr.mxu0 %v16372_v0 }
  0x47   :  { %12762 = vmatmul.mubr.f32.vlgmr.msra.gmra.mxu0 %v14535_v29  ;;  %12767 = vmatpush3.msra.mxu1 %v14640_v52 }
  0x48   :  { %12776 = vmatpush3.msra.mxu0 %v14572_v38  ;;  %12768 = vmatprep.subr.mxu1 %v16372_v0 }
  0x49   :  { %12777 = vmatprep.subr.mxu0 %v16372_v0  ;;  %12769 = vmatpush3.msra.mxu1 %v14649_v54 }
  0x4a   :  { %12778 = vmatpush3.msra.mxu0 %v14586_v41  ;;  %12770 = vmatprep.subr.mxu1 %v16372_v0 }
  0x4b   :  { %12779 = vmatprep.subr.mxu0 %v16372_v0  ;;  %12771 = vmatpush3.msra.mxu1 %v14655_v55 }
  0x4c   :  { %12772 = vmatprep.mubr.msk.f32.mxu1 %vm14432_vm1, %v16372_v0  ;;  %12780 = vmatpush3.msra.mxu0 %v14596_v43 }
  0x4d   :  { %12773 = vmatmul.mubr.f32.vlgmr.msra.gmra.mxu1 %v14484_v12  ;;  %12781 = vmatprep.subr.mxu0 %v16372_v0 }
  0x4e   :  { %12786 = vmatprep.subr.mxu1 %v16372_v0  ;;  %12782 = vmatpush3.msra.mxu0 %v14607_v45 }
  0x4f   :  { %12783 = vmatprep.mubr.msk.f32.mxu0 %vm14432_vm1, %v16372_v0  ;;  %12787 = vmatpush3.msra.mxu1 %v14559_v33 }
  0x50   :  { %12784 = vmatmul.mubr.f32.vlgmr.msra.gmra.mxu0 %v14501_v17  ;;  %12788 = vmatprep.subr.mxu1 %v16372_v0 }
  0x51   :  { %12797 = vmatprep.subr.mxu0 %v16372_v0  ;;  %12789 = vmatpush3.msra.mxu1 %v14567_v36 }
  0x52   :  { %12798 = vmatpush3.msra.mxu0 %v14591_v42  ;;  %12790 = vmatprep.subr.mxu1 %v16372_v0 }
  0x53   :  { %12799 = vmatprep.subr.mxu0 %v16372_v0  ;;  %12791 = vmatpush3.msra.mxu1 %v14576_v39 }
  0x54   :  { %12800 = vmatpush3.msra.mxu0 %v14604_v44  ;;  %12792 = vmatprep.subr.mxu1 %v16372_v0 }
  0x55   :  { %12801 = vmatprep.subr.mxu0 %v16372_v0  ;;  %12793 = vmatpush3.msra.mxu1 %v14583_v40 }
  0x56   :  { %12794 = vmatprep.mubr.msk.f32.mxu1 %vm14432_vm1, %v16372_v0  ;;  %12802 = vmatpush3.msra.mxu0 %v14616_v47 }
  0x57   :  { %12795 = vmatmul.mubr.f32.vlgmr.msra.gmra.mxu1 %v14517_v22  ;;  %12803 = vmatprep.subr.mxu0 %v16372_v0 }
  0x58   :  { %12808 = vmatprep.subr.mxu1 %v16372_v0  ;;  %12804 = vmatpush3.msra.mxu0 %v14625_v49 }
  0x59   :  { %12805 = vmatprep.mubr.msk.f32.mxu0 %vm14432_vm1, %v16372_v0  ;;  %12809 = vmatpush3.msra.mxu1 %v14559_v33 }
  0x5a   :  { %12806 = vmatmul.mubr.f32.vlgmr.msra.gmra.mxu0 %v14484_v12  ;;  %12810 = vmatprep.subr.mxu1 %v16372_v0 }
  0x5b   :  { %12819 = vmatprep.subr.mxu0 %v16372_v0  ;;  %12811 = vmatpush3.msra.mxu1 %v14567_v36 }
  0x5c   :  { %12820 = vmatpush3.msra.mxu0 %v14673_v57  ;;  %12812 = vmatprep.subr.mxu1 %v16372_v0 }
  0x5d   :  { %12821 = vmatprep.subr.mxu0 %v16372_v0  ;;  %12813 = vmatpush3.msra.mxu1 %v14576_v39 }
  0x5e   :  { %12822 = vmatpush3.msra.mxu0 %v14681_v60  ;;  %12814 = vmatprep.subr.mxu1 %v16372_v0 }
  0x5f   :  { %12823 = vmatprep.subr.mxu0 %v16372_v0  ;;  %12815 = vmatpush3.msra.mxu1 %v14583_v40 }
  0x60   :  { %12816 = vmatprep.mubr.msk.f32.mxu1 %vm14432_vm1, %v16372_v0  ;;  %12824 = vmatpush3.msra.mxu0 %v14690_v63 }
  0x61   :  { %12817 = vmatmul.mubr.f32.vlgmr.msra.gmra.mxu1 %v14484_v12  ;;  %12825 = vmatprep.subr.mxu0 %v16372_v0 }
  0x62   :  { %12830 = vmatprep.subr.mxu1 %v16372_v0  ;;  %12826 = vmatpush3.msra.mxu0 %v14697_v1 }
  0x63   :  { %12831 = vmatpush3.msra.mxu1 %v14743_v32  ;;  %12827 = vmatprep.mubr.msk.f32.mxu0 %vm14432_vm1, %v16372_v0 }
  0x64   :  { %12832 = vmatprep.subr.mxu1 %v16372_v0  ;;  %12841 = vmatprep.subr.mxu0 %v16372_v0 }
  0x65   :  { %12828 = vmatmul.mubr.f32.vlgmr.msra.gmra.mxu0 %v14535_v29  ;;  %12833 = vmatpush3.msra.mxu1 %v14754_v35 }
  0x66   :  { %12842 = vmatpush3.msra.mxu0 %v14686_v62  ;;  %12834 = vmatprep.subr.mxu1 %v16372_v0 }
  0x67   :  { %12843 = vmatprep.subr.mxu0 %v16372_v0  ;;  %12835 = vmatpush3.msra.mxu1 %v14763_v46 }
  0x68   :  { %12844 = vmatpush3.msra.mxu0 %v14700_v2  ;;  %12836 = vmatprep.subr.mxu1 %v16372_v0 }
  0x69   :  { %12845 = vmatprep.subr.mxu0 %v16372_v0  ;;  %12837 = vmatpush3.msra.mxu1 %v14769_v48 }
  0x6a   :  { %12838 = vmatprep.mubr.msk.f32.mxu1 %vm14432_vm1, %v16372_v0  ;;  %12846 = vmatpush3.msra.mxu0 %v14710_v7 }
  0x6b   :  { %12839 = vmatmul.mubr.f32.vlgmr.msra.gmra.mxu1 %v14484_v12  ;;  %12847 = vmatprep.subr.mxu0 %v16372_v0 }
  0x6c   :  { %12852 = vmatprep.subr.mxu1 %v16372_v0  ;;  %12848 = vmatpush3.msra.mxu0 %v14721_v21 }
  0x6d   :  { %12853 = vmatpush3.msra.mxu1 %v14673_v57  ;;  %12849 = vmatprep.mubr.msk.f32.mxu0 %vm14432_vm1, %v16372_v0 }
  0x6e   :  { %12854 = vmatprep.subr.mxu1 %v16372_v0  ;;  %12863 = vmatprep.subr.mxu0 %v16372_v0 }
  0x6f   :  { %12850 = vmatmul.mubr.f32.vlgmr.msra.gmra.mxu0 %v14501_v17  ;;  %12855 = vmatpush3.msra.mxu1 %v14681_v60 }
  0x70   :  { %12864 = vmatpush3.msra.mxu0 %v14705_v3  ;;  %12856 = vmatprep.subr.mxu1 %v16372_v0 }
  0x71   :  { %12865 = vmatprep.subr.mxu0 %v16372_v0  ;;  %12857 = vmatpush3.msra.mxu1 %v14690_v63 }
  0x72   :  { %12866 = vmatpush3.msra.mxu0 %v14718_v10  ;;  %12858 = vmatprep.subr.mxu1 %v16372_v0 }
  0x73   :  { %12867 = vmatprep.subr.mxu0 %v16372_v0  ;;  %12859 = vmatpush3.msra.mxu1 %v14697_v1 }
  0x74   :  { %12860 = vmatprep.mubr.msk.f32.mxu1 %vm14432_vm1, %v16372_v0  ;;  %12868 = vmatpush3.msra.mxu0 %v14730_v24 }
  0x75   :  { %12861 = vmatmul.mubr.f32.vlgmr.msra.gmra.mxu1 %v14517_v22  ;;  %12869 = vmatprep.subr.mxu0 %v16372_v0 }
  0x76   :  { %12874 = vmatprep.subr.mxu1 %v16372_v0  ;;  %12870 = vmatpush3.msra.mxu0 %v14739_v28 }
  0x77   :  { %12871 = vmatprep.mubr.msk.f32.mxu0 %vm14432_vm1, %v16372_v0  ;;  %12875 = vmatpush3.msra.mxu1 %v14673_v57 }
  0x78   :  { %12872 = vmatmul.mubr.f32.vlgmr.msra.gmra.mxu0 %v14484_v12  ;;  %12876 = vmatprep.subr.mxu1 %v16372_v0 }
  0x79   :  { %12882 = vmatprep.mubr.msk.f32.mxu1 %vm14432_vm1, %v16372_v0  ;;  %12877 = vmatpush3.msra.mxu1 %v14681_v60 }
  0x7a   :  { %12885 = vmatprep.subr.mxu0 %v16372_v0  ;;  %12878 = vmatprep.subr.mxu1 %v16372_v0 }
  0x7b   :  { %12886 = vmatpush3.msra.mxu0 %v14464_v4  ;;  %12879 = vmatpush3.msra.mxu1 %v14690_v63 }
  0x7c   :  { %12887 = vmatprep.subr.mxu0 %v16372_v0  ;;  %12880 = vmatprep.subr.mxu1 %v16372_v0 }
  0x7d   :  { %12888 = vmatpush3.msra.mxu0 %v14466_v5  ;;  %12881 = vmatpush3.msra.mxu1 %v14697_v1 }
  0x7e   :  { %12889 = vmatprep.subr.mxu0 %v16372_v0  ;;  %12883 = vmatmul.mubr.f32.vlgmr.msra.gmra.mxu1 %v14484_v12 }
  0x7f   :  { %12896 = vmatprep.subr.mxu1 %v16372_v0  ;;  %12904 = vmatprep.mubr.msk.f32.mxu1 %vm14432_vm1, %v16372_v0 }
  0x80   :  { %12897 = vmatpush3.msra.mxu1 %v14525_v25  ;;  %12890 = vmatpush3.msra.mxu0 %v14468_v6 }
  0x81   :  { %12898 = vmatprep.subr.mxu1 %v16372_v0  ;;  %12891 = vmatprep.subr.mxu0 %v16372_v0 }
  0x82   :  { %12899 = vmatpush3.msra.mxu1 %v14529_v27  ;;  %12892 = vmatpush3.msra.mxu0 %v14476_v9 }
  0x83   :  { %12900 = vmatprep.subr.mxu1 %v16372_v0  ;;  %12893 = vmatprep.mubr.msk.f32.mxu0 %vm14432_vm1, %v16372_v0 }
  0x84   :  { %12901 = vmatpush3.msra.mxu1 %v14537_v30  ;;  %12907 = vmatprep.subr.mxu0 %v16372_v0 }
  0x85   :  { %12902 = vmatprep.subr.mxu1 %v16372_v0 }
  0x86   :  { %12903 = vmatpush3.msra.mxu1 %v14542_v31 }
  0x87   :  { %12918 = vmatprep.subr.mxu1 %v16372_v0 }
  0xea   :  { %v149_v12 = vpop.f32.mrf.mxu0 }
  0xec   :  { %v12697_v17 = vpop.f32.mrf.mxu0 }
  0xee   :  { %v240_v22 = vpop.f32.mrf.mxu1 }
  0xef   :  { %v241_v37 = vadd.f32 %v240_v22, %v149_v12 }
  0xf0   :  { %v12708_v29 = vpop.f32.mrf.mxu1 }
  0xf1   :  { %v1044_v29 = vld [vmem:[#allocation3] sm:$0xff] }
  0xf2   :  { %v320_v51 = vpop.f32.mrf.mxu0 }
  0xf3   :  { %v321_v28 = vadd.f32 %v320_v51, %v241_v37 }
  0xf4   :  { %v12719_v53 = vpop.f32.mrf.mxu0 }
  0xf9   :  { %v397_v56 = vpop.f32.mrf.mxu1 }
  0xfa   :  { %v398_v31 = vadd.f32 %v397_v56, %v321_v28  ;;  %v1045_v28 = vld [vmem:[#allocation3 + $0x8] sm:$0xff] }
  0xfb   :  { %v12730_v58 = vpop.f32.mrf.mxu1 }
  0xfc   :  { %v480_v59 = vpop.f32.mrf.mxu0 }
  0xfd   :  { %v481_v25 = vadd.f32 %v480_v59, %v398_v31 }
  0xfe   :  { %v12741_v61 = vpop.f32.mrf.mxu0 }
 0x103   :  { %v555_v23 = vpop.f32.mrf.mxu1 }
 0x104   :  { %v556_v10 = vadd.f32 %v555_v23, %v481_v25 }
 0x105   :  { %v12752_v26 = vpop.f32.mrf.mxu1 }
 0x106   :  { %v1047_v21 = vadd.f32 %v1044_v29, %v556_v10 }
 0x107   :  { %v634_v34 = vpop.f32.mrf.mxu0 }
 0x108   :  { %v11951_v2 = vmul.f32 -1.442695, %v1047_v21 }
 0x109   :  { %v12763_v30 = vpop.f32.mrf.mxu0 }
 0x10a   :  { %14278 = vpow2.f32 %v11951_v2 }
 0x10d   :  { %v725_v27 = vpop.f32.mrf.mxu1 }
 0x10e   :  { %v726_v3 = vadd.f32 %v725_v27, %v634_v34 }
 0x10f   :  { %v12774_v24 = vpop.f32.mrf.mxu1 }
 0x110   :  { %v805_v0 = vpop.f32.mrf.mxu0 }
 0x111   :  { %v806_v7 = vadd.f32 %v805_v0, %v726_v3  ;;  %v14845_v0 = vld [vmem:[%s16359_s1] ss:$0 sm:$0xff] }
 0x112   :  { %v12785_v17 = vpop.f32.mrf.mxu0 }
 0x117   :  { %v882_v53 = vpop.f32.mrf.mxu1  ;;  %v14279_v27 = vpop.eup %14278 }
 0x118   :  { %v883_v26 = vadd.f32 %v882_v53, %v806_v7  ;;  %v1051_v2 = vadd.f32 1.0, %v14279_v27 }
 0x119   :  { %v12796_v58 = vpop.f32.mrf.mxu1 }
 0x11a   :  { %v965_v61 = vpop.f32.mrf.mxu0 }
 0x11b   :  { %v966_v30 = vadd.f32 %v965_v61, %v883_v26 }
 0x11c   :  { %v12807_v62 = vpop.f32.mrf.mxu0 }
 0x121   :  { %v1040_v12 = vpop.f32.mrf.mxu1 }
 0x122   :  { %v1041_v22 = vadd.f32 %v1040_v12, %v966_v30 }
 0x123   :  { %v12818_v24 = vpop.f32.mrf.mxu1 }
 0x124   :  { %v1054_v31 = vadd.f32 %v1045_v28, %v1041_v22  ;;  %v1046_v28 = vld [vmem:[#allocation3 + $0x10] sm:$0xff] }
 0x125   :  { %v1136_v51 = vpop.f32.mrf.mxu0 }
 0x126   :  { %v11952_v25 = vmul.f32 -1.442695, %v1054_v31  ;;  %v1137_v7 = vadd.f32 %v14845_v0, %v1136_v51 }
 0x127   :  { %v12829_v56 = vpop.f32.mrf.mxu0 }
 0x128   :  { %14280 = vpow2.f32 %v11952_v25 }
 0x129   :  { %14282 = vrcp.f32 %v1051_v2 }
 0x12b   :  { %v1227_v59 = vpop.f32.mrf.mxu1 }
 0x12c   :  { %v1228_v21 = vadd.f32 %v1227_v59, %v1137_v7 }
 0x12d   :  { %v12840_v3 = vpop.f32.mrf.mxu1 }
 0x12f   :  { %v1307_v62 = vpop.f32.mrf.mxu0 }
 0x130   :  { %v1308_v37 = vadd.f32 %v1307_v62, %v1228_v21  ;;  %v16413_v21 = vmov 0.0  }
 0x131   :  { %v12851_v10 = vpop.f32.mrf.mxu0 }
 0x135   :  { %v1384_v23 = vpop.f32.mrf.mxu1  ;;  %v14281_v58 = vpop.eup %14280 }
 0x136   :  { %v1385_v29 = vadd.f32 %v1384_v23, %v1308_v37  ;;  %v1058_v61 = vadd.f32 1.0, %v14281_v58  ;;  %v14283_v22 = vpop.eup %14282  ;;  %v16414_v37 = vld [vmem:[#allocation19_spill] sm:$0xff] }
 0x137   :  { %v12862_v34 = vpop.f32.mrf.mxu1  ;;  %v16418_v58 = vld [vmem:[#allocation23_spill] sm:$0xff] }
 0x138   :  { %v1467_v17 = vpop.f32.mrf.mxu0  ;;  %14284 = vrcp.f32 %v1058_v61  ;;  %v16419_v61 = vld [vmem:[#allocation25_spill] sm:$0xff] }
 0x139   :  { %v1468_v26 = vadd.f32 %v1467_v17, %v1385_v29  ;;  %v16415_v17 = vld [vmem:[#allocation22_spill] sm:$0xff]  ;;  %v16416_v29 = vld [vmem:[#allocation24_spill] sm:$0xff] }
 0x13a   :  { %v12873_v53 = vpop.f32.mrf.mxu0 }
 0x13b   :  { %v16417_v53 = vld [vmem:[#allocation26_spill] sm:$0xff] }
 0x13e   :  { %v1542_v30 = vpop.f32.mrf.mxu1 }
 0x13f   :  { %v1543_v12 = vadd.f32 %v1542_v30, %v1468_v26  ;;  %v16420_v26 = vld [vmem:[#allocation15_spill] sm:$0xff] }
 0x140   :  { %v12884_v24 = vpop.f32.mrf.mxu1  ;;  %v16421_v30 = vld [vmem:[#allocation27_spill] sm:$0xff] }
 0x141   :  { %v1546_v31 = vmul.f32 %v14283_v22, %v1543_v12  ;;  %v16422_v12 = vld [vmem:[#allocation16_spill] sm:$0xff]  ;;  %v16425_v24 = vld [vmem:[#allocation18_spill] sm:$0xff] }
 0x142   :  { %v16423_v22 = vld [vmem:[#allocation28_spill] sm:$0xff] }
 0x143   :  { %v1547_v51 = vadd.f32 %v1546_v31, %v1046_v28  ;;  %v16424_v28 = vld [vmem:[#allocation17_spill] sm:$0xff] }
 0x145   :  { %14286 = vtanh.f32 %v1547_v51  ;;  %v14285_v56 = vpop.eup %14284 }
 0x146   :  { %v1549_v25 = vsub.f32 1.0, %v14285_v56  ;;  %v1551_v27 = vmul.f32 %v14285_v56, %v14472_v8 }
 0x152   :  { %v14287_v59 = vpop.eup %14286 }
 0x153   :  { %v1550_v3 = vmul.f32 %v14287_v59, %v1549_v25 }
 0x155   :  { %v14849_v62 = vadd.f32 %v1551_v27, %v1550_v3 }
 0x157   :  { %v1554_v2 = vsel %vm31_vm0, %v14849_v62, 0 }
 0x158   :  { %v14853_v7 = vand.u32 4294901760, %v1554_v2 }
 0x15a   :  { %12905 = vmatmul.mubr.f32.vlgmr.msra.gmra.mxu1 %v14853_v7  ;;  %v14857_v10 = vsub.f32 %v1554_v2, %v14853_v7 }
 0x15b   :  { %12919 = vmatpush3.msra.mxu1 %v14464_v4  ;;  %12926 = vmatprep.mubr.msk.f32.mxu1 %vm14432_vm1, %v16413_v21 }
 0x15c   :  { %12920 = vmatprep.subr.mxu1 %v16413_v21  ;;  %v14864_v8 = vand.u32 4294901760, %v14857_v10 }
 0x15d   :  { %12921 = vmatpush3.msra.mxu1 %v14466_v5 }
 0x15e   :  { %12922 = vmatprep.subr.mxu1 %v16413_v21  ;;  %v1628_v23 = vsub.f32 %v14857_v10, %v14864_v8 }
 0x15f   :  { %12923 = vmatpush3.msra.mxu1 %v14468_v6 }
 0x160   :  { %12924 = vmatprep.subr.mxu1 %v16413_v21  ;;  %v14872_v34 = vand.u32 4294901760, %v1628_v23 }
 0x161   :  { %12925 = vmatpush3.msra.mxu1 %v14476_v9 }
 0x162   :  { %12927 = vmatmul.mubr.f32.vlgmr.msra.gmra.mxu1 %v14864_v8  ;;  %12940 = vmatprep.subr.mxu1 %v16413_v21 }
 0x163   :  { %12894 = vmatmul.mubr.f32.vlgmr.msra.gmra.mxu0 %v14872_v34  ;;  %12941 = vmatpush3.msra.mxu1 %v14464_v4 }
 0x164   :  { %12908 = vmatpush3.msra.mxu0 %v14482_v11  ;;  %12942 = vmatprep.subr.mxu1 %v16413_v21 }
 0x165   :  { %12909 = vmatprep.subr.mxu0 %v16413_v21  ;;  %12943 = vmatpush3.msra.mxu1 %v14466_v5 }
 0x166   :  { %12910 = vmatpush3.msra.mxu0 %v14487_v13  ;;  %12944 = vmatprep.subr.mxu1 %v16413_v21 }
 0x167   :  { %12911 = vmatprep.subr.mxu0 %v16413_v21  ;;  %12945 = vmatpush3.msra.mxu1 %v14468_v6 }
 0x168   :  { %12912 = vmatpush3.msra.mxu0 %v14490_v14  ;;  %12946 = vmatprep.subr.mxu1 %v16413_v21 }
 0x169   :  { %12913 = vmatprep.subr.mxu0 %v16413_v21  ;;  %12915 = vmatprep.mubr.msk.f32.mxu0 %vm14432_vm1, %v16413_v21 }
 0x16a   :  { %12914 = vmatpush3.msra.mxu0 %v14494_v15  ;;  %12947 = vmatpush3.msra.mxu1 %v14476_v9 }
 0x16b   :  { %12948 = vmatprep.mubr.msk.f32.mxu1 %vm14432_vm1, %v16413_v21  ;;  %12916 = vmatmul.mubr.f32.vlgmr.msra.gmra.mxu0 %v14857_v10 }
 0x16c   :  { %12929 = vmatprep.subr.mxu0 %v16413_v21  ;;  %12949 = vmatmul.mubr.f32.vlgmr.msra.gmra.mxu1 %v14853_v7 }
 0x16d   :  { %12962 = vmatprep.subr.mxu1 %v16413_v21  ;;  %12930 = vmatpush3.msra.mxu0 %v14498_v16 }
 0x16e   :  { %12963 = vmatpush3.msra.mxu1 %v14629_v50  ;;  %12931 = vmatprep.subr.mxu0 %v16413_v21 }
 0x16f   :  { %12964 = vmatprep.subr.mxu1 %v16413_v21  ;;  %12932 = vmatpush3.msra.mxu0 %v14504_v18 }
 0x170   :  { %12965 = vmatpush3.msra.mxu1 %v14640_v52  ;;  %12933 = vmatprep.subr.mxu0 %v16413_v21 }
 0x171   :  { %12966 = vmatprep.subr.mxu1 %v16413_v21  ;;  %12934 = vmatpush3.msra.mxu0 %v14507_v19 }
 0x172   :  { %12967 = vmatpush3.msra.mxu1 %v14649_v54  ;;  %12935 = vmatprep.subr.mxu0 %v16413_v21 }
 0x173   :  { %12968 = vmatprep.subr.mxu1 %v16413_v21  ;;  %12936 = vmatpush3.msra.mxu0 %v14511_v20 }
 0x174   :  { %12937 = vmatprep.mubr.msk.f32.mxu0 %vm14432_vm1, %v16413_v21  ;;  %12969 = vmatpush3.msra.mxu1 %v14655_v55 }
 0x175   :  { %12970 = vmatprep.mubr.msk.f32.mxu1 %vm14432_vm1, %v16413_v21  ;;  %12938 = vmatmul.mubr.f32.vlgmr.msra.gmra.mxu0 %v14853_v7 }
 0x176   :  { %12951 = vmatprep.subr.mxu0 %v16413_v21  ;;  %12971 = vmatmul.mubr.f32.vlgmr.msra.gmra.mxu1 %v14853_v7 }
 0x177   :  { %12984 = vmatprep.subr.mxu1 %v16413_v21  ;;  %12952 = vmatpush3.msra.mxu0 %v14559_v33 }
 0x178   :  { %12985 = vmatpush3.msra.mxu1 %v14559_v33  ;;  %12953 = vmatprep.subr.mxu0 %v16413_v21 }
 0x179   :  { %12986 = vmatprep.subr.mxu1 %v16413_v21  ;;  %12954 = vmatpush3.msra.mxu0 %v14567_v36 }
 0x17a   :  { %12987 = vmatpush3.msra.mxu1 %v14567_v36  ;;  %12955 = vmatprep.subr.mxu0 %v16413_v21 }
 0x17b   :  { %12988 = vmatprep.subr.mxu1 %v16413_v21  ;;  %12956 = vmatpush3.msra.mxu0 %v14576_v39 }
 0x17c   :  { %12989 = vmatpush3.msra.mxu1 %v14576_v39  ;;  %12957 = vmatprep.subr.mxu0 %v16413_v21 }
 0x17d   :  { %12990 = vmatprep.subr.mxu1 %v16413_v21  ;;  %12958 = vmatpush3.msra.mxu0 %v14583_v40 }
 0x17e   :  { %12959 = vmatprep.mubr.msk.f32.mxu0 %vm14432_vm1, %v16413_v21  ;;  %12991 = vmatpush3.msra.mxu1 %v14583_v40 }
 0x17f   :  { %12992 = vmatprep.mubr.msk.f32.mxu1 %vm14432_vm1, %v16413_v21  ;;  %12960 = vmatmul.mubr.f32.vlgmr.msra.gmra.mxu0 %v14872_v34 }
 0x180   :  { %12973 = vmatprep.subr.mxu0 %v16413_v21  ;;  %12993 = vmatmul.mubr.f32.vlgmr.msra.gmra.mxu1 %v14864_v8 }
 0x181   :  { %13006 = vmatprep.subr.mxu1 %v16413_v21  ;;  %12974 = vmatpush3.msra.mxu0 %v14572_v38 }
 0x182   :  { %13007 = vmatpush3.msra.mxu1 %v14559_v33  ;;  %12975 = vmatprep.subr.mxu0 %v16413_v21 }
 0x183   :  { %13008 = vmatprep.subr.mxu1 %v16413_v21  ;;  %12976 = vmatpush3.msra.mxu0 %v14586_v41 }
 0x184   :  { %13009 = vmatpush3.msra.mxu1 %v14567_v36  ;;  %12977 = vmatprep.subr.mxu0 %v16413_v21 }
 0x185   :  { %13010 = vmatprep.subr.mxu1 %v16413_v21  ;;  %12978 = vmatpush3.msra.mxu0 %v14596_v43 }
 0x186   :  { %13011 = vmatpush3.msra.mxu1 %v14576_v39  ;;  %12979 = vmatprep.subr.mxu0 %v16413_v21 }
 0x187   :  { %13012 = vmatprep.subr.mxu1 %v16413_v21  ;;  %12980 = vmatpush3.msra.mxu0 %v14607_v45 }
 0x188   :  { %12981 = vmatprep.mubr.msk.f32.mxu0 %vm14432_vm1, %v16413_v21  ;;  %13013 = vmatpush3.msra.mxu1 %v14583_v40 }
 0x189   :  { %13014 = vmatprep.mubr.msk.f32.mxu1 %vm14432_vm1, %v16413_v21  ;;  %12982 = vmatmul.mubr.f32.vlgmr.msra.gmra.mxu0 %v14857_v10 }
 0x18a   :  { %12995 = vmatprep.subr.mxu0 %v16413_v21  ;;  %13015 = vmatmul.mubr.f32.vlgmr.msra.gmra.mxu1 %v14853_v7 }
 0x18b   :  { %13028 = vmatprep.subr.mxu1 %v16413_v21  ;;  %12996 = vmatpush3.msra.mxu0 %v14591_v42 }
 0x18c   :  { %13029 = vmatpush3.msra.mxu1 %v14743_v32  ;;  %12997 = vmatprep.subr.mxu0 %v16413_v21 }
 0x18d   :  { %13030 = vmatprep.subr.mxu1 %v16413_v21  ;;  %12998 = vmatpush3.msra.mxu0 %v14604_v44 }
 0x18e   :  { %13031 = vmatpush3.msra.mxu1 %v14754_v35  ;;  %12999 = vmatprep.subr.mxu0 %v16413_v21 }
 0x18f   :  { %13032 = vmatprep.subr.mxu1 %v16413_v21  ;;  %13000 = vmatpush3.msra.mxu0 %v14616_v47 }
 0x190   :  { %13033 = vmatpush3.msra.mxu1 %v14763_v46  ;;  %13001 = vmatprep.subr.mxu0 %v16413_v21 }
 0x191   :  { %13034 = vmatprep.subr.mxu1 %v16413_v21  ;;  %13002 = vmatpush3.msra.mxu0 %v14625_v49 }
 0x192   :  { %13003 = vmatprep.mubr.msk.f32.mxu0 %vm14432_vm1, %v16413_v21  ;;  %13035 = vmatpush3.msra.mxu1 %v14769_v48 }
 0x193   :  { %13036 = vmatprep.mubr.msk.f32.mxu1 %vm14432_vm1, %v16413_v21  ;;  %13004 = vmatmul.mubr.f32.vlgmr.msra.gmra.mxu0 %v14853_v7 }
 0x194   :  { %13017 = vmatprep.subr.mxu0 %v16413_v21  ;;  %13037 = vmatmul.mubr.f32.vlgmr.msra.gmra.mxu1 %v14853_v7 }
 0x195   :  { %13050 = vmatprep.subr.mxu1 %v16413_v21  ;;  %13018 = vmatpush3.msra.mxu0 %v14673_v57 }
 0x196   :  { %13051 = vmatpush3.msra.mxu1 %v14673_v57  ;;  %13019 = vmatprep.subr.mxu0 %v16413_v21 }
 0x197   :  { %13052 = vmatprep.subr.mxu1 %v16413_v21  ;;  %13020 = vmatpush3.msra.mxu0 %v14681_v60 }
 0x198   :  { %13053 = vmatpush3.msra.mxu1 %v14681_v60  ;;  %13021 = vmatprep.subr.mxu0 %v16413_v21 }
 0x199   :  { %13054 = vmatprep.subr.mxu1 %v16413_v21  ;;  %13022 = vmatpush3.msra.mxu0 %v14690_v63 }
 0x19a   :  { %13055 = vmatpush3.msra.mxu1 %v14690_v63  ;;  %13023 = vmatprep.subr.mxu0 %v16413_v21 }
 0x19b   :  { %13056 = vmatprep.subr.mxu1 %v16413_v21  ;;  %13024 = vmatpush3.msra.mxu0 %v14697_v1 }
 0x19c   :  { %13025 = vmatprep.mubr.msk.f32.mxu0 %vm14432_vm1, %v16413_v21  ;;  %13057 = vmatpush3.msra.mxu1 %v14697_v1 }
 0x19d   :  { %13058 = vmatprep.mubr.msk.f32.mxu1 %vm14432_vm1, %v16413_v21  ;;  %13026 = vmatmul.mubr.f32.vlgmr.msra.gmra.mxu0 %v14872_v34 }
 0x19e   :  { %13039 = vmatprep.subr.mxu0 %v16413_v21  ;;  %13059 = vmatmul.mubr.f32.vlgmr.msra.gmra.mxu1 %v14864_v8 }
 0x19f   :  { %13072 = vmatprep.subr.mxu1 %v16413_v21  ;;  %13040 = vmatpush3.msra.mxu0 %v16414_v37 }
 0x1a0   :  { %13073 = vmatpush3.msra.mxu1 %v14673_v57  ;;  %13041 = vmatprep.subr.mxu0 %v16413_v21 }
 0x1a1   :  { %13074 = vmatprep.subr.mxu1 %v16413_v21  ;;  %13042 = vmatpush3.msra.mxu0 %v16415_v17 }
 0x1a2   :  { %13075 = vmatpush3.msra.mxu1 %v14681_v60  ;;  %13043 = vmatprep.subr.mxu0 %v16413_v21 }
 0x1a3   :  { %13076 = vmatprep.subr.mxu1 %v16413_v21  ;;  %13044 = vmatpush3.msra.mxu0 %v16416_v29  ;;  %v2527_v29 = vld [vmem:[#allocation3 + $0x18] sm:$0xff] }
 0x1a4   :  { %13077 = vmatpush3.msra.mxu1 %v14690_v63  ;;  %13045 = vmatprep.subr.mxu0 %v16413_v21 }
 0x1a5   :  { %13078 = vmatprep.subr.mxu1 %v16413_v21  ;;  %13046 = vmatpush3.msra.mxu0 %v16417_v53 }
 0x1a6   :  { %13047 = vmatprep.mubr.msk.f32.mxu0 %vm14432_vm1, %v16413_v21  ;;  %13079 = vmatpush3.msra.mxu1 %v14697_v1 }
 0x1a7   :  { %13080 = vmatprep.mubr.msk.f32.mxu1 %vm14432_vm1, %v16413_v21  ;;  %13048 = vmatmul.mubr.f32.vlgmr.msra.gmra.mxu0 %v14857_v10 }
 0x1a8   :  { %13061 = vmatprep.subr.mxu0 %v16413_v21  ;;  %13081 = vmatmul.mubr.f32.vlgmr.msra.gmra.mxu1 %v14853_v7 }
 0x1a9   :  { %13062 = vmatpush3.msra.mxu0 %v16418_v58  ;;  %13069 = vmatprep.mubr.msk.f32.mxu0 %vm14432_vm1, %v16413_v21 }
 0x1aa   :  { %13063 = vmatprep.subr.mxu0 %v16413_v21  ;;  %13094 = vmatprep.subr.mxu1 %v16413_v21 }
 0x1ab   :  { %13064 = vmatpush3.msra.mxu0 %v16419_v61  ;;  %13095 = vmatpush3.msra.mxu1 %v16420_v26 }
 0x1ac   :  { %13065 = vmatprep.subr.mxu0 %v16413_v21  ;;  %13096 = vmatprep.subr.mxu1 %v16413_v21 }
 0x1ad   :  { %13066 = vmatpush3.msra.mxu0 %v16421_v30  ;;  %13097 = vmatpush3.msra.mxu1 %v16422_v12 }
 0x1ae   :  { %13067 = vmatprep.subr.mxu0 %v16413_v21  ;;  %13098 = vmatprep.subr.mxu1 %v16413_v21 }
 0x1af   :  { %13068 = vmatpush3.msra.mxu0 %v16423_v22  ;;  %13099 = vmatpush3.msra.mxu1 %v16424_v28 }
 0x1b0   :  { %13070 = vmatmul.mubr.f32.vlgmr.msra.gmra.mxu0 %v14853_v7  ;;  %13100 = vmatprep.subr.mxu1 %v16413_v21 }
 0x1b1   :  { %13101 = vmatpush3.msra.mxu1 %v16425_v24  ;;  %13083 = vmatprep.subr.mxu0 %v16413_v21 }
 0x1b2   :  { %13102 = vmatprep.mubr.msk.f32.mxu1 %vm14432_vm1, %v16413_v21  ;;  %13116 = vmatprep.subr.mxu1 %v16413_v21 }
 0x1b3   :  { %13084 = vmatpush3.msra.mxu0 %v14464_v4  ;;  %13091 = vmatprep.mubr.msk.f32.mxu0 %vm14432_vm1, %v16413_v21 }
 0x1b4   :  { %13085 = vmatprep.subr.mxu0 %v16413_v21 }
 0x1b5   :  { %13086 = vmatpush3.msra.mxu0 %v14466_v5 }
 0x1b6   :  { %13087 = vmatprep.subr.mxu0 %v16413_v21 }
 0x1b7   :  { %13088 = vmatpush3.msra.mxu0 %v14468_v6 }
 0x1b8   :  { %13089 = vmatprep.subr.mxu0 %v16413_v21 }
 0x1b9   :  { %13090 = vmatpush3.msra.mxu0 %v14476_v9 }
 0x1ba   :  { %13105 = vmatprep.subr.mxu0 %v16413_v21 }
 0x21a   :  { %v1722_v31 = vpop.f32.mrf.mxu1 }
 0x21c   :  { %v12906_v51 = vpop.f32.mrf.mxu1 }
 0x222   :  { %v1879_v56 = vpop.f32.mrf.mxu1 }
 0x223   :  { %v1631_v25 = vpop.f32.mrf.mxu0 }
 0x224   :  { %v12928_v59 = vpop.f32.mrf.mxu1  ;;  %v1723_v28 = vadd.f32 %v1722_v31, %v1631_v25 }
 0x225   :  { %v12895_v27 = vpop.f32.mrf.mxu0 }
 0x22b   :  { %v1802_v3 = vpop.f32.mrf.mxu0 }
 0x22c   :  { %v2037_v2 = vpop.f32.mrf.mxu1  ;;  %v1803_v22 = vadd.f32 %v1802_v3, %v1723_v28 }
 0x22d   :  { %v12917_v7 = vpop.f32.mrf.mxu0 }
 0x22e   :  { %v12950_v10 = vpop.f32.mrf.mxu1  ;;  %v1880_v26 = vadd.f32 %v1879_v56, %v1803_v22 }
 0x235   :  { %v1962_v8 = vpop.f32.mrf.mxu0 }
 0x236   :  { %v2207_v23 = vpop.f32.mrf.mxu1  ;;  %v1963_v51 = vadd.f32 %v1962_v8, %v1880_v26 }
 0x237   :  { %v12939_v34 = vpop.f32.mrf.mxu0 }
 0x238   :  { %v12972_v24 = vpop.f32.mrf.mxu1  ;;  %v2038_v53 = vadd.f32 %v2037_v2, %v1963_v51 }
 0x23a   :  { %v2530_v17 = vadd.f32 %v2527_v29, %v2038_v53 }
 0x23c   :  { %v11953_v63 = vmul.f32 -1.442695, %v2530_v17 }
 0x23e   :  { %14288 = vpow2.f32 %v11953_v63 }
 0x23f   :  { %v2116_v12 = vpop.f32.mrf.mxu0 }
 0x240   :  { %v2364_v30 = vpop.f32.mrf.mxu1  ;;  %v2208_v7 = vadd.f32 %v2207_v23, %v2116_v12 }
 0x241   :  { %v12961_v61 = vpop.f32.mrf.mxu0 }
 0x242   :  { %v12994_v58 = vpop.f32.mrf.mxu1  ;;  %v2528_v61 = vld [vmem:[#allocation3 + $0x20] sm:$0xff] }
 0x249   :  { %v2287_v59 = vpop.f32.mrf.mxu0 }
 0x24a   :  { %v2522_v27 = vpop.f32.mrf.mxu1  ;;  %v2288_v1 = vadd.f32 %v2287_v59, %v2208_v7 }
 0x24b   :  { %v12983_v37 = vpop.f32.mrf.mxu0  ;;  %v14289_v29 = vpop.eup %14288 }
 0x24c   :  { %v13016_v10 = vpop.f32.mrf.mxu1  ;;  %v2365_v34 = vadd.f32 %v2364_v30, %v2288_v1  ;;  %v2534_v53 = vadd.f32 1.0, %v14289_v29 }
 0x253   :  { %v2447_v24 = vpop.f32.mrf.mxu0 }
 0x254   :  { %v2448_v28 = vadd.f32 %v2447_v24, %v2365_v34  ;;  %v2710_v31 = vpop.f32.mrf.mxu1 }
 0x255   :  { %v13005_v25 = vpop.f32.mrf.mxu0 }
 0x256   :  { %v2523_v22 = vadd.f32 %v2522_v27, %v2448_v28  ;;  %v13038_v58 = vpop.f32.mrf.mxu1 }
 0x258   :  { %v2537_v26 = vadd.f32 %v2528_v61, %v2523_v22  ;;  %v2529_v22 = vld [vmem:[#allocation3 + $0x28] sm:$0xff] }
 0x25a   :  { %v11954_v56 = vmul.f32 -1.442695, %v2537_v26 }
 0x25c   :  { %14290 = vpow2.f32 %v11954_v56 }
 0x25d   :  { %v2619_v3 = vpop.f32.mrf.mxu0  ;;  %14292 = vrcp.f32 %v2534_v53 }
 0x25e   :  { %v2867_v2 = vpop.f32.mrf.mxu1  ;;  %v2620_v17 = vadd.f32 %v14845_v0, %v2619_v3 }
 0x25f   :  { %v13027_v8 = vpop.f32.mrf.mxu0 }
 0x260   :  { %v13060_v37 = vpop.f32.mrf.mxu1  ;;  %v2711_v30 = vadd.f32 %v2710_v31, %v2620_v17 }
 0x267   :  { %v2790_v63 = vpop.f32.mrf.mxu0 }
 0x268   :  { %v3025_v1 = vpop.f32.mrf.mxu1  ;;  %v2791_v51 = vadd.f32 %v2790_v63, %v2711_v30  ;;  %v16426_v63 = vld [vmem:[#allocation20_spill] sm:$0xff]  ;;  %v16428_v30 = vld [vmem:[#allocation19_spill] sm:$0xff] }
 0x269   :  { %v13049_v12 = vpop.f32.mrf.mxu0  ;;  %v14291_v59 = vpop.eup %14290 }
 0x26a   :  { %v13082_v23 = vpop.f32.mrf.mxu1  ;;  %v2868_v27 = vadd.f32 %v2867_v2, %v2791_v51  ;;  %v2541_v10 = vadd.f32 1.0, %v14291_v59  ;;  %v14293_v25 = vpop.eup %14292  ;;  %v16429_v12 = vld [vmem:[#allocation22_spill] sm:$0xff]  ;;  %v16432_v59 = vld [vmem:[#allocation23_spill] sm:$0xff] }
 0x26b   :  { %v16430_v23 = vld [vmem:[#allocation24_spill] sm:$0xff]  ;;  %v16431_v51 = vld [vmem:[#allocation26_spill] sm:$0xff] }
 0x26c   :  { %14294 = vrcp.f32 %v2541_v10  ;;  %v16435_v10 = vld [vmem:[#allocation27_spill] sm:$0xff] }
 0x270   :  { %v2950_v7 = vpop.f32.mrf.mxu0 }
 0x271   :  { %v2951_v34 = vadd.f32 %v2950_v7, %v2868_v27  ;;  %v16433_v27 = vld [vmem:[#allocation25_spill] sm:$0xff]  ;;  %v16434_v7 = vld [vmem:[#allocation15_spill] sm:$0xff] }
 0x272   :  { %v13071_v24 = vpop.f32.mrf.mxu0 }
 0x273   :  { %v3026_v28 = vadd.f32 %v3025_v1, %v2951_v34  ;;  %v16427_v1 = vld [vmem:[#allocation21_spill] sm:$0xff]  ;;  %v16436_v34 = vld [vmem:[#allocation16_spill] sm:$0xff] }
 0x274   :  { %v16437_v24 = vld [vmem:[#allocation28_spill] sm:$0xff] }
 0x275   :  { %v3029_v61 = vmul.f32 %v14293_v25, %v3026_v28  ;;  %v16438_v28 = vld [vmem:[#allocation17_spill] sm:$0xff]  ;;  %v16439_v25 = vld [vmem:[#allocation18_spill] sm:$0xff] }
 0x277   :  { %v3030_v58 = vadd.f32 %v3029_v61, %v2529_v22 }
 0x279   :  { %14296 = vtanh.f32 %v3030_v58  ;;  %v14295_v0 = vpop.eup %14294 }
 0x27a   :  { %v3032_v26 = vsub.f32 1.0, %v14295_v0  ;;  %v3034_v31 = vmul.f32 %v14295_v0, %v14849_v62 }
 0x286   :  { %v14297_v56 = vpop.eup %14296 }
 0x287   :  { %v3033_v3 = vmul.f32 %v14297_v56, %v3032_v26 }
 0x289   :  { %v15065_v8 = vadd.f32 %v3034_v31, %v3033_v3 }
 0x28b   :  { %v3037_v2 = vsel %vm31_vm0, %v15065_v8, 0 }
 0x28c   :  { %v15069_v29 = vand.u32 4294901760, %v3037_v2 }
 0x28e   :  { %13103 = vmatmul.mubr.f32.vlgmr.msra.gmra.mxu1 %v15069_v29  ;;  %v15073_v37 = vsub.f32 %v3037_v2, %v15069_v29 }
 0x28f   :  { %13117 = vmatpush3.msra.mxu1 %v14464_v4  ;;  %13124 = vmatprep.mubr.msk.f32.mxu1 %vm14432_vm1, %v16413_v21 }
 0x290   :  { %13118 = vmatprep.subr.mxu1 %v16413_v21  ;;  %v15080_v62 = vand.u32 4294901760, %v15073_v37 }
 0x291   :  { %13119 = vmatpush3.msra.mxu1 %v14466_v5 }
 0x292   :  { %13120 = vmatprep.subr.mxu1 %v16413_v21  ;;  %v3111_v53 = vsub.f32 %v15073_v37, %v15080_v62 }
 0x293   :  { %13121 = vmatpush3.msra.mxu1 %v14468_v6 }
 0x294   :  { %13122 = vmatprep.subr.mxu1 %v16413_v21  ;;  %v15088_v17 = vand.u32 4294901760, %v3111_v53 }
 0x295   :  { %13123 = vmatpush3.msra.mxu1 %v14476_v9 }
 0x296   :  { %13125 = vmatmul.mubr.f32.vlgmr.msra.gmra.mxu1 %v15080_v62  ;;  %13138 = vmatprep.subr.mxu1 %v16413_v21 }
 0x297   :  { %13092 = vmatmul.mubr.f32.vlgmr.msra.gmra.mxu0 %v15088_v17  ;;  %13139 = vmatpush3.msra.mxu1 %v14464_v4 }
 0x298   :  { %13106 = vmatpush3.msra.mxu0 %v14482_v11  ;;  %13140 = vmatprep.subr.mxu1 %v16413_v21 }
 0x299   :  { %13107 = vmatprep.subr.mxu0 %v16413_v21  ;;  %13141 = vmatpush3.msra.mxu1 %v14466_v5 }
 0x29a   :  { %13108 = vmatpush3.msra.mxu0 %v14487_v13  ;;  %13142 = vmatprep.subr.mxu1 %v16413_v21 }
 0x29b   :  { %13109 = vmatprep.subr.mxu0 %v16413_v21  ;;  %13143 = vmatpush3.msra.mxu1 %v14468_v6 }
 0x29c   :  { %13110 = vmatpush3.msra.mxu0 %v14490_v14  ;;  %13144 = vmatprep.subr.mxu1 %v16413_v21 }
 0x29d   :  { %13111 = vmatprep.subr.mxu0 %v16413_v21  ;;  %13113 = vmatprep.mubr.msk.f32.mxu0 %vm14432_vm1, %v16413_v21 }
 0x29e   :  { %13112 = vmatpush3.msra.mxu0 %v14494_v15  ;;  %13145 = vmatpush3.msra.mxu1 %v14476_v9 }
 0x29f   :  { %13146 = vmatprep.mubr.msk.f32.mxu1 %vm14432_vm1, %v16413_v21  ;;  %13114 = vmatmul.mubr.f32.vlgmr.msra.gmra.mxu0 %v15073_v37 }
 0x2a0   :  { %13127 = vmatprep.subr.mxu0 %v16413_v21  ;;  %13147 = vmatmul.mubr.f32.vlgmr.msra.gmra.mxu1 %v15069_v29 }
 0x2a1   :  { %13160 = vmatprep.subr.mxu1 %v16413_v21  ;;  %13128 = vmatpush3.msra.mxu0 %v14498_v16 }
 0x2a2   :  { %13161 = vmatpush3.msra.mxu1 %v14629_v50  ;;  %13129 = vmatprep.subr.mxu0 %v16413_v21 }
 0x2a3   :  { %13162 = vmatprep.subr.mxu1 %v16413_v21  ;;  %13130 = vmatpush3.msra.mxu0 %v14504_v18 }
 0x2a4   :  { %13163 = vmatpush3.msra.mxu1 %v14640_v52  ;;  %13131 = vmatprep.subr.mxu0 %v16413_v21 }
 0x2a5   :  { %13164 = vmatprep.subr.mxu1 %v16413_v21  ;;  %13132 = vmatpush3.msra.mxu0 %v14507_v19 }
 0x2a6   :  { %13165 = vmatpush3.msra.mxu1 %v14649_v54  ;;  %13133 = vmatprep.subr.mxu0 %v16413_v21 }
 0x2a7   :  { %13166 = vmatprep.subr.mxu1 %v16413_v21  ;;  %13134 = vmatpush3.msra.mxu0 %v14511_v20 }
 0x2a8   :  { %13135 = vmatprep.mubr.msk.f32.mxu0 %vm14432_vm1, %v16413_v21  ;;  %13167 = vmatpush3.msra.mxu1 %v14655_v55 }
 0x2a9   :  { %13168 = vmatprep.mubr.msk.f32.mxu1 %vm14432_vm1, %v16413_v21  ;;  %13136 = vmatmul.mubr.f32.vlgmr.msra.gmra.mxu0 %v15069_v29 }
 0x2aa   :  { %13149 = vmatprep.subr.mxu0 %v16413_v21  ;;  %13169 = vmatmul.mubr.f32.vlgmr.msra.gmra.mxu1 %v15069_v29 }
 0x2ab   :  { %13182 = vmatprep.subr.mxu1 %v16413_v21  ;;  %13150 = vmatpush3.msra.mxu0 %v14559_v33 }
 0x2ac   :  { %13183 = vmatpush3.msra.mxu1 %v14559_v33  ;;  %13151 = vmatprep.subr.mxu0 %v16413_v21 }
 0x2ad   :  { %13184 = vmatprep.subr.mxu1 %v16413_v21  ;;  %13152 = vmatpush3.msra.mxu0 %v14567_v36 }
 0x2ae   :  { %13185 = vmatpush3.msra.mxu1 %v14567_v36  ;;  %13153 = vmatprep.subr.mxu0 %v16413_v21 }
 0x2af   :  { %13186 = vmatprep.subr.mxu1 %v16413_v21  ;;  %13154 = vmatpush3.msra.mxu0 %v14576_v39 }
 0x2b0   :  { %13187 = vmatpush3.msra.mxu1 %v14576_v39  ;;  %13155 = vmatprep.subr.mxu0 %v16413_v21 }
 0x2b1   :  { %13188 = vmatprep.subr.mxu1 %v16413_v21  ;;  %13156 = vmatpush3.msra.mxu0 %v14583_v40 }
 0x2b2   :  { %13157 = vmatprep.mubr.msk.f32.mxu0 %vm14432_vm1, %v16413_v21  ;;  %13189 = vmatpush3.msra.mxu1 %v14583_v40 }
 0x2b3   :  { %13190 = vmatprep.mubr.msk.f32.mxu1 %vm14432_vm1, %v16413_v21  ;;  %13158 = vmatmul.mubr.f32.vlgmr.msra.gmra.mxu0 %v15088_v17 }
 0x2b4   :  { %13171 = vmatprep.subr.mxu0 %v16413_v21  ;;  %13191 = vmatmul.mubr.f32.vlgmr.msra.gmra.mxu1 %v15080_v62 }
 0x2b5   :  { %13204 = vmatprep.subr.mxu1 %v16413_v21  ;;  %13172 = vmatpush3.msra.mxu0 %v14572_v38 }
 0x2b6   :  { %13205 = vmatpush3.msra.mxu1 %v14559_v33  ;;  %13173 = vmatprep.subr.mxu0 %v16413_v21 }
 0x2b7   :  { %13206 = vmatprep.subr.mxu1 %v16413_v21  ;;  %13174 = vmatpush3.msra.mxu0 %v14586_v41 }
 0x2b8   :  { %13207 = vmatpush3.msra.mxu1 %v14567_v36  ;;  %13175 = vmatprep.subr.mxu0 %v16413_v21 }
 0x2b9   :  { %13208 = vmatprep.subr.mxu1 %v16413_v21  ;;  %13176 = vmatpush3.msra.mxu0 %v14596_v43 }
 0x2ba   :  { %13209 = vmatpush3.msra.mxu1 %v14576_v39  ;;  %13177 = vmatprep.subr.mxu0 %v16413_v21 }
 0x2bb   :  { %13210 = vmatprep.subr.mxu1 %v16413_v21  ;;  %13178 = vmatpush3.msra.mxu0 %v14607_v45 }
 0x2bc   :  { %13179 = vmatprep.mubr.msk.f32.mxu0 %vm14432_vm1, %v16413_v21  ;;  %13211 = vmatpush3.msra.mxu1 %v14583_v40 }
 0x2bd   :  { %13212 = vmatprep.mubr.msk.f32.mxu1 %vm14432_vm1, %v16413_v21  ;;  %13180 = vmatmul.mubr.f32.vlgmr.msra.gmra.mxu0 %v15073_v37 }
 0x2be   :  { %13193 = vmatprep.subr.mxu0 %v16413_v21  ;;  %13213 = vmatmul.mubr.f32.vlgmr.msra.gmra.mxu1 %v15069_v29 }
 0x2bf   :  { %13226 = vmatprep.subr.mxu1 %v16413_v21  ;;  %13194 = vmatpush3.msra.mxu0 %v14591_v42 }
 0x2c0   :  { %13227 = vmatpush3.msra.mxu1 %v14743_v32  ;;  %13195 = vmatprep.subr.mxu0 %v16413_v21 }
 0x2c1   :  { %13228 = vmatprep.subr.mxu1 %v16413_v21  ;;  %13196 = vmatpush3.msra.mxu0 %v14604_v44 }
 0x2c2   :  { %13229 = vmatpush3.msra.mxu1 %v14754_v35  ;;  %13197 = vmatprep.subr.mxu0 %v16413_v21 }
 0x2c3   :  { %13230 = vmatprep.subr.mxu1 %v16413_v21  ;;  %13198 = vmatpush3.msra.mxu0 %v14616_v47 }
 0x2c4   :  { %13231 = vmatpush3.msra.mxu1 %v14763_v46  ;;  %13199 = vmatprep.subr.mxu0 %v16413_v21 }
 0x2c5   :  { %13232 = vmatprep.subr.mxu1 %v16413_v21  ;;  %13200 = vmatpush3.msra.mxu0 %v14625_v49 }
 0x2c6   :  { %13201 = vmatprep.mubr.msk.f32.mxu0 %vm14432_vm1, %v16413_v21  ;;  %13233 = vmatpush3.msra.mxu1 %v14769_v48 }
 0x2c7   :  { %13234 = vmatprep.mubr.msk.f32.mxu1 %vm14432_vm1, %v16413_v21  ;;  %13202 = vmatmul.mubr.f32.vlgmr.msra.gmra.mxu0 %v15069_v29 }
 0x2c8   :  { %13215 = vmatprep.subr.mxu0 %v16413_v21  ;;  %13235 = vmatmul.mubr.f32.vlgmr.msra.gmra.mxu1 %v15069_v29 }
 0x2c9   :  { %13248 = vmatprep.subr.mxu1 %v16413_v21  ;;  %13216 = vmatpush3.msra.mxu0 %v14673_v57 }
 0x2ca   :  { %13249 = vmatpush3.msra.mxu1 %v14673_v57  ;;  %13217 = vmatprep.subr.mxu0 %v16413_v21 }
 0x2cb   :  { %13250 = vmatprep.subr.mxu1 %v16413_v21  ;;  %13218 = vmatpush3.msra.mxu0 %v14681_v60 }
 0x2cc   :  { %13251 = vmatpush3.msra.mxu1 %v14681_v60  ;;  %13219 = vmatprep.subr.mxu0 %v16413_v21 }
 0x2cd   :  { %13252 = vmatprep.subr.mxu1 %v16413_v21  ;;  %13220 = vmatpush3.msra.mxu0 %v16426_v63 }
 0x2ce   :  { %13253 = vmatpush3.msra.mxu1 %v16426_v63  ;;  %13221 = vmatprep.subr.mxu0 %v16413_v21 }
 0x2cf   :  { %13254 = vmatprep.subr.mxu1 %v16413_v21  ;;  %13222 = vmatpush3.msra.mxu0 %v16427_v1 }
 0x2d0   :  { %13223 = vmatprep.mubr.msk.f32.mxu0 %vm14432_vm1, %v16413_v21  ;;  %13255 = vmatpush3.msra.mxu1 %v16427_v1 }
 0x2d1   :  { %13256 = vmatprep.mubr.msk.f32.mxu1 %vm14432_vm1, %v16413_v21  ;;  %13224 = vmatmul.mubr.f32.vlgmr.msra.gmra.mxu0 %v15088_v17 }
 0x2d2   :  { %13237 = vmatprep.subr.mxu0 %v16413_v21  ;;  %13257 = vmatmul.mubr.f32.vlgmr.msra.gmra.mxu1 %v15080_v62 }
 0x2d3   :  { %13270 = vmatprep.subr.mxu1 %v16413_v21  ;;  %13238 = vmatpush3.msra.mxu0 %v16428_v30 }
 0x2d4   :  { %13271 = vmatpush3.msra.mxu1 %v14673_v57  ;;  %13239 = vmatprep.subr.mxu0 %v16413_v21 }
 0x2d5   :  { %13272 = vmatprep.subr.mxu1 %v16413_v21  ;;  %13240 = vmatpush3.msra.mxu0 %v16429_v12 }
 0x2d6   :  { %13273 = vmatpush3.msra.mxu1 %v14681_v60  ;;  %13241 = vmatprep.subr.mxu0 %v16413_v21 }
 0x2d7   :  { %13274 = vmatprep.subr.mxu1 %v16413_v21  ;;  %13242 = vmatpush3.msra.mxu0 %v16430_v23 }
 0x2d8   :  { %13275 = vmatpush3.msra.mxu1 %v16426_v63  ;;  %13243 = vmatprep.subr.mxu0 %v16413_v21 }
 0x2d9   :  { %13276 = vmatprep.subr.mxu1 %v16413_v21  ;;  %13244 = vmatpush3.msra.mxu0 %v16431_v51  ;;  %v4010_v51 = vld [vmem:[#allocation3 + $0x30] sm:$0xff] }
 0x2da   :  { %13245 = vmatprep.mubr.msk.f32.mxu0 %vm14432_vm1, %v16413_v21  ;;  %13277 = vmatpush3.msra.mxu1 %v16427_v1 }
 0x2db   :  { %13278 = vmatprep.mubr.msk.f32.mxu1 %vm14432_vm1, %v16413_v21  ;;  %13246 = vmatmul.mubr.f32.vlgmr.msra.gmra.mxu0 %v15073_v37 }
 0x2dc   :  { %13259 = vmatprep.subr.mxu0 %v16413_v21  ;;  %13279 = vmatmul.mubr.f32.vlgmr.msra.gmra.mxu1 %v15069_v29 }
 0x2dd   :  { %13260 = vmatpush3.msra.mxu0 %v16432_v59  ;;  %13267 = vmatprep.mubr.msk.f32.mxu0 %vm14432_vm1, %v16413_v21 }
 0x2de   :  { %13261 = vmatprep.subr.mxu0 %v16413_v21  ;;  %13292 = vmatprep.subr.mxu1 %v16413_v21 }
 0x2df   :  { %13262 = vmatpush3.msra.mxu0 %v16433_v27  ;;  %13293 = vmatpush3.msra.mxu1 %v16434_v7 }
 0x2e0   :  { %13263 = vmatprep.subr.mxu0 %v16413_v21  ;;  %13294 = vmatprep.subr.mxu1 %v16413_v21 }
 0x2e1   :  { %13264 = vmatpush3.msra.mxu0 %v16435_v10  ;;  %13295 = vmatpush3.msra.mxu1 %v16436_v34 }
 0x2e2   :  { %13265 = vmatprep.subr.mxu0 %v16413_v21  ;;  %13296 = vmatprep.subr.mxu1 %v16413_v21 }
 0x2e3   :  { %13266 = vmatpush3.msra.mxu0 %v16437_v24  ;;  %13297 = vmatpush3.msra.mxu1 %v16438_v28 }
 0x2e4   :  { %13268 = vmatmul.mubr.f32.vlgmr.msra.gmra.mxu0 %v15069_v29  ;;  %13298 = vmatprep.subr.mxu1 %v16413_v21 }
 0x2e5   :  { %13299 = vmatpush3.msra.mxu1 %v16439_v25  ;;  %13281 = vmatprep.subr.mxu0 %v16413_v21 }
 0x2e6   :  { %13300 = vmatprep.mubr.msk.f32.mxu1 %vm14432_vm1, %v16413_v21  ;;  %13314 = vmatprep.subr.mxu1 %v16413_v21 }
 0x2e7   :  { %13282 = vmatpush3.msra.mxu0 %v14464_v4  ;;  %13289 = vmatprep.mubr.msk.f32.mxu0 %vm14432_vm1, %v16413_v21 }
 0x2e8   :  { %13283 = vmatprep.subr.mxu0 %v16413_v21 }
 0x2e9   :  { %13284 = vmatpush3.msra.mxu0 %v14466_v5 }
 0x2ea   :  { %13285 = vmatprep.subr.mxu0 %v16413_v21 }
 0x2eb   :  { %13286 = vmatpush3.msra.mxu0 %v14468_v6 }
 0x2ec   :  { %13287 = vmatprep.subr.mxu0 %v16413_v21 }
 0x2ed   :  { %13288 = vmatpush3.msra.mxu0 %v14476_v9 }
 0x2ee   :  { %13303 = vmatprep.subr.mxu0 %v16413_v21 }
 0x34e   :  { %v3205_v22 = vpop.f32.mrf.mxu1 }
 0x350   :  { %v13104_v61 = vpop.f32.mrf.mxu1 }
 0x356   :  { %v3362_v58 = vpop.f32.mrf.mxu1 }
 0x357   :  { %v3114_v0 = vpop.f32.mrf.mxu0 }
 0x358   :  { %v13126_v26 = vpop.f32.mrf.mxu1  ;;  %v3206_v25 = vadd.f32 %v3205_v22, %v3114_v0 }
 0x359   :  { %v13093_v56 = vpop.f32.mrf.mxu0 }
 0x35f   :  { %v3285_v31 = vpop.f32.mrf.mxu0 }
 0x360   :  { %v3520_v3 = vpop.f32.mrf.mxu1  ;;  %v3286_v28 = vadd.f32 %v3285_v31, %v3206_v25 }
 0x361   :  { %v13115_v2 = vpop.f32.mrf.mxu0 }
 0x362   :  { %v13148_v29 = vpop.f32.mrf.mxu1  ;;  %v3363_v10 = vadd.f32 %v3362_v58, %v3286_v28 }
 0x369   :  { %v3445_v37 = vpop.f32.mrf.mxu0 }
 0x36a   :  { %v3690_v62 = vpop.f32.mrf.mxu1  ;;  %v3446_v61 = vadd.f32 %v3445_v37, %v3363_v10 }
 0x36b   :  { %v13137_v53 = vpop.f32.mrf.mxu0 }
 0x36c   :  { %v13170_v17 = vpop.f32.mrf.mxu1  ;;  %v3521_v59 = vadd.f32 %v3520_v3, %v3446_v61 }
 0x36e   :  { %v4013_v23 = vadd.f32 %v4010_v51, %v3521_v59 }
 0x370   :  { %v11955_v1 = vmul.f32 -1.442695, %v4013_v23 }
 0x372   :  { %14298 = vpow2.f32 %v11955_v1  ;;  %v15282_v1 = vld [vmem:[%s16359_s1] ss:$0 sm:$0xff] }
 0x373   :  { %v3599_v24 = vpop.f32.mrf.mxu0 }
 0x374   :  { %v3847_v34 = vpop.f32.mrf.mxu1  ;;  %v3691_v2 = vadd.f32 %v3690_v62, %v3599_v24 }
 0x375   :  { %v13159_v7 = vpop.f32.mrf.mxu0 }
 0x376   :  { %v13192_v27 = vpop.f32.mrf.mxu1  ;;  %v4011_v7 = vld [vmem:[#allocation3 + $0x38] sm:$0xff] }
 0x37d   :  { %v3770_v26 = vpop.f32.mrf.mxu0 }
 0x37e   :  { %v4005_v56 = vpop.f32.mrf.mxu1  ;;  %v3771_v30 = vadd.f32 %v3770_v26, %v3691_v2 }
 0x37f   :  { %v13181_v12 = vpop.f32.mrf.mxu0  ;;  %v14299_v51 = vpop.eup %14298 }
 0x380   :  { %v13214_v29 = vpop.f32.mrf.mxu1  ;;  %v3848_v53 = vadd.f32 %v3847_v34, %v3771_v30  ;;  %v4017_v59 = vadd.f32 1.0, %v14299_v51 }
 0x387   :  { %v3930_v22 = vpop.f32.mrf.mxu0 }
 0x388   :  { %v3931_v25 = vadd.f32 %v3930_v22, %v3848_v53  ;;  %v4193_v0 = vpop.f32.mrf.mxu1 }
 0x389   :  { %v13203_v31 = vpop.f32.mrf.mxu0 }
 0x38a   :  { %v4006_v28 = vadd.f32 %v4005_v56, %v3931_v25  ;;  %v13236_v27 = vpop.f32.mrf.mxu1 }
 0x38c   :  { %v4020_v10 = vadd.f32 %v4011_v7, %v4006_v28  ;;  %v4012_v7 = vld [vmem:[#allocation3 + $0x40] sm:$0xff] }
 0x38e   :  { %v11956_v58 = vmul.f32 -1.442695, %v4020_v10 }
 0x390   :  { %14300 = vpow2.f32 %v11956_v58 }
 0x391   :  { %v4102_v3 = vpop.f32.mrf.mxu0  ;;  %14302 = vrcp.f32 %v4017_v59 }
 0x392   :  { %v4350_v37 = vpop.f32.mrf.mxu1  ;;  %v4103_v30 = vadd.f32 %v15282_v1, %v4102_v3 }
 0x393   :  { %v13225_v17 = vpop.f32.mrf.mxu0 }
 0x394   :  { %v13258_v12 = vpop.f32.mrf.mxu1  ;;  %v4194_v24 = vadd.f32 %v4193_v0, %v4103_v30 }
 0x39b   :  { %v4273_v23 = vpop.f32.mrf.mxu0 }
 0x39c   :  { %v4508_v34 = vpop.f32.mrf.mxu1  ;;  %v4274_v26 = vadd.f32 %v4273_v23, %v4194_v24  ;;  %v16440_v24 = vld [vmem:[#allocation21_spill] sm:$0xff] }
 0x39d   :  { %v13247_v62 = vpop.f32.mrf.mxu0  ;;  %v14301_v56 = vpop.eup %14300 }
 0x39e   :  { %v13280_v61 = vpop.f32.mrf.mxu1  ;;  %v4351_v2 = vadd.f32 %v4350_v37, %v4274_v26  ;;  %v4024_v53 = vadd.f32 1.0, %v14301_v56  ;;  %v14303_v28 = vpop.eup %14302  ;;  %v16441_v62 = vld [vmem:[#allocation19_spill] sm:$0xff]  ;;  %v16443_v26 = vld [vmem:[#allocation24_spill] sm:$0xff]  ;;  %v16444_v56 = vld [vmem:[#allocation26_spill] sm:$0xff] }
 0x39f   :  { %v16442_v61 = vld [vmem:[#allocation22_spill] sm:$0xff] }
 0x3a0   :  { %14304 = vrcp.f32 %v4024_v53  ;;  %v16447_v53 = vld [vmem:[#allocation15_spill] sm:$0xff] }
 0x3a4   :  { %v4433_v29 = vpop.f32.mrf.mxu0 }
 0x3a5   :  { %v4434_v22 = vadd.f32 %v4433_v29, %v4351_v2  ;;  %v16445_v2 = vld [vmem:[#allocation23_spill] sm:$0xff]  ;;  %v16446_v29 = vld [vmem:[#allocation25_spill] sm:$0xff] }
 0x3a6   :  { %v13269_v25 = vpop.f32.mrf.mxu0 }
 0x3a7   :  { %v4509_v31 = vadd.f32 %v4508_v34, %v4434_v22  ;;  %v16448_v22 = vld [vmem:[#allocation27_spill] sm:$0xff]  ;;  %v16449_v25 = vld [vmem:[#allocation16_spill] sm:$0xff] }
 0x3a9   :  { %v4512_v27 = vmul.f32 %v14303_v28, %v4509_v31  ;;  %v16450_v31 = vld [vmem:[#allocation28_spill] sm:$0xff]  ;;  %v16451_v28 = vld [vmem:[#allocation17_spill] sm:$0xff] }
 0x3ab   :  { %v4513_v10 = vadd.f32 %v4512_v27, %v4012_v7  ;;  %v16452_v7 = vld [vmem:[#allocation18_spill] sm:$0xff] }
 0x3ad   :  { %14306 = vtanh.f32 %v4513_v10  ;;  %v14305_v58 = vpop.eup %14304 }
 0x3ae   :  { %v4515_v3 = vsub.f32 1.0, %v14305_v58  ;;  %v4517_v0 = vmul.f32 %v14305_v58, %v15065_v8 }
 0x3ba   :  { %v14307_v17 = vpop.eup %14306 }
 0x3bb   :  { %v4516_v51 = vmul.f32 %v14307_v17, %v4515_v3 }
 0x3bd   :  { %v15286_v12 = vadd.f32 %v4517_v0, %v4516_v51 }
 0x3bf   :  { %v4520_v37 = vsel %vm31_vm0, %v15286_v12, 0 }
 0x3c0   :  { %v15290_v59 = vand.u32 4294901760, %v4520_v37 }
 0x3c2   :  { %13301 = vmatmul.mubr.f32.vlgmr.msra.gmra.mxu1 %v15290_v59  ;;  %v15294_v30 = vsub.f32 %v4520_v37, %v15290_v59 }
 0x3c3   :  { %13315 = vmatpush3.msra.mxu1 %v14464_v4  ;;  %13322 = vmatprep.mubr.msk.f32.mxu1 %vm14432_vm1, %v16413_v21 }
 0x3c4   :  { %13316 = vmatprep.subr.mxu1 %v16413_v21  ;;  %v15301_v8 = vand.u32 4294901760, %v15294_v30 }
 0x3c5   :  { %13317 = vmatpush3.msra.mxu1 %v14466_v5 }
 0x3c6   :  { %13318 = vmatprep.subr.mxu1 %v16413_v21  ;;  %v4594_v23 = vsub.f32 %v15294_v30, %v15301_v8 }
 0x3c7   :  { %13319 = vmatpush3.msra.mxu1 %v14468_v6 }
 0x3c8   :  { %13320 = vmatprep.subr.mxu1 %v16413_v21  ;;  %v15309_v34 = vand.u32 4294901760, %v4594_v23 }
 0x3c9   :  { %13321 = vmatpush3.msra.mxu1 %v14476_v9 }
 0x3ca   :  { %13323 = vmatmul.mubr.f32.vlgmr.msra.gmra.mxu1 %v15301_v8  ;;  %13336 = vmatprep.subr.mxu1 %v16413_v21 }
 0x3cb   :  { %13290 = vmatmul.mubr.f32.vlgmr.msra.gmra.mxu0 %v15309_v34  ;;  %13337 = vmatpush3.msra.mxu1 %v14464_v4 }
 0x3cc   :  { %13304 = vmatpush3.msra.mxu0 %v14482_v11  ;;  %13338 = vmatprep.subr.mxu1 %v16413_v21 }
 0x3cd   :  { %13305 = vmatprep.subr.mxu0 %v16413_v21  ;;  %13339 = vmatpush3.msra.mxu1 %v14466_v5 }
 0x3ce   :  { %13306 = vmatpush3.msra.mxu0 %v14487_v13  ;;  %13340 = vmatprep.subr.mxu1 %v16413_v21 }
 0x3cf   :  { %13307 = vmatprep.subr.mxu0 %v16413_v21  ;;  %13341 = vmatpush3.msra.mxu1 %v14468_v6 }
 0x3d0   :  { %13308 = vmatpush3.msra.mxu0 %v14490_v14  ;;  %13342 = vmatprep.subr.mxu1 %v16413_v21 }
 0x3d1   :  { %13309 = vmatprep.subr.mxu0 %v16413_v21  ;;  %13311 = vmatprep.mubr.msk.f32.mxu0 %vm14432_vm1, %v16413_v21 }
 0x3d2   :  { %13310 = vmatpush3.msra.mxu0 %v14494_v15  ;;  %13343 = vmatpush3.msra.mxu1 %v14476_v9 }
 0x3d3   :  { %13344 = vmatprep.mubr.msk.f32.mxu1 %vm14432_vm1, %v16413_v21  ;;  %13312 = vmatmul.mubr.f32.vlgmr.msra.gmra.mxu0 %v15294_v30 }
 0x3d4   :  { %13325 = vmatprep.subr.mxu0 %v16413_v21  ;;  %13345 = vmatmul.mubr.f32.vlgmr.msra.gmra.mxu1 %v15290_v59 }
 0x3d5   :  { %13358 = vmatprep.subr.mxu1 %v16413_v21  ;;  %13326 = vmatpush3.msra.mxu0 %v14498_v16 }
 0x3d6   :  { %13359 = vmatpush3.msra.mxu1 %v14629_v50  ;;  %13327 = vmatprep.subr.mxu0 %v16413_v21 }
 0x3d7   :  { %13360 = vmatprep.subr.mxu1 %v16413_v21  ;;  %13328 = vmatpush3.msra.mxu0 %v14504_v18 }
 0x3d8   :  { %13361 = vmatpush3.msra.mxu1 %v14640_v52  ;;  %13329 = vmatprep.subr.mxu0 %v16413_v21 }
 0x3d9   :  { %13362 = vmatprep.subr.mxu1 %v16413_v21  ;;  %13330 = vmatpush3.msra.mxu0 %v14507_v19 }
 0x3da   :  { %13363 = vmatpush3.msra.mxu1 %v14649_v54  ;;  %13331 = vmatprep.subr.mxu0 %v16413_v21 }
 0x3db   :  { %13364 = vmatprep.subr.mxu1 %v16413_v21  ;;  %13332 = vmatpush3.msra.mxu0 %v14511_v20 }
 0x3dc   :  { %13333 = vmatprep.mubr.msk.f32.mxu0 %vm14432_vm1, %v16413_v21  ;;  %13365 = vmatpush3.msra.mxu1 %v14655_v55 }
 0x3dd   :  { %13366 = vmatprep.mubr.msk.f32.mxu1 %vm14432_vm1, %v16413_v21  ;;  %13334 = vmatmul.mubr.f32.vlgmr.msra.gmra.mxu0 %v15290_v59 }
 0x3de   :  { %13347 = vmatprep.subr.mxu0 %v16413_v21  ;;  %13367 = vmatmul.mubr.f32.vlgmr.msra.gmra.mxu1 %v15290_v59 }
 0x3df   :  { %13380 = vmatprep.subr.mxu1 %v16413_v21  ;;  %13348 = vmatpush3.msra.mxu0 %v14559_v33 }
 0x3e0   :  { %13381 = vmatpush3.msra.mxu1 %v14559_v33  ;;  %13349 = vmatprep.subr.mxu0 %v16413_v21 }
 0x3e1   :  { %13382 = vmatprep.subr.mxu1 %v16413_v21  ;;  %13350 = vmatpush3.msra.mxu0 %v14567_v36 }
 0x3e2   :  { %13383 = vmatpush3.msra.mxu1 %v14567_v36  ;;  %13351 = vmatprep.subr.mxu0 %v16413_v21 }
 0x3e3   :  { %13384 = vmatprep.subr.mxu1 %v16413_v21  ;;  %13352 = vmatpush3.msra.mxu0 %v14576_v39 }
 0x3e4   :  { %13385 = vmatpush3.msra.mxu1 %v14576_v39  ;;  %13353 = vmatprep.subr.mxu0 %v16413_v21 }
 0x3e5   :  { %13386 = vmatprep.subr.mxu1 %v16413_v21  ;;  %13354 = vmatpush3.msra.mxu0 %v14583_v40 }
 0x3e6   :  { %13355 = vmatprep.mubr.msk.f32.mxu0 %vm14432_vm1, %v16413_v21  ;;  %13387 = vmatpush3.msra.mxu1 %v14583_v40 }
 0x3e7   :  { %13388 = vmatprep.mubr.msk.f32.mxu1 %vm14432_vm1, %v16413_v21  ;;  %13356 = vmatmul.mubr.f32.vlgmr.msra.gmra.mxu0 %v15309_v34 }
 0x3e8   :  { %13369 = vmatprep.subr.mxu0 %v16413_v21  ;;  %13389 = vmatmul.mubr.f32.vlgmr.msra.gmra.mxu1 %v15301_v8 }
 0x3e9   :  { %13402 = vmatprep.subr.mxu1 %v16413_v21  ;;  %13370 = vmatpush3.msra.mxu0 %v14572_v38 }
 0x3ea   :  { %13403 = vmatpush3.msra.mxu1 %v14559_v33  ;;  %13371 = vmatprep.subr.mxu0 %v16413_v21 }
 0x3eb   :  { %13404 = vmatprep.subr.mxu1 %v16413_v21  ;;  %13372 = vmatpush3.msra.mxu0 %v14586_v41 }
 0x3ec   :  { %13405 = vmatpush3.msra.mxu1 %v14567_v36  ;;  %13373 = vmatprep.subr.mxu0 %v16413_v21 }
 0x3ed   :  { %13406 = vmatprep.subr.mxu1 %v16413_v21  ;;  %13374 = vmatpush3.msra.mxu0 %v14596_v43 }
 0x3ee   :  { %13407 = vmatpush3.msra.mxu1 %v14576_v39  ;;  %13375 = vmatprep.subr.mxu0 %v16413_v21 }
 0x3ef   :  { %13408 = vmatprep.subr.mxu1 %v16413_v21  ;;  %13376 = vmatpush3.msra.mxu0 %v14607_v45 }
 0x3f0   :  { %13377 = vmatprep.mubr.msk.f32.mxu0 %vm14432_vm1, %v16413_v21  ;;  %13409 = vmatpush3.msra.mxu1 %v14583_v40 }
 0x3f1   :  { %13410 = vmatprep.mubr.msk.f32.mxu1 %vm14432_vm1, %v16413_v21  ;;  %13378 = vmatmul.mubr.f32.vlgmr.msra.gmra.mxu0 %v15294_v30 }
 0x3f2   :  { %13391 = vmatprep.subr.mxu0 %v16413_v21  ;;  %13411 = vmatmul.mubr.f32.vlgmr.msra.gmra.mxu1 %v15290_v59 }
 0x3f3   :  { %13424 = vmatprep.subr.mxu1 %v16413_v21  ;;  %13392 = vmatpush3.msra.mxu0 %v14591_v42 }
 0x3f4   :  { %13425 = vmatpush3.msra.mxu1 %v14743_v32  ;;  %13393 = vmatprep.subr.mxu0 %v16413_v21 }
 0x3f5   :  { %13426 = vmatprep.subr.mxu1 %v16413_v21  ;;  %13394 = vmatpush3.msra.mxu0 %v14604_v44 }
 0x3f6   :  { %13427 = vmatpush3.msra.mxu1 %v14754_v35  ;;  %13395 = vmatprep.subr.mxu0 %v16413_v21 }
 0x3f7   :  { %13428 = vmatprep.subr.mxu1 %v16413_v21  ;;  %13396 = vmatpush3.msra.mxu0 %v14616_v47 }
 0x3f8   :  { %13429 = vmatpush3.msra.mxu1 %v14763_v46  ;;  %13397 = vmatprep.subr.mxu0 %v16413_v21 }
 0x3f9   :  { %13430 = vmatprep.subr.mxu1 %v16413_v21  ;;  %13398 = vmatpush3.msra.mxu0 %v14625_v49 }
 0x3fa   :  { %13399 = vmatprep.mubr.msk.f32.mxu0 %vm14432_vm1, %v16413_v21  ;;  %13431 = vmatpush3.msra.mxu1 %v14769_v48 }
 0x3fb   :  { %13432 = vmatprep.mubr.msk.f32.mxu1 %vm14432_vm1, %v16413_v21  ;;  %13400 = vmatmul.mubr.f32.vlgmr.msra.gmra.mxu0 %v15290_v59 }
 0x3fc   :  { %13413 = vmatprep.subr.mxu0 %v16413_v21  ;;  %13433 = vmatmul.mubr.f32.vlgmr.msra.gmra.mxu1 %v15290_v59 }
 0x3fd   :  { %13446 = vmatprep.subr.mxu1 %v16413_v21  ;;  %13414 = vmatpush3.msra.mxu0 %v14673_v57 }
 0x3fe   :  { %13447 = vmatpush3.msra.mxu1 %v14673_v57  ;;  %13415 = vmatprep.subr.mxu0 %v16413_v21 }
 0x3ff   :  { %13448 = vmatprep.subr.mxu1 %v16413_v21  ;;  %13416 = vmatpush3.msra.mxu0 %v14681_v60 }
 0x400   :  { %13449 = vmatpush3.msra.mxu1 %v14681_v60  ;;  %13417 = vmatprep.subr.mxu0 %v16413_v21 }
 0x401   :  { %13450 = vmatprep.subr.mxu1 %v16413_v21  ;;  %13418 = vmatpush3.msra.mxu0 %v16426_v63 }
 0x402   :  { %13451 = vmatpush3.msra.mxu1 %v16426_v63  ;;  %13419 = vmatprep.subr.mxu0 %v16413_v21 }
 0x403   :  { %13452 = vmatprep.subr.mxu1 %v16413_v21  ;;  %13420 = vmatpush3.msra.mxu0 %v16440_v24 }
 0x404   :  { %13421 = vmatprep.mubr.msk.f32.mxu0 %vm14432_vm1, %v16413_v21  ;;  %13453 = vmatpush3.msra.mxu1 %v16440_v24 }
 0x405   :  { %13454 = vmatprep.mubr.msk.f32.mxu1 %vm14432_vm1, %v16413_v21  ;;  %13422 = vmatmul.mubr.f32.vlgmr.msra.gmra.mxu0 %v15309_v34 }
 0x406   :  { %13435 = vmatprep.subr.mxu0 %v16413_v21  ;;  %13455 = vmatmul.mubr.f32.vlgmr.msra.gmra.mxu1 %v15301_v8 }
 0x407   :  { %13468 = vmatprep.subr.mxu1 %v16413_v21  ;;  %13436 = vmatpush3.msra.mxu0 %v16441_v62 }
 0x408   :  { %13469 = vmatpush3.msra.mxu1 %v14673_v57  ;;  %13437 = vmatprep.subr.mxu0 %v16413_v21 }
 0x409   :  { %13470 = vmatprep.subr.mxu1 %v16413_v21  ;;  %13438 = vmatpush3.msra.mxu0 %v16442_v61 }
 0x40a   :  { %13471 = vmatpush3.msra.mxu1 %v14681_v60  ;;  %13439 = vmatprep.subr.mxu0 %v16413_v21 }
 0x40b   :  { %13472 = vmatprep.subr.mxu1 %v16413_v21  ;;  %13440 = vmatpush3.msra.mxu0 %v16443_v26  ;;  %v5493_v26 = vld [vmem:[#allocation3 + $0x48] sm:$0xff] }
 0x40c   :  { %13473 = vmatpush3.msra.mxu1 %v16426_v63  ;;  %13441 = vmatprep.subr.mxu0 %v16413_v21 }
 0x40d   :  { %13474 = vmatprep.subr.mxu1 %v16413_v21  ;;  %13442 = vmatpush3.msra.mxu0 %v16444_v56 }
 0x40e   :  { %13443 = vmatprep.mubr.msk.f32.mxu0 %vm14432_vm1, %v16413_v21  ;;  %13475 = vmatpush3.msra.mxu1 %v16440_v24 }
 0x40f   :  { %13476 = vmatprep.mubr.msk.f32.mxu1 %vm14432_vm1, %v16413_v21  ;;  %13444 = vmatmul.mubr.f32.vlgmr.msra.gmra.mxu0 %v15294_v30 }
 0x410   :  { %13457 = vmatprep.subr.mxu0 %v16413_v21  ;;  %13477 = vmatmul.mubr.f32.vlgmr.msra.gmra.mxu1 %v15290_v59 }
 0x411   :  { %13458 = vmatpush3.msra.mxu0 %v16445_v2  ;;  %13465 = vmatprep.mubr.msk.f32.mxu0 %vm14432_vm1, %v16413_v21 }
 0x412   :  { %13459 = vmatprep.subr.mxu0 %v16413_v21  ;;  %13490 = vmatprep.subr.mxu1 %v16413_v21 }
 0x413   :  { %13460 = vmatpush3.msra.mxu0 %v16446_v29  ;;  %13491 = vmatpush3.msra.mxu1 %v16447_v53 }
 0x414   :  { %13461 = vmatprep.subr.mxu0 %v16413_v21  ;;  %13492 = vmatprep.subr.mxu1 %v16413_v21 }
 0x415   :  { %13462 = vmatpush3.msra.mxu0 %v16448_v22  ;;  %13493 = vmatpush3.msra.mxu1 %v16449_v25 }
 0x416   :  { %13463 = vmatprep.subr.mxu0 %v16413_v21  ;;  %13494 = vmatprep.subr.mxu1 %v16413_v21 }
 0x417   :  { %13464 = vmatpush3.msra.mxu0 %v16450_v31  ;;  %13495 = vmatpush3.msra.mxu1 %v16451_v28 }
 0x418   :  { %13466 = vmatmul.mubr.f32.vlgmr.msra.gmra.mxu0 %v15290_v59  ;;  %13496 = vmatprep.subr.mxu1 %v16413_v21 }
 0x419   :  { %13497 = vmatpush3.msra.mxu1 %v16452_v7  ;;  %13479 = vmatprep.subr.mxu0 %v16413_v21 }
 0x41a   :  { %13498 = vmatprep.mubr.msk.f32.mxu1 %vm14432_vm1, %v16413_v21  ;;  %13512 = vmatprep.subr.mxu1 %v16413_v21 }
 0x41b   :  { %13480 = vmatpush3.msra.mxu0 %v14464_v4  ;;  %13487 = vmatprep.mubr.msk.f32.mxu0 %vm14432_vm1, %v16413_v21 }
 0x41c   :  { %13481 = vmatprep.subr.mxu0 %v16413_v21 }
 0x41d   :  { %13482 = vmatpush3.msra.mxu0 %v14466_v5 }
 0x41e   :  { %13483 = vmatprep.subr.mxu0 %v16413_v21 }
 0x41f   :  { %13484 = vmatpush3.msra.mxu0 %v14468_v6 }
 0x420   :  { %13485 = vmatprep.subr.mxu0 %v16413_v21 }
 0x421   :  { %13486 = vmatpush3.msra.mxu0 %v14476_v9 }
 0x422   :  { %13501 = vmatprep.subr.mxu0 %v16413_v21 }
 0x482   :  { %v4688_v27 = vpop.f32.mrf.mxu1 }
 0x484   :  { %v13302_v10 = vpop.f32.mrf.mxu1 }
 0x48a   :  { %v4845_v58 = vpop.f32.mrf.mxu1 }
 0x48b   :  { %v4597_v3 = vpop.f32.mrf.mxu0 }
 0x48c   :  { %v13324_v17 = vpop.f32.mrf.mxu1  ;;  %v4689_v28 = vadd.f32 %v4688_v27, %v4597_v3 }
 0x48d   :  { %v13291_v0 = vpop.f32.mrf.mxu0 }
 0x493   :  { %v4768_v51 = vpop.f32.mrf.mxu0 }
 0x494   :  { %v5003_v37 = vpop.f32.mrf.mxu1  ;;  %v4769_v31 = vadd.f32 %v4768_v51, %v4689_v28 }
 0x495   :  { %v13313_v59 = vpop.f32.mrf.mxu0 }
 0x496   :  { %v13346_v30 = vpop.f32.mrf.mxu1  ;;  %v4846_v53 = vadd.f32 %v4845_v58, %v4769_v31 }
 0x49d   :  { %v4928_v8 = vpop.f32.mrf.mxu0 }
 0x49e   :  { %v5173_v23 = vpop.f32.mrf.mxu1  ;;  %v4929_v10 = vadd.f32 %v4928_v8, %v4846_v53 }
 0x49f   :  { %v13335_v34 = vpop.f32.mrf.mxu0 }
 0x4a0   :  { %v13368_v7 = vpop.f32.mrf.mxu1  ;;  %v5004_v56 = vadd.f32 %v5003_v37, %v4929_v10 }
 0x4a2   :  { %v5496_v61 = vadd.f32 %v5493_v26, %v5004_v56 }
 0x4a4   :  { %v11957_v63 = vmul.f32 -1.442695, %v5496_v61 }
 0x4a6   :  { %14308 = vpow2.f32 %v11957_v63 }
 0x4a7   :  { %v5082_v25 = vpop.f32.mrf.mxu0 }
 0x4a8   :  { %v5330_v22 = vpop.f32.mrf.mxu1  ;;  %v5174_v59 = vadd.f32 %v5173_v23, %v5082_v25 }
 0x4a9   :  { %v13357_v29 = vpop.f32.mrf.mxu0 }
 0x4aa   :  { %v13390_v2 = vpop.f32.mrf.mxu1  ;;  %v5494_v29 = vld [vmem:[#allocation3 + $0x50] sm:$0xff] }
 0x4b1   :  { %v5253_v17 = vpop.f32.mrf.mxu0 }
 0x4b2   :  { %v5488_v0 = vpop.f32.mrf.mxu1  ;;  %v5254_v24 = vadd.f32 %v5253_v17, %v5174_v59 }
 0x4b3   :  { %v13379_v62 = vpop.f32.mrf.mxu0  ;;  %v14309_v26 = vpop.eup %14308 }
 0x4b4   :  { %v13412_v30 = vpop.f32.mrf.mxu1  ;;  %v5331_v34 = vadd.f32 %v5330_v22, %v5254_v24  ;;  %v5500_v56 = vadd.f32 1.0, %v14309_v26 }
 0x4bb   :  { %v5413_v7 = vpop.f32.mrf.mxu0 }
 0x4bc   :  { %v5414_v28 = vadd.f32 %v5413_v7, %v5331_v34  ;;  %v5676_v27 = vpop.f32.mrf.mxu1 }
 0x4bd   :  { %v13401_v3 = vpop.f32.mrf.mxu0 }
 0x4be   :  { %v5489_v31 = vadd.f32 %v5488_v0, %v5414_v28  ;;  %v13434_v2 = vpop.f32.mrf.mxu1 }
 0x4c0   :  { %v5503_v53 = vadd.f32 %v5494_v29, %v5489_v31  ;;  %v5495_v31 = vld [vmem:[#allocation3 + $0x58] sm:$0xff] }
 0x4c2   :  { %v11958_v58 = vmul.f32 -1.442695, %v5503_v53 }
 0x4c4   :  { %14310 = vpow2.f32 %v11958_v58 }
 0x4c5   :  { %v5585_v51 = vpop.f32.mrf.mxu0  ;;  %14312 = vrcp.f32 %v5500_v56 }
 0x4c6   :  { %v5833_v37 = vpop.f32.mrf.mxu1  ;;  %v5586_v61 = vadd.f32 %v15282_v1, %v5585_v51 }
 0x4c7   :  { %v13423_v8 = vpop.f32.mrf.mxu0 }
 0x4c8   :  { %v13456_v62 = vpop.f32.mrf.mxu1  ;;  %v5677_v22 = vadd.f32 %v5676_v27, %v5586_v61 }
 0x4cf   :  { %v5756_v63 = vpop.f32.mrf.mxu0 }
 0x4d0   :  { %v5991_v24 = vpop.f32.mrf.mxu1  ;;  %v5757_v10 = vadd.f32 %v5756_v63, %v5677_v22  ;;  %v16453_v63 = vld [vmem:[#allocation20_spill] sm:$0xff]  ;;  %v16455_v22 = vld [vmem:[#allocation19_spill] sm:$0xff] }
 0x4d1   :  { %v13445_v25 = vpop.f32.mrf.mxu0  ;;  %v14311_v17 = vpop.eup %14310 }
 0x4d2   :  { %v13478_v23 = vpop.f32.mrf.mxu1  ;;  %v5834_v0 = vadd.f32 %v5833_v37, %v5757_v10  ;;  %v5507_v30 = vadd.f32 1.0, %v14311_v17  ;;  %v14313_v3 = vpop.eup %14312  ;;  %v16456_v25 = vld [vmem:[#allocation22_spill] sm:$0xff]  ;;  %v16459_v17 = vld [vmem:[#allocation23_spill] sm:$0xff] }
 0x4d3   :  { %v16457_v23 = vld [vmem:[#allocation24_spill] sm:$0xff]  ;;  %v16458_v10 = vld [vmem:[#allocation26_spill] sm:$0xff] }
 0x4d4   :  { %14314 = vrcp.f32 %v5507_v30  ;;  %v16462_v30 = vld [vmem:[#allocation27_spill] sm:$0xff] }
 0x4d8   :  { %v5916_v59 = vpop.f32.mrf.mxu0 }
 0x4d9   :  { %v5917_v34 = vadd.f32 %v5916_v59, %v5834_v0  ;;  %v16460_v0 = vld [vmem:[#allocation25_spill] sm:$0xff]  ;;  %v16461_v59 = vld [vmem:[#allocation15_spill] sm:$0xff] }
 0x4da   :  { %v13467_v7 = vpop.f32.mrf.mxu0 }
 0x4db   :  { %v5992_v28 = vadd.f32 %v5991_v24, %v5917_v34  ;;  %v16454_v24 = vld [vmem:[#allocation21_spill] sm:$0xff]  ;;  %v16463_v34 = vld [vmem:[#allocation16_spill] sm:$0xff] }
 0x4dc   :  { %v16464_v7 = vld [vmem:[#allocation28_spill] sm:$0xff] }
 0x4dd   :  { %v5995_v29 = vmul.f32 %v14313_v3, %v5992_v28  ;;  %v16465_v28 = vld [vmem:[#allocation17_spill] sm:$0xff]  ;;  %v16466_v3 = vld [vmem:[#allocation18_spill] sm:$0xff] }
 0x4df   :  { %v5996_v2 = vadd.f32 %v5995_v29, %v5495_v31 }
 0x4e1   :  { %14316 = vtanh.f32 %v5996_v2  ;;  %v14315_v1 = vpop.eup %14314 }
 0x4e2   :  { %v5998_v53 = vsub.f32 1.0, %v14315_v1  ;;  %v6000_v27 = vmul.f32 %v14315_v1, %v15286_v12 }
 0x4ee   :  { %v14317_v58 = vpop.eup %14316 }
 0x4ef   :  { %v5999_v51 = vmul.f32 %v14317_v58, %v5998_v53 }
 0x4f1   :  { %v15502_v8 = vadd.f32 %v6000_v27, %v5999_v51 }
 0x4f3   :  { %v6003_v37 = vsel %vm31_vm0, %v15502_v8, 0 }
 0x4f4   :  { %v15506_v26 = vand.u32 4294901760, %v6003_v37 }
 0x4f6   :  { %13499 = vmatmul.mubr.f32.vlgmr.msra.gmra.mxu1 %v15506_v26  ;;  %v15510_v62 = vsub.f32 %v6003_v37, %v15506_v26 }
 0x4f7   :  { %13513 = vmatpush3.msra.mxu1 %v14464_v4  ;;  %13520 = vmatprep.mubr.msk.f32.mxu1 %vm14432_vm1, %v16413_v21 }
 0x4f8   :  { %13514 = vmatprep.subr.mxu1 %v16413_v21  ;;  %v15517_v12 = vand.u32 4294901760, %v15510_v62 }
 0x4f9   :  { %13515 = vmatpush3.msra.mxu1 %v14466_v5 }
 0x4fa   :  { %13516 = vmatprep.subr.mxu1 %v16413_v21  ;;  %v6077_v56 = vsub.f32 %v15510_v62, %v15517_v12 }
 0x4fb   :  { %13517 = vmatpush3.msra.mxu1 %v14468_v6 }
 0x4fc   :  { %13518 = vmatprep.subr.mxu1 %v16413_v21  ;;  %v15525_v61 = vand.u32 4294901760, %v6077_v56 }
 0x4fd   :  { %13519 = vmatpush3.msra.mxu1 %v14476_v9 }
 0x4fe   :  { %13521 = vmatmul.mubr.f32.vlgmr.msra.gmra.mxu1 %v15517_v12  ;;  %13534 = vmatprep.subr.mxu1 %v16413_v21 }
 0x4ff   :  { %13488 = vmatmul.mubr.f32.vlgmr.msra.gmra.mxu0 %v15525_v61  ;;  %13535 = vmatpush3.msra.mxu1 %v14464_v4 }
 0x500   :  { %13502 = vmatpush3.msra.mxu0 %v14482_v11  ;;  %13536 = vmatprep.subr.mxu1 %v16413_v21 }
 0x501   :  { %13503 = vmatprep.subr.mxu0 %v16413_v21  ;;  %13537 = vmatpush3.msra.mxu1 %v14466_v5 }
 0x502   :  { %13504 = vmatpush3.msra.mxu0 %v14487_v13  ;;  %13538 = vmatprep.subr.mxu1 %v16413_v21 }
 0x503   :  { %13505 = vmatprep.subr.mxu0 %v16413_v21  ;;  %13539 = vmatpush3.msra.mxu1 %v14468_v6 }
 0x504   :  { %13506 = vmatpush3.msra.mxu0 %v14490_v14  ;;  %13540 = vmatprep.subr.mxu1 %v16413_v21 }
 0x505   :  { %13507 = vmatprep.subr.mxu0 %v16413_v21  ;;  %13509 = vmatprep.mubr.msk.f32.mxu0 %vm14432_vm1, %v16413_v21 }
 0x506   :  { %13508 = vmatpush3.msra.mxu0 %v14494_v15  ;;  %13541 = vmatpush3.msra.mxu1 %v14476_v9 }
 0x507   :  { %13542 = vmatprep.mubr.msk.f32.mxu1 %vm14432_vm1, %v16413_v21  ;;  %13510 = vmatmul.mubr.f32.vlgmr.msra.gmra.mxu0 %v15510_v62 }
 0x508   :  { %13523 = vmatprep.subr.mxu0 %v16413_v21  ;;  %13543 = vmatmul.mubr.f32.vlgmr.msra.gmra.mxu1 %v15506_v26 }
 0x509   :  { %13556 = vmatprep.subr.mxu1 %v16413_v21  ;;  %13524 = vmatpush3.msra.mxu0 %v14498_v16 }
 0x50a   :  { %13557 = vmatpush3.msra.mxu1 %v14629_v50  ;;  %13525 = vmatprep.subr.mxu0 %v16413_v21 }
 0x50b   :  { %13558 = vmatprep.subr.mxu1 %v16413_v21  ;;  %13526 = vmatpush3.msra.mxu0 %v14504_v18 }
 0x50c   :  { %13559 = vmatpush3.msra.mxu1 %v14640_v52  ;;  %13527 = vmatprep.subr.mxu0 %v16413_v21 }
 0x50d   :  { %13560 = vmatprep.subr.mxu1 %v16413_v21  ;;  %13528 = vmatpush3.msra.mxu0 %v14507_v19 }
 0x50e   :  { %13561 = vmatpush3.msra.mxu1 %v14649_v54  ;;  %13529 = vmatprep.subr.mxu0 %v16413_v21 }
 0x50f   :  { %13562 = vmatprep.subr.mxu1 %v16413_v21  ;;  %13530 = vmatpush3.msra.mxu0 %v14511_v20 }
 0x510   :  { %13531 = vmatprep.mubr.msk.f32.mxu0 %vm14432_vm1, %v16413_v21  ;;  %13563 = vmatpush3.msra.mxu1 %v14655_v55 }
 0x511   :  { %13564 = vmatprep.mubr.msk.f32.mxu1 %vm14432_vm1, %v16413_v21  ;;  %13532 = vmatmul.mubr.f32.vlgmr.msra.gmra.mxu0 %v15506_v26 }
 0x512   :  { %13545 = vmatprep.subr.mxu0 %v16413_v21  ;;  %13565 = vmatmul.mubr.f32.vlgmr.msra.gmra.mxu1 %v15506_v26 }
 0x513   :  { %13578 = vmatprep.subr.mxu1 %v16413_v21  ;;  %13546 = vmatpush3.msra.mxu0 %v14559_v33 }
 0x514   :  { %13579 = vmatpush3.msra.mxu1 %v14559_v33  ;;  %13547 = vmatprep.subr.mxu0 %v16413_v21 }
 0x515   :  { %13580 = vmatprep.subr.mxu1 %v16413_v21  ;;  %13548 = vmatpush3.msra.mxu0 %v14567_v36 }
 0x516   :  { %13581 = vmatpush3.msra.mxu1 %v14567_v36  ;;  %13549 = vmatprep.subr.mxu0 %v16413_v21 }
 0x517   :  { %13582 = vmatprep.subr.mxu1 %v16413_v21  ;;  %13550 = vmatpush3.msra.mxu0 %v14576_v39 }
 0x518   :  { %13583 = vmatpush3.msra.mxu1 %v14576_v39  ;;  %13551 = vmatprep.subr.mxu0 %v16413_v21 }
 0x519   :  { %13584 = vmatprep.subr.mxu1 %v16413_v21  ;;  %13552 = vmatpush3.msra.mxu0 %v14583_v40 }
 0x51a   :  { %13553 = vmatprep.mubr.msk.f32.mxu0 %vm14432_vm1, %v16413_v21  ;;  %13585 = vmatpush3.msra.mxu1 %v14583_v40 }
 0x51b   :  { %13586 = vmatprep.mubr.msk.f32.mxu1 %vm14432_vm1, %v16413_v21  ;;  %13554 = vmatmul.mubr.f32.vlgmr.msra.gmra.mxu0 %v15525_v61 }
 0x51c   :  { %13567 = vmatprep.subr.mxu0 %v16413_v21  ;;  %13587 = vmatmul.mubr.f32.vlgmr.msra.gmra.mxu1 %v15517_v12 }
 0x51d   :  { %13600 = vmatprep.subr.mxu1 %v16413_v21  ;;  %13568 = vmatpush3.msra.mxu0 %v14572_v38 }
 0x51e   :  { %13601 = vmatpush3.msra.mxu1 %v14559_v33  ;;  %13569 = vmatprep.subr.mxu0 %v16413_v21 }
 0x51f   :  { %13602 = vmatprep.subr.mxu1 %v16413_v21  ;;  %13570 = vmatpush3.msra.mxu0 %v14586_v41 }
 0x520   :  { %13603 = vmatpush3.msra.mxu1 %v14567_v36  ;;  %13571 = vmatprep.subr.mxu0 %v16413_v21 }
 0x521   :  { %13604 = vmatprep.subr.mxu1 %v16413_v21  ;;  %13572 = vmatpush3.msra.mxu0 %v14596_v43 }
 0x522   :  { %13605 = vmatpush3.msra.mxu1 %v14576_v39  ;;  %13573 = vmatprep.subr.mxu0 %v16413_v21 }
 0x523   :  { %13606 = vmatprep.subr.mxu1 %v16413_v21  ;;  %13574 = vmatpush3.msra.mxu0 %v14607_v45 }
 0x524   :  { %13575 = vmatprep.mubr.msk.f32.mxu0 %vm14432_vm1, %v16413_v21  ;;  %13607 = vmatpush3.msra.mxu1 %v14583_v40 }
 0x525   :  { %13608 = vmatprep.mubr.msk.f32.mxu1 %vm14432_vm1, %v16413_v21  ;;  %13576 = vmatmul.mubr.f32.vlgmr.msra.gmra.mxu0 %v15510_v62 }
 0x526   :  { %13589 = vmatprep.subr.mxu0 %v16413_v21  ;;  %13609 = vmatmul.mubr.f32.vlgmr.msra.gmra.mxu1 %v15506_v26 }
 0x527   :  { %13622 = vmatprep.subr.mxu1 %v16413_v21  ;;  %13590 = vmatpush3.msra.mxu0 %v14591_v42 }
 0x528   :  { %13623 = vmatpush3.msra.mxu1 %v14743_v32  ;;  %13591 = vmatprep.subr.mxu0 %v16413_v21 }
 0x529   :  { %13624 = vmatprep.subr.mxu1 %v16413_v21  ;;  %13592 = vmatpush3.msra.mxu0 %v14604_v44 }
 0x52a   :  { %13625 = vmatpush3.msra.mxu1 %v14754_v35  ;;  %13593 = vmatprep.subr.mxu0 %v16413_v21 }
 0x52b   :  { %13626 = vmatprep.subr.mxu1 %v16413_v21  ;;  %13594 = vmatpush3.msra.mxu0 %v14616_v47 }
 0x52c   :  { %13627 = vmatpush3.msra.mxu1 %v14763_v46  ;;  %13595 = vmatprep.subr.mxu0 %v16413_v21 }
 0x52d   :  { %13628 = vmatprep.subr.mxu1 %v16413_v21  ;;  %13596 = vmatpush3.msra.mxu0 %v14625_v49 }
 0x52e   :  { %13597 = vmatprep.mubr.msk.f32.mxu0 %vm14432_vm1, %v16413_v21  ;;  %13629 = vmatpush3.msra.mxu1 %v14769_v48 }
 0x52f   :  { %13630 = vmatprep.mubr.msk.f32.mxu1 %vm14432_vm1, %v16413_v21  ;;  %13598 = vmatmul.mubr.f32.vlgmr.msra.gmra.mxu0 %v15506_v26 }
 0x530   :  { %13611 = vmatprep.subr.mxu0 %v16413_v21  ;;  %13631 = vmatmul.mubr.f32.vlgmr.msra.gmra.mxu1 %v15506_v26 }
 0x531   :  { %13644 = vmatprep.subr.mxu1 %v16413_v21  ;;  %13612 = vmatpush3.msra.mxu0 %v14673_v57 }
 0x532   :  { %13645 = vmatpush3.msra.mxu1 %v14673_v57  ;;  %13613 = vmatprep.subr.mxu0 %v16413_v21 }
 0x533   :  { %13646 = vmatprep.subr.mxu1 %v16413_v21  ;;  %13614 = vmatpush3.msra.mxu0 %v14681_v60 }
 0x534   :  { %13647 = vmatpush3.msra.mxu1 %v14681_v60  ;;  %13615 = vmatprep.subr.mxu0 %v16413_v21 }
 0x535   :  { %13648 = vmatprep.subr.mxu1 %v16413_v21  ;;  %13616 = vmatpush3.msra.mxu0 %v16453_v63 }
 0x536   :  { %13649 = vmatpush3.msra.mxu1 %v16453_v63  ;;  %13617 = vmatprep.subr.mxu0 %v16413_v21 }
 0x537   :  { %13650 = vmatprep.subr.mxu1 %v16413_v21  ;;  %13618 = vmatpush3.msra.mxu0 %v16454_v24 }
 0x538   :  { %13619 = vmatprep.mubr.msk.f32.mxu0 %vm14432_vm1, %v16413_v21  ;;  %13651 = vmatpush3.msra.mxu1 %v16454_v24 }
 0x539   :  { %13652 = vmatprep.mubr.msk.f32.mxu1 %vm14432_vm1, %v16413_v21  ;;  %13620 = vmatmul.mubr.f32.vlgmr.msra.gmra.mxu0 %v15525_v61 }
 0x53a   :  { %13633 = vmatprep.subr.mxu0 %v16413_v21  ;;  %13653 = vmatmul.mubr.f32.vlgmr.msra.gmra.mxu1 %v15517_v12 }
 0x53b   :  { %13666 = vmatprep.subr.mxu1 %v16413_v21  ;;  %13634 = vmatpush3.msra.mxu0 %v16455_v22 }
 0x53c   :  { %13667 = vmatpush3.msra.mxu1 %v14673_v57  ;;  %13635 = vmatprep.subr.mxu0 %v16413_v21 }
 0x53d   :  { %13668 = vmatprep.subr.mxu1 %v16413_v21  ;;  %13636 = vmatpush3.msra.mxu0 %v16456_v25 }
 0x53e   :  { %13669 = vmatpush3.msra.mxu1 %v14681_v60  ;;  %13637 = vmatprep.subr.mxu0 %v16413_v21 }
 0x53f   :  { %13670 = vmatprep.subr.mxu1 %v16413_v21  ;;  %13638 = vmatpush3.msra.mxu0 %v16457_v23 }
 0x540   :  { %13671 = vmatpush3.msra.mxu1 %v16453_v63  ;;  %13639 = vmatprep.subr.mxu0 %v16413_v21 }
 0x541   :  { %13672 = vmatprep.subr.mxu1 %v16413_v21  ;;  %13640 = vmatpush3.msra.mxu0 %v16458_v10  ;;  %v6976_v10 = vld [vmem:[#allocation3 + $0x60] sm:$0xff] }
 0x542   :  { %13641 = vmatprep.mubr.msk.f32.mxu0 %vm14432_vm1, %v16413_v21  ;;  %13673 = vmatpush3.msra.mxu1 %v16454_v24 }
 0x543   :  { %13674 = vmatprep.mubr.msk.f32.mxu1 %vm14432_vm1, %v16413_v21  ;;  %13642 = vmatmul.mubr.f32.vlgmr.msra.gmra.mxu0 %v15510_v62 }
 0x544   :  { %13655 = vmatprep.subr.mxu0 %v16413_v21  ;;  %13675 = vmatmul.mubr.f32.vlgmr.msra.gmra.mxu1 %v15506_v26 }
 0x545   :  { %13656 = vmatpush3.msra.mxu0 %v16459_v17  ;;  %13663 = vmatprep.mubr.msk.f32.mxu0 %vm14432_vm1, %v16413_v21 }
 0x546   :  { %13657 = vmatprep.subr.mxu0 %v16413_v21  ;;  %13688 = vmatprep.subr.mxu1 %v16413_v21 }
 0x547   :  { %13658 = vmatpush3.msra.mxu0 %v16460_v0  ;;  %13689 = vmatpush3.msra.mxu1 %v16461_v59 }
 0x548   :  { %13659 = vmatprep.subr.mxu0 %v16413_v21  ;;  %13690 = vmatprep.subr.mxu1 %v16413_v21 }
 0x549   :  { %13660 = vmatpush3.msra.mxu0 %v16462_v30  ;;  %13691 = vmatpush3.msra.mxu1 %v16463_v34 }
 0x54a   :  { %13661 = vmatprep.subr.mxu0 %v16413_v21  ;;  %13692 = vmatprep.subr.mxu1 %v16413_v21 }
 0x54b   :  { %13662 = vmatpush3.msra.mxu0 %v16464_v7  ;;  %13693 = vmatpush3.msra.mxu1 %v16465_v28 }
 0x54c   :  { %13664 = vmatmul.mubr.f32.vlgmr.msra.gmra.mxu0 %v15506_v26  ;;  %13694 = vmatprep.subr.mxu1 %v16413_v21 }
 0x54d   :  { %13695 = vmatpush3.msra.mxu1 %v16466_v3  ;;  %13677 = vmatprep.subr.mxu0 %v16413_v21 }
 0x54e   :  { %13696 = vmatprep.mubr.msk.f32.mxu1 %vm14432_vm1, %v16413_v21  ;;  %13710 = vmatprep.subr.mxu1 %v16413_v21 }
 0x54f   :  { %13678 = vmatpush3.msra.mxu0 %v14464_v4  ;;  %13685 = vmatprep.mubr.msk.f32.mxu0 %vm14432_vm1, %v16413_v21 }
 0x550   :  { %13679 = vmatprep.subr.mxu0 %v16413_v21 }
 0x551   :  { %13680 = vmatpush3.msra.mxu0 %v14466_v5 }
 0x552   :  { %13681 = vmatprep.subr.mxu0 %v16413_v21 }
 0x553   :  { %13682 = vmatpush3.msra.mxu0 %v14468_v6 }
 0x554   :  { %13683 = vmatprep.subr.mxu0 %v16413_v21 }
 0x555   :  { %13684 = vmatpush3.msra.mxu0 %v14476_v9 }
 0x556   :  { %13699 = vmatprep.subr.mxu0 %v16413_v21 }
 0x5b6   :  { %v6171_v31 = vpop.f32.mrf.mxu1 }
 0x5b8   :  { %v13500_v29 = vpop.f32.mrf.mxu1 }
 0x5be   :  { %v6328_v2 = vpop.f32.mrf.mxu1 }
 0x5bf   :  { %v6080_v1 = vpop.f32.mrf.mxu0 }
 0x5c0   :  { %v13522_v53 = vpop.f32.mrf.mxu1  ;;  %v6172_v3 = vadd.f32 %v6171_v31, %v6080_v1 }
 0x5c1   :  { %v13489_v58 = vpop.f32.mrf.mxu0 }
 0x5c7   :  { %v6251_v27 = vpop.f32.mrf.mxu0 }
 0x5c8   :  { %v6486_v51 = vpop.f32.mrf.mxu1  ;;  %v6252_v28 = vadd.f32 %v6251_v27, %v6172_v3 }
 0x5c9   :  { %v13511_v37 = vpop.f32.mrf.mxu0 }
 0x5ca   :  { %v13544_v26 = vpop.f32.mrf.mxu1  ;;  %v6329_v30 = vadd.f32 %v6328_v2, %v6252_v28 }
 0x5d1   :  { %v6411_v62 = vpop.f32.mrf.mxu0 }
 0x5d2   :  { %v6656_v12 = vpop.f32.mrf.mxu1  ;;  %v6412_v29 = vadd.f32 %v6411_v62, %v6329_v30 }
 0x5d3   :  { %v13533_v56 = vpop.f32.mrf.mxu0 }
 0x5d4   :  { %v13566_v61 = vpop.f32.mrf.mxu1  ;;  %v6487_v17 = vadd.f32 %v6486_v51, %v6412_v29 }
 0x5d6   :  { %v6979_v23 = vadd.f32 %v6976_v10, %v6487_v17 }
 0x5d8   :  { %v11959_v24 = vmul.f32 -1.442695, %v6979_v23 }
 0x5da   :  { %14318 = vpow2.f32 %v11959_v24  ;;  %v15719_v24 = vld [vmem:[%s16359_s1] ss:$0 sm:$0xff] }
 0x5db   :  { %v6565_v7 = vpop.f32.mrf.mxu0 }
 0x5dc   :  { %v6813_v34 = vpop.f32.mrf.mxu1  ;;  %v6657_v37 = vadd.f32 %v6656_v12, %v6565_v7 }
 0x5dd   :  { %v13555_v59 = vpop.f32.mrf.mxu0 }
 0x5de   :  { %v13588_v0 = vpop.f32.mrf.mxu1  ;;  %v6977_v59 = vld [vmem:[#allocation3 + $0x68] sm:$0xff] }
 0x5e5   :  { %v6736_v53 = vpop.f32.mrf.mxu0 }
 0x5e6   :  { %v6971_v58 = vpop.f32.mrf.mxu1  ;;  %v6737_v22 = vadd.f32 %v6736_v53, %v6657_v37 }
 0x5e7   :  { %v13577_v25 = vpop.f32.mrf.mxu0  ;;  %v14319_v10 = vpop.eup %14318 }
 0x5e8   :  { %v13610_v26 = vpop.f32.mrf.mxu1  ;;  %v6814_v56 = vadd.f32 %v6813_v34, %v6737_v22  ;;  %v6983_v17 = vadd.f32 1.0, %v14319_v10 }
 0x5ef   :  { %v6896_v31 = vpop.f32.mrf.mxu0 }
 0x5f0   :  { %v6897_v3 = vadd.f32 %v6896_v31, %v6814_v56  ;;  %v7159_v1 = vpop.f32.mrf.mxu1 }
 0x5f1   :  { %v13599_v27 = vpop.f32.mrf.mxu0 }
 0x5f2   :  { %v6972_v28 = vadd.f32 %v6971_v58, %v6897_v3  ;;  %v13632_v0 = vpop.f32.mrf.mxu1 }
 0x5f4   :  { %v6986_v30 = vadd.f32 %v6977_v59, %v6972_v28  ;;  %v6978_v59 = vld [vmem:[#allocation3 + $0x70] sm:$0xff] }
 0x5f6   :  { %v11960_v2 = vmul.f32 -1.442695, %v6986_v30 }
 0x5f8   :  { %14320 = vpow2.f32 %v11960_v2 }
 0x5f9   :  { %v7068_v51 = vpop.f32.mrf.mxu0  ;;  %14322 = vrcp.f32 %v6983_v17 }
 0x5fa   :  { %v7316_v62 = vpop.f32.mrf.mxu1  ;;  %v7069_v22 = vadd.f32 %v15719_v24, %v7068_v51 }
 0x5fb   :  { %v13621_v61 = vpop.f32.mrf.mxu0 }
 0x5fc   :  { %v13654_v25 = vpop.f32.mrf.mxu1  ;;  %v7160_v7 = vadd.f32 %v7159_v1, %v7069_v22 }
 0x603   :  { %v7239_v23 = vpop.f32.mrf.mxu0 }
 0x604   :  { %v7474_v34 = vpop.f32.mrf.mxu1  ;;  %v7240_v53 = vadd.f32 %v7239_v23, %v7160_v7  ;;  %v16467_v7 = vld [vmem:[#allocation21_spill] sm:$0xff] }
 0x605   :  { %v13643_v12 = vpop.f32.mrf.mxu0  ;;  %v14321_v58 = vpop.eup %14320 }
 0x606   :  { %v13676_v29 = vpop.f32.mrf.mxu1  ;;  %v7317_v37 = vadd.f32 %v7316_v62, %v7240_v53  ;;  %v6990_v56 = vadd.f32 1.0, %v14321_v58  ;;  %v14323_v28 = vpop.eup %14322  ;;  %v16468_v12 = vld [vmem:[#allocation19_spill] sm:$0xff]  ;;  %v16470_v53 = vld [vmem:[#allocation24_spill] sm:$0xff]  ;;  %v16471_v58 = vld [vmem:[#allocation26_spill] sm:$0xff] }
 0x607   :  { %v16469_v29 = vld [vmem:[#allocation22_spill] sm:$0xff] }
 0x608   :  { %14324 = vrcp.f32 %v6990_v56  ;;  %v16474_v56 = vld [vmem:[#allocation15_spill] sm:$0xff] }
 0x60c   :  { %v7399_v26 = vpop.f32.mrf.mxu0 }
 0x60d   :  { %v7400_v31 = vadd.f32 %v7399_v26, %v7317_v37  ;;  %v16472_v37 = vld [vmem:[#allocation23_spill] sm:$0xff]  ;;  %v16473_v26 = vld [vmem:[#allocation25_spill] sm:$0xff] }
 0x60e   :  { %v13665_v3 = vpop.f32.mrf.mxu0 }
 0x60f   :  { %v7475_v27 = vadd.f32 %v7474_v34, %v7400_v31  ;;  %v16475_v31 = vld [vmem:[#allocation27_spill] sm:$0xff]  ;;  %v16476_v3 = vld [vmem:[#allocation16_spill] sm:$0xff] }
 0x611   :  { %v7478_v0 = vmul.f32 %v14323_v28, %v7475_v27  ;;  %v16477_v27 = vld [vmem:[#allocation28_spill] sm:$0xff]  ;;  %v16478_v28 = vld [vmem:[#allocation17_spill] sm:$0xff] }
 0x613   :  { %v7479_v30 = vadd.f32 %v7478_v0, %v6978_v59  ;;  %v16479_v59 = vld [vmem:[#allocation18_spill] sm:$0xff] }
 0x615   :  { %14326 = vtanh.f32 %v7479_v30  ;;  %v14325_v2 = vpop.eup %14324 }
 0x616   :  { %v7481_v51 = vsub.f32 1.0, %v14325_v2  ;;  %v7483_v1 = vmul.f32 %v14325_v2, %v15502_v8 }
 0x622   :  { %v14327_v61 = vpop.eup %14326 }
 0x623   :  { %v7482_v10 = vmul.f32 %v14327_v61, %v7481_v51 }
 0x625   :  { %v15723_v25 = vadd.f32 %v7483_v1, %v7482_v10 }
 0x627   :  { %v7486_v62 = vsel %vm31_vm0, %v15723_v25, 0 }
 0x628   :  { %v15727_v17 = vand.u32 4294901760, %v7486_v62 }
 0x62a   :  { %13697 = vmatmul.mubr.f32.vlgmr.msra.gmra.mxu1 %v15727_v17  ;;  %v15731_v22 = vsub.f32 %v7486_v62, %v15727_v17 }
 0x62b   :  { %13711 = vmatpush3.msra.mxu1 %v14464_v4  ;;  %13718 = vmatprep.mubr.msk.f32.mxu1 %vm14432_vm1, %v16413_v21 }
 0x62c   :  { %13712 = vmatprep.subr.mxu1 %v16413_v21  ;;  %v15738_v8 = vand.u32 4294901760, %v15731_v22 }
 0x62d   :  { %13713 = vmatpush3.msra.mxu1 %v14466_v5 }
 0x62e   :  { %13714 = vmatprep.subr.mxu1 %v16413_v21  ;;  %v7560_v23 = vsub.f32 %v15731_v22, %v15738_v8 }
 0x62f   :  { %13715 = vmatpush3.msra.mxu1 %v14468_v6 }
 0x630   :  { %13716 = vmatprep.subr.mxu1 %v16413_v21  ;;  %v15746_v34 = vand.u32 4294901760, %v7560_v23 }
 0x631   :  { %13717 = vmatpush3.msra.mxu1 %v14476_v9 }
 0x632   :  { %13719 = vmatmul.mubr.f32.vlgmr.msra.gmra.mxu1 %v15738_v8  ;;  %13732 = vmatprep.subr.mxu1 %v16413_v21 }
 0x633   :  { %13686 = vmatmul.mubr.f32.vlgmr.msra.gmra.mxu0 %v15746_v34  ;;  %13733 = vmatpush3.msra.mxu1 %v14464_v4 }
 0x634   :  { %13700 = vmatpush3.msra.mxu0 %v14482_v11  ;;  %13734 = vmatprep.subr.mxu1 %v16413_v21 }
 0x635   :  { %13701 = vmatprep.subr.mxu0 %v16413_v21  ;;  %13735 = vmatpush3.msra.mxu1 %v14466_v5 }
 0x636   :  { %13702 = vmatpush3.msra.mxu0 %v14487_v13  ;;  %13736 = vmatprep.subr.mxu1 %v16413_v21 }
 0x637   :  { %13703 = vmatprep.subr.mxu0 %v16413_v21  ;;  %13737 = vmatpush3.msra.mxu1 %v14468_v6 }
 0x638   :  { %13704 = vmatpush3.msra.mxu0 %v14490_v14  ;;  %13738 = vmatprep.subr.mxu1 %v16413_v21 }
 0x639   :  { %13705 = vmatprep.subr.mxu0 %v16413_v21  ;;  %13707 = vmatprep.mubr.msk.f32.mxu0 %vm14432_vm1, %v16413_v21 }
 0x63a   :  { %13706 = vmatpush3.msra.mxu0 %v14494_v15  ;;  %13739 = vmatpush3.msra.mxu1 %v14476_v9 }
 0x63b   :  { %13740 = vmatprep.mubr.msk.f32.mxu1 %vm14432_vm1, %v16413_v21  ;;  %13708 = vmatmul.mubr.f32.vlgmr.msra.gmra.mxu0 %v15731_v22 }
 0x63c   :  { %13721 = vmatprep.subr.mxu0 %v16413_v21  ;;  %13741 = vmatmul.mubr.f32.vlgmr.msra.gmra.mxu1 %v15727_v17 }
 0x63d   :  { %13754 = vmatprep.subr.mxu1 %v16413_v21  ;;  %13722 = vmatpush3.msra.mxu0 %v14498_v16 }
 0x63e   :  { %13755 = vmatpush3.msra.mxu1 %v14629_v50  ;;  %13723 = vmatprep.subr.mxu0 %v16413_v21 }
 0x63f   :  { %13756 = vmatprep.subr.mxu1 %v16413_v21  ;;  %13724 = vmatpush3.msra.mxu0 %v14504_v18 }
 0x640   :  { %13757 = vmatpush3.msra.mxu1 %v14640_v52  ;;  %13725 = vmatprep.subr.mxu0 %v16413_v21 }
 0x641   :  { %13758 = vmatprep.subr.mxu1 %v16413_v21  ;;  %13726 = vmatpush3.msra.mxu0 %v14507_v19 }
 0x642   :  { %13759 = vmatpush3.msra.mxu1 %v14649_v54  ;;  %13727 = vmatprep.subr.mxu0 %v16413_v21 }
 0x643   :  { %13760 = vmatprep.subr.mxu1 %v16413_v21  ;;  %13728 = vmatpush3.msra.mxu0 %v14511_v20 }
 0x644   :  { %13729 = vmatprep.mubr.msk.f32.mxu0 %vm14432_vm1, %v16413_v21  ;;  %13761 = vmatpush3.msra.mxu1 %v14655_v55 }
 0x645   :  { %13762 = vmatprep.mubr.msk.f32.mxu1 %vm14432_vm1, %v16413_v21  ;;  %13730 = vmatmul.mubr.f32.vlgmr.msra.gmra.mxu0 %v15727_v17 }
 0x646   :  { %13743 = vmatprep.subr.mxu0 %v16413_v21  ;;  %13763 = vmatmul.mubr.f32.vlgmr.msra.gmra.mxu1 %v15727_v17 }
 0x647   :  { %13776 = vmatprep.subr.mxu1 %v16413_v21  ;;  %13744 = vmatpush3.msra.mxu0 %v14559_v33 }
 0x648   :  { %13777 = vmatpush3.msra.mxu1 %v14559_v33  ;;  %13745 = vmatprep.subr.mxu0 %v16413_v21 }
 0x649   :  { %13778 = vmatprep.subr.mxu1 %v16413_v21  ;;  %13746 = vmatpush3.msra.mxu0 %v14567_v36 }
 0x64a   :  { %13779 = vmatpush3.msra.mxu1 %v14567_v36  ;;  %13747 = vmatprep.subr.mxu0 %v16413_v21 }
 0x64b   :  { %13780 = vmatprep.subr.mxu1 %v16413_v21  ;;  %13748 = vmatpush3.msra.mxu0 %v14576_v39 }
 0x64c   :  { %13781 = vmatpush3.msra.mxu1 %v14576_v39  ;;  %13749 = vmatprep.subr.mxu0 %v16413_v21 }
 0x64d   :  { %13782 = vmatprep.subr.mxu1 %v16413_v21  ;;  %13750 = vmatpush3.msra.mxu0 %v14583_v40 }
 0x64e   :  { %13751 = vmatprep.mubr.msk.f32.mxu0 %vm14432_vm1, %v16413_v21  ;;  %13783 = vmatpush3.msra.mxu1 %v14583_v40 }
 0x64f   :  { %13784 = vmatprep.mubr.msk.f32.mxu1 %vm14432_vm1, %v16413_v21  ;;  %13752 = vmatmul.mubr.f32.vlgmr.msra.gmra.mxu0 %v15746_v34 }
 0x650   :  { %13765 = vmatprep.subr.mxu0 %v16413_v21  ;;  %13785 = vmatmul.mubr.f32.vlgmr.msra.gmra.mxu1 %v15738_v8 }
 0x651   :  { %13798 = vmatprep.subr.mxu1 %v16413_v21  ;;  %13766 = vmatpush3.msra.mxu0 %v14572_v38 }
 0x652   :  { %13799 = vmatpush3.msra.mxu1 %v14559_v33  ;;  %13767 = vmatprep.subr.mxu0 %v16413_v21 }
 0x653   :  { %13800 = vmatprep.subr.mxu1 %v16413_v21  ;;  %13768 = vmatpush3.msra.mxu0 %v14586_v41 }
 0x654   :  { %13801 = vmatpush3.msra.mxu1 %v14567_v36  ;;  %13769 = vmatprep.subr.mxu0 %v16413_v21 }
 0x655   :  { %13802 = vmatprep.subr.mxu1 %v16413_v21  ;;  %13770 = vmatpush3.msra.mxu0 %v14596_v43 }
 0x656   :  { %13803 = vmatpush3.msra.mxu1 %v14576_v39  ;;  %13771 = vmatprep.subr.mxu0 %v16413_v21 }
 0x657   :  { %13804 = vmatprep.subr.mxu1 %v16413_v21  ;;  %13772 = vmatpush3.msra.mxu0 %v14607_v45 }
 0x658   :  { %13773 = vmatprep.mubr.msk.f32.mxu0 %vm14432_vm1, %v16413_v21  ;;  %13805 = vmatpush3.msra.mxu1 %v14583_v40 }
 0x659   :  { %13806 = vmatprep.mubr.msk.f32.mxu1 %vm14432_vm1, %v16413_v21  ;;  %13774 = vmatmul.mubr.f32.vlgmr.msra.gmra.mxu0 %v15731_v22 }
 0x65a   :  { %13787 = vmatprep.subr.mxu0 %v16413_v21  ;;  %13807 = vmatmul.mubr.f32.vlgmr.msra.gmra.mxu1 %v15727_v17 }
 0x65b   :  { %13820 = vmatprep.subr.mxu1 %v16413_v21  ;;  %13788 = vmatpush3.msra.mxu0 %v14591_v42 }
 0x65c   :  { %13821 = vmatpush3.msra.mxu1 %v14743_v32  ;;  %13789 = vmatprep.subr.mxu0 %v16413_v21 }
 0x65d   :  { %13822 = vmatprep.subr.mxu1 %v16413_v21  ;;  %13790 = vmatpush3.msra.mxu0 %v14604_v44 }
 0x65e   :  { %13823 = vmatpush3.msra.mxu1 %v14754_v35  ;;  %13791 = vmatprep.subr.mxu0 %v16413_v21 }
 0x65f   :  { %13824 = vmatprep.subr.mxu1 %v16413_v21  ;;  %13792 = vmatpush3.msra.mxu0 %v14616_v47 }
 0x660   :  { %13825 = vmatpush3.msra.mxu1 %v14763_v46  ;;  %13793 = vmatprep.subr.mxu0 %v16413_v21 }
 0x661   :  { %13826 = vmatprep.subr.mxu1 %v16413_v21  ;;  %13794 = vmatpush3.msra.mxu0 %v14625_v49 }
 0x662   :  { %13795 = vmatprep.mubr.msk.f32.mxu0 %vm14432_vm1, %v16413_v21  ;;  %13827 = vmatpush3.msra.mxu1 %v14769_v48 }
 0x663   :  { %13828 = vmatprep.mubr.msk.f32.mxu1 %vm14432_vm1, %v16413_v21  ;;  %13796 = vmatmul.mubr.f32.vlgmr.msra.gmra.mxu0 %v15727_v17 }
 0x664   :  { %13809 = vmatprep.subr.mxu0 %v16413_v21  ;;  %13829 = vmatmul.mubr.f32.vlgmr.msra.gmra.mxu1 %v15727_v17 }
 0x665   :  { %13842 = vmatprep.subr.mxu1 %v16413_v21  ;;  %13810 = vmatpush3.msra.mxu0 %v14673_v57 }
 0x666   :  { %13843 = vmatpush3.msra.mxu1 %v14673_v57  ;;  %13811 = vmatprep.subr.mxu0 %v16413_v21 }
 0x667   :  { %13844 = vmatprep.subr.mxu1 %v16413_v21  ;;  %13812 = vmatpush3.msra.mxu0 %v14681_v60 }
 0x668   :  { %13845 = vmatpush3.msra.mxu1 %v14681_v60  ;;  %13813 = vmatprep.subr.mxu0 %v16413_v21 }
 0x669   :  { %13846 = vmatprep.subr.mxu1 %v16413_v21  ;;  %13814 = vmatpush3.msra.mxu0 %v16453_v63 }
 0x66a   :  { %13847 = vmatpush3.msra.mxu1 %v16453_v63  ;;  %13815 = vmatprep.subr.mxu0 %v16413_v21 }
 0x66b   :  { %13848 = vmatprep.subr.mxu1 %v16413_v21  ;;  %13816 = vmatpush3.msra.mxu0 %v16467_v7 }
 0x66c   :  { %13817 = vmatprep.mubr.msk.f32.mxu0 %vm14432_vm1, %v16413_v21  ;;  %13849 = vmatpush3.msra.mxu1 %v16467_v7 }
 0x66d   :  { %13850 = vmatprep.mubr.msk.f32.mxu1 %vm14432_vm1, %v16413_v21  ;;  %13818 = vmatmul.mubr.f32.vlgmr.msra.gmra.mxu0 %v15746_v34 }
 0x66e   :  { %13831 = vmatprep.subr.mxu0 %v16413_v21  ;;  %13851 = vmatmul.mubr.f32.vlgmr.msra.gmra.mxu1 %v15738_v8 }
 0x66f   :  { %13864 = vmatprep.subr.mxu1 %v16413_v21  ;;  %13832 = vmatpush3.msra.mxu0 %v16468_v12 }
 0x670   :  { %13865 = vmatpush3.msra.mxu1 %v14673_v57  ;;  %13833 = vmatprep.subr.mxu0 %v16413_v21 }
 0x671   :  { %13866 = vmatprep.subr.mxu1 %v16413_v21  ;;  %13834 = vmatpush3.msra.mxu0 %v16469_v29 }
 0x672   :  { %13867 = vmatpush3.msra.mxu1 %v14681_v60  ;;  %13835 = vmatprep.subr.mxu0 %v16413_v21 }
 0x673   :  { %13868 = vmatprep.subr.mxu1 %v16413_v21  ;;  %13836 = vmatpush3.msra.mxu0 %v16470_v53  ;;  %v8459_v53 = vld [vmem:[#allocation3 + $0x78] sm:$0xff] }
 0x674   :  { %13869 = vmatpush3.msra.mxu1 %v16453_v63  ;;  %13837 = vmatprep.subr.mxu0 %v16413_v21 }
 0x675   :  { %13870 = vmatprep.subr.mxu1 %v16413_v21  ;;  %13838 = vmatpush3.msra.mxu0 %v16471_v58 }
 0x676   :  { %13839 = vmatprep.mubr.msk.f32.mxu0 %vm14432_vm1, %v16413_v21  ;;  %13871 = vmatpush3.msra.mxu1 %v16467_v7 }
 0x677   :  { %13872 = vmatprep.mubr.msk.f32.mxu1 %vm14432_vm1, %v16413_v21  ;;  %13840 = vmatmul.mubr.f32.vlgmr.msra.gmra.mxu0 %v15731_v22 }
 0x678   :  { %13853 = vmatprep.subr.mxu0 %v16413_v21  ;;  %13873 = vmatmul.mubr.f32.vlgmr.msra.gmra.mxu1 %v15727_v17 }
 0x679   :  { %13854 = vmatpush3.msra.mxu0 %v16472_v37  ;;  %13861 = vmatprep.mubr.msk.f32.mxu0 %vm14432_vm1, %v16413_v21 }
 0x67a   :  { %13855 = vmatprep.subr.mxu0 %v16413_v21  ;;  %13886 = vmatprep.subr.mxu1 %v16413_v21 }
 0x67b   :  { %13856 = vmatpush3.msra.mxu0 %v16473_v26  ;;  %13887 = vmatpush3.msra.mxu1 %v16474_v56 }
 0x67c   :  { %13857 = vmatprep.subr.mxu0 %v16413_v21  ;;  %13888 = vmatprep.subr.mxu1 %v16413_v21 }
 0x67d   :  { %13858 = vmatpush3.msra.mxu0 %v16475_v31  ;;  %13889 = vmatpush3.msra.mxu1 %v16476_v3 }
 0x67e   :  { %13859 = vmatprep.subr.mxu0 %v16413_v21  ;;  %13890 = vmatprep.subr.mxu1 %v16413_v21 }
 0x67f   :  { %13860 = vmatpush3.msra.mxu0 %v16477_v27  ;;  %13891 = vmatpush3.msra.mxu1 %v16478_v28 }
 0x680   :  { %13862 = vmatmul.mubr.f32.vlgmr.msra.gmra.mxu0 %v15727_v17  ;;  %13892 = vmatprep.subr.mxu1 %v16413_v21 }
 0x681   :  { %13893 = vmatpush3.msra.mxu1 %v16479_v59  ;;  %13875 = vmatprep.subr.mxu0 %v16413_v21 }
 0x682   :  { %13894 = vmatprep.mubr.msk.f32.mxu1 %vm14432_vm1, %v16413_v21  ;;  %13908 = vmatprep.subr.mxu1 %v16413_v21 }
 0x683   :  { %13876 = vmatpush3.msra.mxu0 %v14464_v4  ;;  %13883 = vmatprep.mubr.msk.f32.mxu0 %vm14432_vm1, %v16413_v21 }
 0x684   :  { %13877 = vmatprep.subr.mxu0 %v16413_v21 }
 0x685   :  { %13878 = vmatpush3.msra.mxu0 %v14466_v5 }
 0x686   :  { %13879 = vmatprep.subr.mxu0 %v16413_v21 }
 0x687   :  { %13880 = vmatpush3.msra.mxu0 %v14468_v6 }
 0x688   :  { %13881 = vmatprep.subr.mxu0 %v16413_v21 }
 0x689   :  { %13882 = vmatpush3.msra.mxu0 %v14476_v9 }
 0x68a   :  { %13897 = vmatprep.subr.mxu0 %v16413_v21 }
 0x6ea   :  { %v7654_v0 = vpop.f32.mrf.mxu1 }
 0x6ec   :  { %v13698_v30 = vpop.f32.mrf.mxu1 }
 0x6f2   :  { %v7811_v2 = vpop.f32.mrf.mxu1 }
 0x6f3   :  { %v7563_v51 = vpop.f32.mrf.mxu0 }
 0x6f4   :  { %v13720_v61 = vpop.f32.mrf.mxu1  ;;  %v7655_v28 = vadd.f32 %v7654_v0, %v7563_v51 }
 0x6f5   :  { %v13687_v1 = vpop.f32.mrf.mxu0 }
 0x6fb   :  { %v7734_v10 = vpop.f32.mrf.mxu0 }
 0x6fc   :  { %v7969_v62 = vpop.f32.mrf.mxu1  ;;  %v7735_v27 = vadd.f32 %v7734_v10, %v7655_v28 }
 0x6fd   :  { %v13709_v17 = vpop.f32.mrf.mxu0 }
 0x6fe   :  { %v13742_v22 = vpop.f32.mrf.mxu1  ;;  %v7812_v56 = vadd.f32 %v7811_v2, %v7735_v27 }
 0x705   :  { %v7894_v8 = vpop.f32.mrf.mxu0 }
 0x706   :  { %v8139_v23 = vpop.f32.mrf.mxu1  ;;  %v7895_v30 = vadd.f32 %v7894_v8, %v7812_v56 }
 0x707   :  { %v13731_v34 = vpop.f32.mrf.mxu0 }
 0x708   :  { %v13764_v59 = vpop.f32.mrf.mxu1  ;;  %v7970_v58 = vadd.f32 %v7969_v62, %v7895_v30 }
 0x70a   :  { %v8462_v29 = vadd.f32 %v8459_v53, %v7970_v58 }
 0x70c   :  { %v11961_v63 = vmul.f32 -1.442695, %v8462_v29 }
 0x70e   :  { %14328 = vpow2.f32 %v11961_v63 }
 0x70f   :  { %v8048_v3 = vpop.f32.mrf.mxu0 }
 0x710   :  { %v8296_v31 = vpop.f32.mrf.mxu1  ;;  %v8140_v17 = vadd.f32 %v8139_v23, %v8048_v3 }
 0x711   :  { %v13753_v26 = vpop.f32.mrf.mxu0 }
 0x712   :  { %v13786_v37 = vpop.f32.mrf.mxu1  ;;  %v8460_v26 = vld [vmem:[#allocation3 + $0x80] sm:$0xff] }
 0x719   :  { %v8219_v61 = vpop.f32.mrf.mxu0 }
 0x71a   :  { %v8454_v1 = vpop.f32.mrf.mxu1  ;;  %v8220_v7 = vadd.f32 %v8219_v61, %v8140_v17 }
 0x71b   :  { %v13775_v12 = vpop.f32.mrf.mxu0  ;;  %v14329_v53 = vpop.eup %14328 }
 0x71c   :  { %v13808_v22 = vpop.f32.mrf.mxu1  ;;  %v8297_v34 = vadd.f32 %v8296_v31, %v8220_v7  ;;  %v8466_v58 = vadd.f32 1.0, %v14329_v53 }
 0x723   :  { %v8379_v59 = vpop.f32.mrf.mxu0 }
 0x724   :  { %v8380_v28 = vadd.f32 %v8379_v59, %v8297_v34  ;;  %v8642_v0 = vpop.f32.mrf.mxu1 }
 0x725   :  { %v13797_v51 = vpop.f32.mrf.mxu0 }
 0x726   :  { %v8455_v27 = vadd.f32 %v8454_v1, %v8380_v28  ;;  %v13830_v37 = vpop.f32.mrf.mxu1 }
 0x728   :  { %v8469_v56 = vadd.f32 %v8460_v26, %v8455_v27  ;;  %v8461_v27 = vld [vmem:[#allocation3 + $0x88] sm:$0xff] }
 0x72a   :  { %v11962_v2 = vmul.f32 -1.442695, %v8469_v56 }
 0x72c   :  { %14330 = vpow2.f32 %v11962_v2 }
 0x72d   :  { %v8551_v10 = vpop.f32.mrf.mxu0  ;;  %14332 = vrcp.f32 %v8466_v58 }
 0x72e   :  { %v8799_v62 = vpop.f32.mrf.mxu1  ;;  %v8552_v29 = vadd.f32 %v15719_v24, %v8551_v10 }
 0x72f   :  { %v13819_v8 = vpop.f32.mrf.mxu0 }
 0x730   :  { %v13852_v12 = vpop.f32.mrf.mxu1  ;;  %v8643_v31 = vadd.f32 %v8642_v0, %v8552_v29 }
 0x737   :  { %v8722_v63 = vpop.f32.mrf.mxu0 }
 0x738   :  { %v8957_v7 = vpop.f32.mrf.mxu1  ;;  %v8723_v30 = vadd.f32 %v8722_v63, %v8643_v31  ;;  %v16480_v63 = vld [vmem:[#allocation20_spill] sm:$0xff]  ;;  %v16482_v31 = vld [vmem:[#allocation19_spill] sm:$0xff] }
 0x739   :  { %v13841_v3 = vpop.f32.mrf.mxu0  ;;  %v14331_v61 = vpop.eup %14330 }
 0x73a   :  { %v13874_v23 = vpop.f32.mrf.mxu1  ;;  %v8800_v1 = vadd.f32 %v8799_v62, %v8723_v30  ;;  %v8473_v22 = vadd.f32 1.0, %v14331_v61  ;;  %v14333_v51 = vpop.eup %14332  ;;  %v16483_v3 = vld [vmem:[#allocation22_spill] sm:$0xff]  ;;  %v16486_v61 = vld [vmem:[#allocation23_spill] sm:$0xff] }
 0x73b   :  { %v16484_v23 = vld [vmem:[#allocation24_spill] sm:$0xff]  ;;  %v16485_v30 = vld [vmem:[#allocation26_spill] sm:$0xff] }
 0x73c   :  { %14334 = vrcp.f32 %v8473_v22  ;;  %v16489_v22 = vld [vmem:[#allocation27_spill] sm:$0xff] }
 0x740   :  { %v8882_v17 = vpop.f32.mrf.mxu0 }
 0x741   :  { %v8883_v34 = vadd.f32 %v8882_v17, %v8800_v1  ;;  %v16487_v1 = vld [vmem:[#allocation25_spill] sm:$0xff]  ;;  %v16488_v17 = vld [vmem:[#allocation15_spill] sm:$0xff] }
 0x742   :  { %v13863_v59 = vpop.f32.mrf.mxu0 }
 0x743   :  { %v8958_v28 = vadd.f32 %v8957_v7, %v8883_v34  ;;  %v16481_v7 = vld [vmem:[#allocation21_spill] sm:$0xff]  ;;  %v16490_v34 = vld [vmem:[#allocation16_spill] sm:$0xff] }
 0x744   :  { %v16491_v59 = vld [vmem:[#allocation28_spill] sm:$0xff] }
 0x745   :  { %v8961_v26 = vmul.f32 %v14333_v51, %v8958_v28  ;;  %v16492_v28 = vld [vmem:[#allocation17_spill] sm:$0xff]  ;;  %v16493_v51 = vld [vmem:[#allocation18_spill] sm:$0xff] }
 0x747   :  { %v8962_v37 = vadd.f32 %v8961_v26, %v8461_v27 }
 0x749   :  { %14336 = vtanh.f32 %v8962_v37  ;;  %v14335_v24 = vpop.eup %14334 }
 0x74a   :  { %v8964_v56 = vsub.f32 1.0, %v14335_v24  ;;  %v8966_v0 = vmul.f32 %v14335_v24, %v15723_v25 }
 0x756   :  { %v14337_v2 = vpop.eup %14336 }
 0x757   :  { %v8965_v10 = vmul.f32 %v14337_v2, %v8964_v56 }
 0x759   :  { %v15939_v8 = vadd.f32 %v8966_v0, %v8965_v10 }
 0x75b   :  { %v8969_v62 = vsel %vm31_vm0, %v15939_v8, 0 }
 0x75c   :  { %v15943_v53 = vand.u32 4294901760, %v8969_v62 }
 0x75e   :  { %13895 = vmatmul.mubr.f32.vlgmr.msra.gmra.mxu1 %v15943_v53  ;;  %v15947_v12 = vsub.f32 %v8969_v62, %v15943_v53 }
 0x75f   :  { %13909 = vmatpush3.msra.mxu1 %v14464_v4  ;;  %13916 = vmatprep.mubr.msk.f32.mxu1 %vm14432_vm1, %v16413_v21 }
 0x760   :  { %13910 = vmatprep.subr.mxu1 %v16413_v21  ;;  %v15954_v25 = vand.u32 4294901760, %v15947_v12 }
 0x761   :  { %13911 = vmatpush3.msra.mxu1 %v14466_v5 }
 0x762   :  { %13912 = vmatprep.subr.mxu1 %v16413_v21  ;;  %v9043_v58 = vsub.f32 %v15947_v12, %v15954_v25 }
 0x763   :  { %13913 = vmatpush3.msra.mxu1 %v14468_v6 }
 0x764   :  { %13914 = vmatprep.subr.mxu1 %v16413_v21  ;;  %v15962_v29 = vand.u32 4294901760, %v9043_v58 }
 0x765   :  { %13915 = vmatpush3.msra.mxu1 %v14476_v9 }
 0x766   :  { %13917 = vmatmul.mubr.f32.vlgmr.msra.gmra.mxu1 %v15954_v25  ;;  %13930 = vmatprep.subr.mxu1 %v16413_v21 }
 0x767   :  { %13884 = vmatmul.mubr.f32.vlgmr.msra.gmra.mxu0 %v15962_v29  ;;  %13931 = vmatpush3.msra.mxu1 %v14464_v4 }
 0x768   :  { %13898 = vmatpush3.msra.mxu0 %v14482_v11  ;;  %13932 = vmatprep.subr.mxu1 %v16413_v21 }
 0x769   :  { %13899 = vmatprep.subr.mxu0 %v16413_v21  ;;  %13933 = vmatpush3.msra.mxu1 %v14466_v5 }
 0x76a   :  { %13900 = vmatpush3.msra.mxu0 %v14487_v13  ;;  %13934 = vmatprep.subr.mxu1 %v16413_v21 }
 0x76b   :  { %13901 = vmatprep.subr.mxu0 %v16413_v21  ;;  %13935 = vmatpush3.msra.mxu1 %v14468_v6 }
 0x76c   :  { %13902 = vmatpush3.msra.mxu0 %v14490_v14  ;;  %13936 = vmatprep.subr.mxu1 %v16413_v21 }
 0x76d   :  { %13903 = vmatprep.subr.mxu0 %v16413_v21  ;;  %13905 = vmatprep.mubr.msk.f32.mxu0 %vm14432_vm1, %v16413_v21 }
 0x76e   :  { %13904 = vmatpush3.msra.mxu0 %v14494_v15  ;;  %13937 = vmatpush3.msra.mxu1 %v14476_v9 }
 0x76f   :  { %13938 = vmatprep.mubr.msk.f32.mxu1 %vm14432_vm1, %v16413_v21  ;;  %13906 = vmatmul.mubr.f32.vlgmr.msra.gmra.mxu0 %v15947_v12 }
 0x770   :  { %13919 = vmatprep.subr.mxu0 %v16413_v21  ;;  %13939 = vmatmul.mubr.f32.vlgmr.msra.gmra.mxu1 %v15943_v53 }
 0x771   :  { %13952 = vmatprep.subr.mxu1 %v16413_v21  ;;  %13920 = vmatpush3.msra.mxu0 %v14498_v16 }
 0x772   :  { %13953 = vmatpush3.msra.mxu1 %v14629_v50  ;;  %13921 = vmatprep.subr.mxu0 %v16413_v21 }
 0x773   :  { %13954 = vmatprep.subr.mxu1 %v16413_v21  ;;  %13922 = vmatpush3.msra.mxu0 %v14504_v18 }
 0x774   :  { %13955 = vmatpush3.msra.mxu1 %v14640_v52  ;;  %13923 = vmatprep.subr.mxu0 %v16413_v21 }
 0x775   :  { %13956 = vmatprep.subr.mxu1 %v16413_v21  ;;  %13924 = vmatpush3.msra.mxu0 %v14507_v19 }
 0x776   :  { %13957 = vmatpush3.msra.mxu1 %v14649_v54  ;;  %13925 = vmatprep.subr.mxu0 %v16413_v21 }
 0x777   :  { %13958 = vmatprep.subr.mxu1 %v16413_v21  ;;  %13926 = vmatpush3.msra.mxu0 %v14511_v20 }
 0x778   :  { %13927 = vmatprep.mubr.msk.f32.mxu0 %vm14432_vm1, %v16413_v21  ;;  %13959 = vmatpush3.msra.mxu1 %v14655_v55 }
 0x779   :  { %13960 = vmatprep.mubr.msk.f32.mxu1 %vm14432_vm1, %v16413_v21  ;;  %13928 = vmatmul.mubr.f32.vlgmr.msra.gmra.mxu0 %v15943_v53 }
 0x77a   :  { %13941 = vmatprep.subr.mxu0 %v16413_v21  ;;  %13961 = vmatmul.mubr.f32.vlgmr.msra.gmra.mxu1 %v15943_v53 }
 0x77b   :  { %13974 = vmatprep.subr.mxu1 %v16413_v21  ;;  %13942 = vmatpush3.msra.mxu0 %v14559_v33 }
 0x77c   :  { %13975 = vmatpush3.msra.mxu1 %v14559_v33  ;;  %13943 = vmatprep.subr.mxu0 %v16413_v21 }
 0x77d   :  { %13976 = vmatprep.subr.mxu1 %v16413_v21  ;;  %13944 = vmatpush3.msra.mxu0 %v14567_v36 }
 0x77e   :  { %13977 = vmatpush3.msra.mxu1 %v14567_v36  ;;  %13945 = vmatprep.subr.mxu0 %v16413_v21 }
 0x77f   :  { %13978 = vmatprep.subr.mxu1 %v16413_v21  ;;  %13946 = vmatpush3.msra.mxu0 %v14576_v39 }
 0x780   :  { %13979 = vmatpush3.msra.mxu1 %v14576_v39  ;;  %13947 = vmatprep.subr.mxu0 %v16413_v21 }
 0x781   :  { %13980 = vmatprep.subr.mxu1 %v16413_v21  ;;  %13948 = vmatpush3.msra.mxu0 %v14583_v40 }
 0x782   :  { %13949 = vmatprep.mubr.msk.f32.mxu0 %vm14432_vm1, %v16413_v21  ;;  %13981 = vmatpush3.msra.mxu1 %v14583_v40 }
 0x783   :  { %13982 = vmatprep.mubr.msk.f32.mxu1 %vm14432_vm1, %v16413_v21  ;;  %13950 = vmatmul.mubr.f32.vlgmr.msra.gmra.mxu0 %v15962_v29 }
 0x784   :  { %13963 = vmatprep.subr.mxu0 %v16413_v21  ;;  %13983 = vmatmul.mubr.f32.vlgmr.msra.gmra.mxu1 %v15954_v25 }
 0x785   :  { %13996 = vmatprep.subr.mxu1 %v16413_v21  ;;  %13964 = vmatpush3.msra.mxu0 %v14572_v38 }
 0x786   :  { %13997 = vmatpush3.msra.mxu1 %v14559_v33  ;;  %13965 = vmatprep.subr.mxu0 %v16413_v21 }
 0x787   :  { %13998 = vmatprep.subr.mxu1 %v16413_v21  ;;  %13966 = vmatpush3.msra.mxu0 %v14586_v41 }
 0x788   :  { %13999 = vmatpush3.msra.mxu1 %v14567_v36  ;;  %13967 = vmatprep.subr.mxu0 %v16413_v21 }
 0x789   :  { %14000 = vmatprep.subr.mxu1 %v16413_v21  ;;  %13968 = vmatpush3.msra.mxu0 %v14596_v43 }
 0x78a   :  { %14001 = vmatpush3.msra.mxu1 %v14576_v39  ;;  %13969 = vmatprep.subr.mxu0 %v16413_v21 }
 0x78b   :  { %14002 = vmatprep.subr.mxu1 %v16413_v21  ;;  %13970 = vmatpush3.msra.mxu0 %v14607_v45 }
 0x78c   :  { %13971 = vmatprep.mubr.msk.f32.mxu0 %vm14432_vm1, %v16413_v21  ;;  %14003 = vmatpush3.msra.mxu1 %v14583_v40 }
 0x78d   :  { %14004 = vmatprep.mubr.msk.f32.mxu1 %vm14432_vm1, %v16413_v21  ;;  %13972 = vmatmul.mubr.f32.vlgmr.msra.gmra.mxu0 %v15947_v12 }
 0x78e   :  { %13985 = vmatprep.subr.mxu0 %v16413_v21  ;;  %14005 = vmatmul.mubr.f32.vlgmr.msra.gmra.mxu1 %v15943_v53 }
 0x78f   :  { %14018 = vmatprep.subr.mxu1 %v16413_v21  ;;  %13986 = vmatpush3.msra.mxu0 %v14591_v42 }
 0x790   :  { %14019 = vmatpush3.msra.mxu1 %v14743_v32  ;;  %13987 = vmatprep.subr.mxu0 %v16413_v21 }
 0x791   :  { %14020 = vmatprep.subr.mxu1 %v16413_v21  ;;  %13988 = vmatpush3.msra.mxu0 %v14604_v44 }
 0x792   :  { %14021 = vmatpush3.msra.mxu1 %v14754_v35  ;;  %13989 = vmatprep.subr.mxu0 %v16413_v21 }
 0x793   :  { %14022 = vmatprep.subr.mxu1 %v16413_v21  ;;  %13990 = vmatpush3.msra.mxu0 %v14616_v47 }
 0x794   :  { %14023 = vmatpush3.msra.mxu1 %v14763_v46  ;;  %13991 = vmatprep.subr.mxu0 %v16413_v21 }
 0x795   :  { %14024 = vmatprep.subr.mxu1 %v16413_v21  ;;  %13992 = vmatpush3.msra.mxu0 %v14625_v49 }
 0x796   :  { %13993 = vmatprep.mubr.msk.f32.mxu0 %vm14432_vm1, %v16413_v21  ;;  %14025 = vmatpush3.msra.mxu1 %v14769_v48 }
 0x797   :  { %14026 = vmatprep.mubr.msk.f32.mxu1 %vm14432_vm1, %v16413_v21  ;;  %13994 = vmatmul.mubr.f32.vlgmr.msra.gmra.mxu0 %v15943_v53 }
 0x798   :  { %14007 = vmatprep.subr.mxu0 %v16413_v21  ;;  %14027 = vmatmul.mubr.f32.vlgmr.msra.gmra.mxu1 %v15943_v53 }
 0x799   :  { %14040 = vmatprep.subr.mxu1 %v16413_v21  ;;  %14008 = vmatpush3.msra.mxu0 %v14673_v57 }
 0x79a   :  { %14041 = vmatpush3.msra.mxu1 %v14673_v57  ;;  %14009 = vmatprep.subr.mxu0 %v16413_v21 }
 0x79b   :  { %14042 = vmatprep.subr.mxu1 %v16413_v21  ;;  %14010 = vmatpush3.msra.mxu0 %v14681_v60 }
 0x79c   :  { %14043 = vmatpush3.msra.mxu1 %v14681_v60  ;;  %14011 = vmatprep.subr.mxu0 %v16413_v21 }
 0x79d   :  { %14044 = vmatprep.subr.mxu1 %v16413_v21  ;;  %14012 = vmatpush3.msra.mxu0 %v16480_v63 }
 0x79e   :  { %14045 = vmatpush3.msra.mxu1 %v16480_v63  ;;  %14013 = vmatprep.subr.mxu0 %v16413_v21 }
 0x79f   :  { %14046 = vmatprep.subr.mxu1 %v16413_v21  ;;  %14014 = vmatpush3.msra.mxu0 %v16481_v7 }
 0x7a0   :  { %14015 = vmatprep.mubr.msk.f32.mxu0 %vm14432_vm1, %v16413_v21  ;;  %14047 = vmatpush3.msra.mxu1 %v16481_v7 }
 0x7a1   :  { %14048 = vmatprep.mubr.msk.f32.mxu1 %vm14432_vm1, %v16413_v21  ;;  %14016 = vmatmul.mubr.f32.vlgmr.msra.gmra.mxu0 %v15962_v29 }
 0x7a2   :  { %14029 = vmatprep.subr.mxu0 %v16413_v21  ;;  %14049 = vmatmul.mubr.f32.vlgmr.msra.gmra.mxu1 %v15954_v25 }
 0x7a3   :  { %14062 = vmatprep.subr.mxu1 %v16413_v21  ;;  %14030 = vmatpush3.msra.mxu0 %v16482_v31 }
 0x7a4   :  { %14063 = vmatpush3.msra.mxu1 %v14673_v57  ;;  %14031 = vmatprep.subr.mxu0 %v16413_v21 }
 0x7a5   :  { %14064 = vmatprep.subr.mxu1 %v16413_v21  ;;  %14032 = vmatpush3.msra.mxu0 %v16483_v3 }
 0x7a6   :  { %14065 = vmatpush3.msra.mxu1 %v14681_v60  ;;  %14033 = vmatprep.subr.mxu0 %v16413_v21 }
 0x7a7   :  { %14066 = vmatprep.subr.mxu1 %v16413_v21  ;;  %14034 = vmatpush3.msra.mxu0 %v16484_v23 }
 0x7a8   :  { %14067 = vmatpush3.msra.mxu1 %v16480_v63  ;;  %14035 = vmatprep.subr.mxu0 %v16413_v21 }
 0x7a9   :  { %14068 = vmatprep.subr.mxu1 %v16413_v21  ;;  %14036 = vmatpush3.msra.mxu0 %v16485_v30  ;;  %v9942_v30 = vld [vmem:[#allocation3 + $0x90] sm:$0xff] }
 0x7aa   :  { %14037 = vmatprep.mubr.msk.f32.mxu0 %vm14432_vm1, %v16413_v21  ;;  %14069 = vmatpush3.msra.mxu1 %v16481_v7 }
 0x7ab   :  { %14070 = vmatprep.mubr.msk.f32.mxu1 %vm14432_vm1, %v16413_v21  ;;  %14038 = vmatmul.mubr.f32.vlgmr.msra.gmra.mxu0 %v15947_v12 }
 0x7ac   :  { %14051 = vmatprep.subr.mxu0 %v16413_v21  ;;  %14071 = vmatmul.mubr.f32.vlgmr.msra.gmra.mxu1 %v15943_v53 }
 0x7ad   :  { %14052 = vmatpush3.msra.mxu0 %v16486_v61  ;;  %14059 = vmatprep.mubr.msk.f32.mxu0 %vm14432_vm1, %v16413_v21 }
 0x7ae   :  { %14053 = vmatprep.subr.mxu0 %v16413_v21  ;;  %14084 = vmatprep.subr.mxu1 %v16413_v21 }
 0x7af   :  { %14054 = vmatpush3.msra.mxu0 %v16487_v1  ;;  %14085 = vmatpush3.msra.mxu1 %v16488_v17 }
 0x7b0   :  { %14055 = vmatprep.subr.mxu0 %v16413_v21  ;;  %14086 = vmatprep.subr.mxu1 %v16413_v21 }
 0x7b1   :  { %14056 = vmatpush3.msra.mxu0 %v16489_v22  ;;  %14087 = vmatpush3.msra.mxu1 %v16490_v34 }
 0x7b2   :  { %14057 = vmatprep.subr.mxu0 %v16413_v21  ;;  %14088 = vmatprep.subr.mxu1 %v16413_v21 }
 0x7b3   :  { %14058 = vmatpush3.msra.mxu0 %v16491_v59  ;;  %14089 = vmatpush3.msra.mxu1 %v16492_v28 }
 0x7b4   :  { %14060 = vmatmul.mubr.f32.vlgmr.msra.gmra.mxu0 %v15943_v53  ;;  %14090 = vmatprep.subr.mxu1 %v16413_v21 }
 0x7b5   :  { %14091 = vmatpush3.msra.mxu1 %v16493_v51  ;;  %14073 = vmatprep.subr.mxu0 %v16413_v21 }
 0x7b6   :  { %14092 = vmatprep.mubr.msk.f32.mxu1 %vm14432_vm1, %v16413_v21  ;;  %14106 = vmatprep.subr.mxu1 %v16413_v21 }
 0x7b7   :  { %14074 = vmatpush3.msra.mxu0 %v14464_v4  ;;  %14081 = vmatprep.mubr.msk.f32.mxu0 %vm14432_vm1, %v16413_v21 }
 0x7b8   :  { %14075 = vmatprep.subr.mxu0 %v16413_v21 }
 0x7b9   :  { %14076 = vmatpush3.msra.mxu0 %v14466_v5 }
 0x7ba   :  { %14077 = vmatprep.subr.mxu0 %v16413_v21 }
 0x7bb   :  { %14078 = vmatpush3.msra.mxu0 %v14468_v6 }
 0x7bc   :  { %14079 = vmatprep.subr.mxu0 %v16413_v21 }
 0x7bd   :  { %14080 = vmatpush3.msra.mxu0 %v14476_v9 }
 0x7be   :  { %14095 = vmatprep.subr.mxu0 %v16413_v21 }
 0x81e   :  { %v9137_v27 = vpop.f32.mrf.mxu1 }
 0x820   :  { %v13896_v26 = vpop.f32.mrf.mxu1 }
 0x826   :  { %v9294_v37 = vpop.f32.mrf.mxu1 }
 0x827   :  { %v9046_v24 = vpop.f32.mrf.mxu0 }
 0x828   :  { %v13918_v56 = vpop.f32.mrf.mxu1  ;;  %v9138_v17 = vadd.f32 %v9137_v27, %v9046_v24 }
 0x829   :  { %v13885_v2 = vpop.f32.mrf.mxu0 }
 0x82f   :  { %v9217_v0 = vpop.f32.mrf.mxu0 }
 0x830   :  { %v9452_v10 = vpop.f32.mrf.mxu1  ;;  %v9218_v34 = vadd.f32 %v9217_v0, %v9138_v17 }
 0x831   :  { %v13907_v62 = vpop.f32.mrf.mxu0 }
 0x832   :  { %v13940_v53 = vpop.f32.mrf.mxu1  ;;  %v9295_v59 = vadd.f32 %v9294_v37, %v9218_v34 }
 0x839   :  { %v9377_v12 = vpop.f32.mrf.mxu0 }
 0x83a   :  { %v9622_v25 = vpop.f32.mrf.mxu1  ;;  %v9378_v26 = vadd.f32 %v9377_v12, %v9295_v59 }
 0x83b   :  { %v13929_v58 = vpop.f32.mrf.mxu0 }
 0x83c   :  { %v13962_v29 = vpop.f32.mrf.mxu1  ;;  %v9453_v61 = vadd.f32 %v9452_v10, %v9378_v26 }
 0x83e   :  { %v9945_v23 = vadd.f32 %v9942_v30, %v9453_v61 }
 0x840   :  { %v11963_v7 = vmul.f32 -1.442695, %v9945_v23 }
 0x842   :  { %14338 = vpow2.f32 %v11963_v7  ;;  %v16156_v7 = vld [vmem:[%s16359_s1] ss:$0 sm:$0xff]  ;;  %s14433_s1 = smov [#allocation6]  }
 0x843   :  { %v9531_v28 = vpop.f32.mrf.mxu0  ;;  %s11941_s30 = sshll.u32 %s14433_s1, 4  ;;  %s11942_s30 = int_to_ptr.vmem [resolvable:$true] %s11941_s30 }
 0x844   :  { %v9779_v51 = vpop.f32.mrf.mxu1  ;;  %v9623_v62 = vadd.f32 %v9622_v25, %v9531_v28  ;;  %s14401_s4 = scalar_lea.vmem %s11942_s30, 128  ;;  %p14406_p11 = scmp.lt.s32.totalorder %s11942_s30, %s11942_s30 }
 0x845   :  { %v13951_v22 = vpop.f32.mrf.mxu0  ;;  %p14402_p10 = scmp.ne.s32.totalorder %s11942_s30, %s14401_s4  ;;  %p14407_p12 = scmp.lt.s32.totalorder %s14401_s4, %s14401_s4 }
 0x846   :  { %v13984_v1 = vpop.f32.mrf.mxu1  ;;  %v9943_v22 = vld [vmem:[#allocation3 + $0x98] sm:$0xff] }
 0x847   :  { %p14408_p13 = por %p14407_p12, %p14406_p11 }
 0x849   :  { %p14409_p0 = pnand %p14408_p13, %p14402_p10 }
 0x84d   :  { %v9702_v56 = vpop.f32.mrf.mxu0 }
 0x84e   :  { %v9937_v2 = vpop.f32.mrf.mxu1  ;;  %v9703_v31 = vadd.f32 %v9702_v56, %v9623_v62 }
 0x84f   :  { %v13973_v3 = vpop.f32.mrf.mxu0  ;;  %v14339_v30 = vpop.eup %14338 }
 0x850   :  { %v14006_v53 = vpop.f32.mrf.mxu1  ;;  %v9780_v58 = vadd.f32 %v9779_v51, %v9703_v31  ;;  %v9949_v61 = vadd.f32 1.0, %v14339_v30 }
 0x857   :  { %v9862_v27 = vpop.f32.mrf.mxu0 }
 0x858   :  { %v9863_v24 = vadd.f32 %v9862_v27, %v9780_v58  ;;  %v10125_v0 = vpop.f32.mrf.mxu1 }
 0x859   :  { %v13995_v29 = vpop.f32.mrf.mxu0 }
 0x85a   :  { %v9938_v37 = vadd.f32 %v9937_v2, %v9863_v24  ;;  %v14028_v1 = vpop.f32.mrf.mxu1 }
 0x85c   :  { %v9952_v59 = vadd.f32 %v9943_v22, %v9938_v37  ;;  %v9944_v22 = vld [vmem:[#allocation3 + $0xa0] sm:$0xff] }
 0x85e   :  { %v11964_v10 = vmul.f32 -1.442695, %v9952_v59 }
 0x860   :  { %14340 = vpow2.f32 %v11964_v10 }
 0x861   :  { %v10034_v12 = vpop.f32.mrf.mxu0  ;;  %14342 = vrcp.f32 %v9949_v61 }
 0x862   :  { %v10282_v17 = vpop.f32.mrf.mxu1  ;;  %v10035_v31 = vadd.f32 %v16156_v7, %v10034_v12 }
 0x863   :  { %v14017_v34 = vpop.f32.mrf.mxu0 }
 0x864   :  { %v14050_v3 = vpop.f32.mrf.mxu1  ;;  %v10126_v28 = vadd.f32 %v10125_v0, %v10035_v31 }
 0x86b   :  { %v10205_v23 = vpop.f32.mrf.mxu0 }
 0x86c   :  { %v10440_v25 = vpop.f32.mrf.mxu1  ;;  %v10206_v56 = vadd.f32 %v10205_v23, %v10126_v28 }
 0x86d   :  { %v14039_v51 = vpop.f32.mrf.mxu0  ;;  %v14341_v2 = vpop.eup %14340 }
 0x86e   :  { %v14072_v26 = vpop.f32.mrf.mxu1  ;;  %v10283_v62 = vadd.f32 %v10282_v17, %v10206_v56  ;;  %v9956_v58 = vadd.f32 1.0, %v14341_v2  ;;  %v14343_v37 = vpop.eup %14342 }
 0x870   :  { %14344 = vrcp.f32 %v9956_v58 }
 0x874   :  { %v10365_v53 = vpop.f32.mrf.mxu0 }
 0x875   :  { %v10366_v27 = vadd.f32 %v10365_v53, %v10283_v62 }
 0x876   :  { %v14061_v24 = vpop.f32.mrf.mxu0 }
 0x877   :  { %v10441_v29 = vadd.f32 %v10440_v25, %v10366_v27 }
 0x879   :  { %v10444_v1 = vmul.f32 %v14343_v37, %v10441_v29  ;;  %v11426_v37 = vld [vmem:[#allocation3 + $0xb0] sm:$0xff] }
 0x87b   :  { %v10445_v59 = vadd.f32 %v10444_v1, %v9944_v22 }
 0x87d   :  { %14346 = vtanh.f32 %v10445_v59  ;;  %v14345_v10 = vpop.eup %14344 }
 0x87e   :  { %v10447_v12 = vsub.f32 1.0, %v14345_v10  ;;  %v10449_v0 = vmul.f32 %v14345_v10, %v15939_v8 }
 0x88a   :  { %v14347_v34 = vpop.eup %14346 }
 0x88b   :  { %v10448_v30 = vmul.f32 %v14347_v34, %v10447_v12 }
 0x88d   :  { %v16160_v3 = vadd.f32 %v10449_v0, %v10448_v30 }
 0x88f   :  { %v10452_v17 = vsel %vm31_vm0, %v16160_v3, 0 }
 0x890   :  { %v16164_v61 = vand.u32 4294901760, %v10452_v17 }
 0x892   :  { %14093 = vmatmul.mubr.f32.vlgmr.msra.gmra.mxu1 %v16164_v61  ;;  %v16168_v31 = vsub.f32 %v10452_v17, %v16164_v61 }
 0x893   :  { %14107 = vmatpush3.msra.mxu1 %v14464_v4  ;;  %14114 = vmatprep.mubr.msk.f32.mxu1 %vm14432_vm1, %v16413_v21 }
 0x894   :  { %14108 = vmatprep.subr.mxu1 %v16413_v21  ;;  %v16175_v8 = vand.u32 4294901760, %v16168_v31 }
 0x895   :  { %14109 = vmatpush3.msra.mxu1 %v14466_v5 }
 0x896   :  { %14110 = vmatprep.subr.mxu1 %v16413_v21  ;;  %v10526_v23 = vsub.f32 %v16168_v31, %v16175_v8 }
 0x897   :  { %14111 = vmatpush3.msra.mxu1 %v14468_v6 }
 0x898   :  { %14112 = vmatprep.subr.mxu1 %v16413_v21  ;;  %v16183_v25 = vand.u32 4294901760, %v10526_v23 }
 0x899   :  { %14113 = vmatpush3.msra.mxu1 %v14476_v9 }
 0x89a   :  { %14115 = vmatmul.mubr.f32.vlgmr.msra.gmra.mxu1 %v16175_v8  ;;  %14128 = vmatprep.subr.mxu1 %v16413_v21 }
 0x89b   :  { %14082 = vmatmul.mubr.f32.vlgmr.msra.gmra.mxu0 %v16183_v25  ;;  %14129 = vmatpush3.msra.mxu1 %v14464_v4  ;;  %v16494_v4 = vld [vmem:[#allocation21_spill] sm:$0xff] }
 0x89c   :  { %14096 = vmatpush3.msra.mxu0 %v14482_v11  ;;  %14130 = vmatprep.subr.mxu1 %v16413_v21  ;;  %v16498_v11 = vld [vmem:[#allocation26_spill] sm:$0xff] }
 0x89d   :  { %14097 = vmatprep.subr.mxu0 %v16413_v21  ;;  %14131 = vmatpush3.msra.mxu1 %v14466_v5  ;;  %v16495_v5 = vld [vmem:[#allocation19_spill] sm:$0xff] }
 0x89e   :  { %14098 = vmatpush3.msra.mxu0 %v14487_v13  ;;  %14132 = vmatprep.subr.mxu1 %v16413_v21  ;;  %v16499_v13 = vld [vmem:[#allocation23_spill] sm:$0xff] }
 0x89f   :  { %14099 = vmatprep.subr.mxu0 %v16413_v21  ;;  %14133 = vmatpush3.msra.mxu1 %v14468_v6  ;;  %v16496_v6 = vld [vmem:[#allocation22_spill] sm:$0xff] }
 0x8a0   :  { %14100 = vmatpush3.msra.mxu0 %v14490_v14  ;;  %14134 = vmatprep.subr.mxu1 %v16413_v21  ;;  %v16500_v14 = vld [vmem:[#allocation25_spill] sm:$0xff] }
 0x8a1   :  { %14101 = vmatprep.subr.mxu0 %v16413_v21  ;;  %14103 = vmatprep.mubr.msk.f32.mxu0 %vm14432_vm1, %v16413_v21 }
 0x8a2   :  { %14102 = vmatpush3.msra.mxu0 %v14494_v15  ;;  %14135 = vmatpush3.msra.mxu1 %v14476_v9  ;;  %v16497_v9 = vld [vmem:[#allocation24_spill] sm:$0xff]  ;;  %v16501_v15 = vld [vmem:[#allocation27_spill] sm:$0xff] }
 0x8a3   :  { %14136 = vmatprep.mubr.msk.f32.mxu1 %vm14432_vm1, %v16413_v21  ;;  %14104 = vmatmul.mubr.f32.vlgmr.msra.gmra.mxu0 %v16168_v31 }
 0x8a4   :  { %14117 = vmatprep.subr.mxu0 %v16413_v21  ;;  %14137 = vmatmul.mubr.f32.vlgmr.msra.gmra.mxu1 %v16164_v61 }
 0x8a5   :  { %14150 = vmatprep.subr.mxu1 %v16413_v21  ;;  %14118 = vmatpush3.msra.mxu0 %v14498_v16  ;;  %v16502_v16 = vld [vmem:[#allocation28_spill] sm:$0xff] }
 0x8a6   :  { %14151 = vmatpush3.msra.mxu1 %v14629_v50  ;;  %14119 = vmatprep.subr.mxu0 %v16413_v21 }
 0x8a7   :  { %14152 = vmatprep.subr.mxu1 %v16413_v21  ;;  %14120 = vmatpush3.msra.mxu0 %v14504_v18 }
 0x8a8   :  { %14153 = vmatpush3.msra.mxu1 %v14640_v52  ;;  %14121 = vmatprep.subr.mxu0 %v16413_v21 }
 0x8a9   :  { %14154 = vmatprep.subr.mxu1 %v16413_v21  ;;  %14122 = vmatpush3.msra.mxu0 %v14507_v19 }
 0x8aa   :  { %14155 = vmatpush3.msra.mxu1 %v14649_v54  ;;  %14123 = vmatprep.subr.mxu0 %v16413_v21 }
 0x8ab   :  { %14156 = vmatprep.subr.mxu1 %v16413_v21  ;;  %14124 = vmatpush3.msra.mxu0 %v14511_v20 }
 0x8ac   :  { %14125 = vmatprep.mubr.msk.f32.mxu0 %vm14432_vm1, %v16413_v21  ;;  %14157 = vmatpush3.msra.mxu1 %v14655_v55 }
 0x8ad   :  { %14158 = vmatprep.mubr.msk.f32.mxu1 %vm14432_vm1, %v16413_v21  ;;  %14126 = vmatmul.mubr.f32.vlgmr.msra.gmra.mxu0 %v16164_v61 }
 0x8ae   :  { %14139 = vmatprep.subr.mxu0 %v16413_v21  ;;  %14159 = vmatmul.mubr.f32.vlgmr.msra.gmra.mxu1 %v16164_v61 }
 0x8af   :  { %14172 = vmatprep.subr.mxu1 %v16413_v21  ;;  %14140 = vmatpush3.msra.mxu0 %v14559_v33 }
 0x8b0   :  { %14173 = vmatpush3.msra.mxu1 %v14559_v33  ;;  %14141 = vmatprep.subr.mxu0 %v16413_v21 }
 0x8b1   :  { %14174 = vmatprep.subr.mxu1 %v16413_v21  ;;  %14142 = vmatpush3.msra.mxu0 %v14567_v36 }
 0x8b2   :  { %14175 = vmatpush3.msra.mxu1 %v14567_v36  ;;  %14143 = vmatprep.subr.mxu0 %v16413_v21 }
 0x8b3   :  { %14176 = vmatprep.subr.mxu1 %v16413_v21  ;;  %14144 = vmatpush3.msra.mxu0 %v14576_v39 }
 0x8b4   :  { %14177 = vmatpush3.msra.mxu1 %v14576_v39  ;;  %14145 = vmatprep.subr.mxu0 %v16413_v21 }
 0x8b5   :  { %14178 = vmatprep.subr.mxu1 %v16413_v21  ;;  %14146 = vmatpush3.msra.mxu0 %v14583_v40 }
 0x8b6   :  { %14147 = vmatprep.mubr.msk.f32.mxu0 %vm14432_vm1, %v16413_v21  ;;  %14179 = vmatpush3.msra.mxu1 %v14583_v40 }
 0x8b7   :  { %14180 = vmatprep.mubr.msk.f32.mxu1 %vm14432_vm1, %v16413_v21  ;;  %14148 = vmatmul.mubr.f32.vlgmr.msra.gmra.mxu0 %v16183_v25 }
 0x8b8   :  { %14161 = vmatprep.subr.mxu0 %v16413_v21  ;;  %14181 = vmatmul.mubr.f32.vlgmr.msra.gmra.mxu1 %v16175_v8 }
 0x8b9   :  { %14194 = vmatprep.subr.mxu1 %v16413_v21  ;;  %14162 = vmatpush3.msra.mxu0 %v14572_v38 }
 0x8ba   :  { %14195 = vmatpush3.msra.mxu1 %v14559_v33  ;;  %14163 = vmatprep.subr.mxu0 %v16413_v21 }
 0x8bb   :  { %14196 = vmatprep.subr.mxu1 %v16413_v21  ;;  %14164 = vmatpush3.msra.mxu0 %v14586_v41 }
 0x8bc   :  { %14197 = vmatpush3.msra.mxu1 %v14567_v36  ;;  %14165 = vmatprep.subr.mxu0 %v16413_v21 }
 0x8bd   :  { %14198 = vmatprep.subr.mxu1 %v16413_v21  ;;  %14166 = vmatpush3.msra.mxu0 %v14596_v43 }
 0x8be   :  { %14199 = vmatpush3.msra.mxu1 %v14576_v39  ;;  %14167 = vmatprep.subr.mxu0 %v16413_v21 }
 0x8bf   :  { %14200 = vmatprep.subr.mxu1 %v16413_v21  ;;  %14168 = vmatpush3.msra.mxu0 %v14607_v45 }
 0x8c0   :  { %14169 = vmatprep.mubr.msk.f32.mxu0 %vm14432_vm1, %v16413_v21  ;;  %14201 = vmatpush3.msra.mxu1 %v14583_v40 }
 0x8c1   :  { %14202 = vmatprep.mubr.msk.f32.mxu1 %vm14432_vm1, %v16413_v21  ;;  %14170 = vmatmul.mubr.f32.vlgmr.msra.gmra.mxu0 %v16168_v31 }
 0x8c2   :  { %14183 = vmatprep.subr.mxu0 %v16413_v21  ;;  %14203 = vmatmul.mubr.f32.vlgmr.msra.gmra.mxu1 %v16164_v61 }
 0x8c3   :  { %14216 = vmatprep.subr.mxu1 %v16413_v21  ;;  %14184 = vmatpush3.msra.mxu0 %v14591_v42 }
 0x8c4   :  { %14217 = vmatpush3.msra.mxu1 %v14743_v32  ;;  %14185 = vmatprep.subr.mxu0 %v16413_v21 }
 0x8c5   :  { %14218 = vmatprep.subr.mxu1 %v16413_v21  ;;  %14186 = vmatpush3.msra.mxu0 %v14604_v44 }
 0x8c6   :  { %14219 = vmatpush3.msra.mxu1 %v14754_v35  ;;  %14187 = vmatprep.subr.mxu0 %v16413_v21 }
 0x8c7   :  { %14220 = vmatprep.subr.mxu1 %v16413_v21  ;;  %14188 = vmatpush3.msra.mxu0 %v14616_v47 }
 0x8c8   :  { %14221 = vmatpush3.msra.mxu1 %v14763_v46  ;;  %14189 = vmatprep.subr.mxu0 %v16413_v21  ;;  %v11425_v46 = vld [vmem:[#allocation3 + $0xa8] sm:$0xff] }
 0x8c9   :  { %14222 = vmatprep.subr.mxu1 %v16413_v21  ;;  %14190 = vmatpush3.msra.mxu0 %v14625_v49 }
 0x8ca   :  { %14191 = vmatprep.mubr.msk.f32.mxu0 %vm14432_vm1, %v16413_v21  ;;  %14223 = vmatpush3.msra.mxu1 %v14769_v48 }
 0x8cb   :  { %14224 = vmatprep.mubr.msk.f32.mxu1 %vm14432_vm1, %v16413_v21  ;;  %14192 = vmatmul.mubr.f32.vlgmr.msra.gmra.mxu0 %v16164_v61 }
 0x8cc   :  { %14205 = vmatprep.subr.mxu0 %v16413_v21  ;;  %14225 = vmatmul.mubr.f32.vlgmr.msra.gmra.mxu1 %v16164_v61 }
 0x8cd   :  { %14238 = vmatprep.subr.mxu1 %v16413_v21  ;;  %14206 = vmatpush3.msra.mxu0 %v14673_v57 }
 0x8ce   :  { %14239 = vmatpush3.msra.mxu1 %v14673_v57  ;;  %14207 = vmatprep.subr.mxu0 %v16413_v21 }
 0x8cf   :  { %14240 = vmatprep.subr.mxu1 %v16413_v21  ;;  %14208 = vmatpush3.msra.mxu0 %v14681_v60 }
 0x8d0   :  { %14241 = vmatpush3.msra.mxu1 %v14681_v60  ;;  %14209 = vmatprep.subr.mxu0 %v16413_v21 }
 0x8d1   :  { %14242 = vmatprep.subr.mxu1 %v16413_v21  ;;  %14210 = vmatpush3.msra.mxu0 %v16480_v63 }
 0x8d2   :  { %14243 = vmatpush3.msra.mxu1 %v16480_v63  ;;  %14211 = vmatprep.subr.mxu0 %v16413_v21 }
 0x8d3   :  { %14244 = vmatprep.subr.mxu1 %v16413_v21  ;;  %14212 = vmatpush3.msra.mxu0 %v16494_v4 }
 0x8d4   :  { %14213 = vmatprep.mubr.msk.f32.mxu0 %vm14432_vm1, %v16413_v21  ;;  %14245 = vmatpush3.msra.mxu1 %v16494_v4 }
 0x8d5   :  { %14246 = vmatprep.mubr.msk.f32.mxu1 %vm14432_vm1, %v16413_v21  ;;  %14214 = vmatmul.mubr.f32.vlgmr.msra.gmra.mxu0 %v16183_v25 }
 0x8d6   :  { %14227 = vmatprep.subr.mxu0 %v16413_v21  ;;  %14247 = vmatmul.mubr.f32.vlgmr.msra.gmra.mxu1 %v16175_v8 }
 0x8d7   :  { %14260 = vmatprep.subr.mxu1 %v16413_v21  ;;  %14228 = vmatpush3.msra.mxu0 %v16495_v5 }
 0x8d8   :  { %14261 = vmatpush3.msra.mxu1 %v14673_v57  ;;  %14229 = vmatprep.subr.mxu0 %v16413_v21 }
 0x8d9   :  { %14262 = vmatprep.subr.mxu1 %v16413_v21  ;;  %14230 = vmatpush3.msra.mxu0 %v16496_v6 }
 0x8da   :  { %14263 = vmatpush3.msra.mxu1 %v14681_v60  ;;  %14231 = vmatprep.subr.mxu0 %v16413_v21 }
 0x8db   :  { %14264 = vmatprep.subr.mxu1 %v16413_v21  ;;  %14232 = vmatpush3.msra.mxu0 %v16497_v9 }
 0x8dc   :  { %14265 = vmatpush3.msra.mxu1 %v16480_v63  ;;  %14233 = vmatprep.subr.mxu0 %v16413_v21 }
 0x8dd   :  { %14266 = vmatprep.subr.mxu1 %v16413_v21  ;;  %14234 = vmatpush3.msra.mxu0 %v16498_v11 }
 0x8de   :  { %14235 = vmatprep.mubr.msk.f32.mxu0 %vm14432_vm1, %v16413_v21  ;;  %14267 = vmatpush3.msra.mxu1 %v16494_v4 }
 0x8df   :  { %14268 = vmatprep.mubr.msk.f32.mxu1 %vm14432_vm1, %v16413_v21  ;;  %14236 = vmatmul.mubr.f32.vlgmr.msra.gmra.mxu0 %v16168_v31 }
 0x8e0   :  { %14249 = vmatprep.subr.mxu0 %v16413_v21  ;;  %14269 = vmatmul.mubr.f32.vlgmr.msra.gmra.mxu1 %v16164_v61 }
 0x8e1   :  { %14250 = vmatpush3.msra.mxu0 %v16499_v13  ;;  %14257 = vmatprep.mubr.msk.f32.mxu0 %vm14432_vm1, %v16413_v21 }
 0x8e2   :  { %14251 = vmatprep.subr.mxu0 %v16413_v21 }
 0x8e3   :  { %14252 = vmatpush3.msra.mxu0 %v16500_v14 }
 0x8e4   :  { %14253 = vmatprep.subr.mxu0 %v16413_v21 }
 0x8e5   :  { %14254 = vmatpush3.msra.mxu0 %v16501_v15 }
 0x8e6   :  { %14255 = vmatprep.subr.mxu0 %v16413_v21 }
 0x8e7   :  { %14256 = vmatpush3.msra.mxu0 %v16502_v16 }
 0x8e8   :  { %14258 = vmatmul.mubr.f32.vlgmr.msra.gmra.mxu0 %v16164_v61 }
 0x952   :  { %v10620_v18 = vpop.f32.mrf.mxu1 }
 0x954   :  { %v14094_v19 = vpop.f32.mrf.mxu1 }
 0x955   :  { %v11427_v19 = vld [vmem:[#allocation3 + $0xb8] sm:$0xff] }
 0x95a   :  { %v10777_v20 = vpop.f32.mrf.mxu1 }
 0x95b   :  { %v10529_v33 = vpop.f32.mrf.mxu0 }
 0x95c   :  { %v14116_v36 = vpop.f32.mrf.mxu1  ;;  %v10621_v49 = vadd.f32 %v10620_v18, %v10529_v33 }
 0x95d   :  { %v14083_v38 = vpop.f32.mrf.mxu0 }
 0x963   :  { %v10700_v39 = vpop.f32.mrf.mxu0 }
 0x964   :  { %v10935_v40 = vpop.f32.mrf.mxu1  ;;  %v10701_v50 = vadd.f32 %v10700_v39, %v10621_v49 }
 0x965   :  { %v14105_v41 = vpop.f32.mrf.mxu0 }
 0x966   :  { %v14138_v42 = vpop.f32.mrf.mxu1  ;;  %v10778_v55 = vadd.f32 %v10777_v20, %v10701_v50 }
 0x96d   :  { %v10860_v43 = vpop.f32.mrf.mxu0 }
 0x96e   :  { %v11105_v44 = vpop.f32.mrf.mxu1  ;;  %v10861_v32 = vadd.f32 %v10860_v43, %v10778_v55 }
 0x96f   :  { %v14127_v45 = vpop.f32.mrf.mxu0 }
 0x970   :  { %v14160_v47 = vpop.f32.mrf.mxu1  ;;  %v10936_v35 = vadd.f32 %v10935_v40, %v10861_v32 }
 0x972   :  { %v11428_v63 = vadd.f32 %v11425_v46, %v10936_v35 }
 0x974   :  { %v11965_v2 = vmul.f32 -1.442695, %v11428_v63 }
 0x976   :  { %14348 = vpow2.f32 %v11965_v2 }
 0x977   :  { %v11014_v52 = vpop.f32.mrf.mxu0 }
 0x978   :  { %v11262_v54 = vpop.f32.mrf.mxu1  ;;  %v11106_v51 = vadd.f32 %v11105_v44, %v11014_v52 }
 0x979   :  { %v14149_v57 = vpop.f32.mrf.mxu0 }
 0x97a   :  { %v14182_v60 = vpop.f32.mrf.mxu1 }
 0x981   :  { %v11185_v48 = vpop.f32.mrf.mxu0 }
 0x982   :  { %v11420_v21 = vpop.f32.mrf.mxu1  ;;  %v11186_v56 = vadd.f32 %v11185_v48, %v11106_v51 }
 0x983   :  { %v14171_v28 = vpop.f32.mrf.mxu0  ;;  %v14349_v0 = vpop.eup %14348 }
 0x984   :  { %v14204_v26 = vpop.f32.mrf.mxu1  ;;  %v11263_v62 = vadd.f32 %v11262_v54, %v11186_v56  ;;  %v11432_v17 = vadd.f32 1.0, %v14349_v0 }
 0x98b   :  { %v11345_v53 = vpop.f32.mrf.mxu0 }
 0x98c   :  { %v11346_v58 = vadd.f32 %v11345_v53, %v11263_v62  ;;  %v11608_v27 = vpop.f32.mrf.mxu1 }
 0x98d   :  { %v14193_v24 = vpop.f32.mrf.mxu0 }
 0x98e   :  { %v11421_v29 = vadd.f32 %v11420_v21, %v11346_v58  ;;  %v14226_v22 = vpop.f32.mrf.mxu1 }
 0x990   :  { %v11435_v1 = vadd.f32 %v11426_v37, %v11421_v29 }
 0x992   :  { %v11966_v59 = vmul.f32 -1.442695, %v11435_v1 }
 0x994   :  { %14350 = vpow2.f32 %v11966_v59 }
 0x995   :  { %v11517_v10 = vpop.f32.mrf.mxu0  ;;  %14352 = vrcp.f32 %v11432_v17 }
 0x996   :  { %v11765_v12 = vpop.f32.mrf.mxu1  ;;  %v11518_v61 = vadd.f32 %v16156_v7, %v11517_v10 }
 0x997   :  { %v14215_v34 = vpop.f32.mrf.mxu0 }
 0x998   :  { %v14248_v30 = vpop.f32.mrf.mxu1  ;;  %v11609_v23 = vadd.f32 %v11608_v27, %v11518_v61 }
 0x99f   :  { %v11688_v31 = vpop.f32.mrf.mxu0 }
 0x9a0   :  { %v11923_v8 = vpop.f32.mrf.mxu1  ;;  %v11689_v5 = vadd.f32 %v11688_v31, %v11609_v23 }
 0x9a1   :  { %v14237_v25 = vpop.f32.mrf.mxu0  ;;  %v14351_v6 = vpop.eup %14350 }
 0x9a2   :  { %v14270_v4 = vpop.f32.mrf.mxu1  ;;  %v11766_v9 = vadd.f32 %v11765_v12, %v11689_v5  ;;  %v11439_v13 = vadd.f32 1.0, %v14351_v6  ;;  %v14353_v18 = vpop.eup %14352 }
 0x9a4   :  { %14354 = vrcp.f32 %v11439_v13 }
 0x9a8   :  { %v11848_v11 = vpop.f32.mrf.mxu0 }
 0x9a9   :  { %v11849_v14 = vadd.f32 %v11848_v11, %v11766_v9 }
 0x9aa   :  { %v14259_v15 = vpop.f32.mrf.mxu0 }
 0x9ab   :  { %v11924_v16 = vadd.f32 %v11923_v8, %v11849_v14 }
 0x9ad   :  { %v11927_v20 = vmul.f32 %v14353_v18, %v11924_v16 }
 0x9af   :  { %v11928_v33 = vadd.f32 %v11927_v20, %v11427_v19 }
 0x9b1   :  { %14356 = vtanh.f32 %v11928_v33  ;;  %v14355_v7 = vpop.eup %14354 }
 0x9b2   :  { %v11930_v36 = vsub.f32 1.0, %v14355_v7  ;;  %v11932_v40 = vmul.f32 %v14355_v7, %v16160_v3 }
 0x9be   :  { %v14357_v38 = vpop.eup %14356 }
 0x9bf   :  { %v11931_v39 = vmul.f32 %v14357_v38, %v11930_v36 }
 0x9c1   :  { %v11933_v41 = vadd.f32 %v11932_v40, %v11931_v39 }
 0x9c3   :  { %11934 = vst.msk [vmem:[#allocation6] sm:$0xff] %vm31_vm0, %v11933_v41 }
 0x9c4   :  { %14412 = shalt.err (!%p14409_p0)
}
 0x9c5   :  { %11944 = dma.vmem_to_hbm [thread:$0]  %s11942_s30, 128, %s16361_s3, [#allocation5]  }
 0x9c6   :  { %14425 = dma.done.wait [#allocation5], 128  }
 0x9c7   :  { %14426 = vsyncadd [#allocation5], 4294967168 }
 0x9c8   :  { %11948 = vsyncpa [#allocation4], 1 }
 0x9c9   :  { %11949 = vsyncpa [#allocation5], 1 }

</bundles_post_ra>
